<compile_context>
chip_gen: v6e
topology: v6e:2x2x1
jax: 0.10.0
libtpu: 0.0.40
codegen_flags: <defaults>
</compile_context>

<pallas_src>
import functools

import numpy as np

import jax
import jax.numpy as jnp
from jax import lax
from jax.experimental import pallas as pl
from jax.experimental.pallas import tpu as pltpu

EPS = 1e-5


# ----------------------------- Pallas kernels -------------------------------

def _bn_tanh_f32(y, gamma, beta, m_valid):
    """Training-mode BatchNorm (stats over the m_valid valid columns) + tanh.

    y: (Cout, Mp) f32 conv output in transposed (lane-dense) layout.  Padded
    columns of y are exactly zero (zero patch columns), so they contribute
    nothing to sum / sum-of-squares; we divide by the true M.
    """
    inv_m = 1.0 / float(m_valid)
    s = jnp.sum(y, axis=1, keepdims=True)           # (Cout, 1) lane reduce
    ss = jnp.sum(y * y, axis=1, keepdims=True)      # (Cout, 1)
    mean = s * inv_m
    var = ss * inv_m - mean * mean                  # biased variance
    scale = gamma * lax.rsqrt(var + EPS)
    bias = beta - mean * scale
    return jnp.tanh(y * scale + bias)


def _conv_bn_tanh_kernel(m_valid, w_ref, pT_ref, g_ref, b_ref, o_ref):
    """Fused conv (as W @ patches^T) + BatchNorm(train) + tanh."""
    y = jnp.dot(w_ref[...], pT_ref[...], preferred_element_type=jnp.float32)
    o_ref[...] = _bn_tanh_f32(y, g_ref[...], b_ref[...], m_valid)


def _conv_bn_tanh_pool_kernel(m_valid, w_ref, pT_ref, g_ref, b_ref, s_ref, o_ref):
    """Fused conv + BatchNorm(train) + tanh + AvgPool(1,2,2).

    The pool is a second matmul against a constant selection matrix S with
    entries in {0, 0.25}: out^T = tanh(...)^T @ S.  Padded rows/cols of S are
    zero, so padded activation columns never leak into the pooled output.
    """
    y = jnp.dot(w_ref[...], pT_ref[...], preferred_element_type=jnp.float32)
    z = _bn_tanh_f32(y, g_ref[...], b_ref[...], m_valid)
    o_ref[...] = jnp.dot(z, s_ref[...], preferred_element_type=jnp.float32)


# ------------------------------- glue helpers -------------------------------

def _round_up(v, m):
    return (v + m - 1) // m * m


def _im2col_T(xc, kd, kh, kw, pad_d):
    """xc: (Cin, N, D, H, W) -> patches^T (Cin*kd*kh*kw, N*Do*Ho*Wo).

    Row order is (cin, dz, dy, dx) with dx fastest, matching
    torch_weight.reshape(Cout, -1); column order is (n, do, ho, wo).
    """
    C, N, D, H, W = xc.shape
    xp = jnp.pad(xc, ((0, 0), (0, 0), (pad_d, pad_d), (0, 0), (0, 0)))
    Do = D + 2 * pad_d - kd + 1
    Ho = H - kh + 1
    Wo = W - kw + 1
    views = [xp[:, :, dz:dz + Do, dy:dy + Ho, dx:dx + Wo]
             for dz in range(kd) for dy in range(kh) for dx in range(kw)]
    p = jnp.stack(views, axis=1)                     # (C, KK, N, Do, Ho, Wo)
    p = p.reshape(C * kd * kh * kw, N * Do * Ho * Wo)
    return p, (Do, Ho, Wo)


def _pool_matrix(N, D, H, W, m_pad, p_pad):
    """(m_pad, p_pad) matrix S s.t. z^T @ S = AvgPool(1,2,2)(z)^T (both padded)."""
    Hp, Wp = H // 2, W // 2
    S = np.zeros((m_pad, p_pad), np.float32)
    for n in range(N):
        for d in range(D):
            for h in range(2 * Hp):
                for w in range(2 * Wp):
                    m = ((n * D + d) * H + h) * W + w
                    p = ((n * D + d) * Hp + h // 2) * Wp + w // 2
                    S[m, p] = 0.25
    return jnp.asarray(S)


def _conv_bn_tanh(xc, w, gamma, beta, *, kd, kh, kw, pad_d, pool_hw=False):
    """One fused Conv3d(bias=False)+BN(train)+Tanh[(+AvgPool 1x2x2)] layer.

    xc: (Cin, N, D, H, W) channel-major input.
    Returns (Cout, Mp_or_Pp) f32 transposed output plus the conv output dims.
    """
    Cin, N, D, H, W = xc.shape
    Cout = w.shape[0]
    K = Cin * kd * kh * kw

    pT, (Do, Ho, Wo) = _im2col_T(xc, kd, kh, kw, pad_d)
    M = N * Do * Ho * Wo
    Mp = _round_up(M, 128)
    if Mp != M:   # zero columns: contribute 0 to conv output and to the stats
        pT = jnp.pad(pT, ((0, 0), (0, Mp - M)))
    pT = pT.astype(jnp.bfloat16)
    w_mat = w.reshape(Cout, K).astype(jnp.bfloat16)
    g = gamma.reshape(Cout, 1).astype(jnp.float32)
    b = beta.reshape(Cout, 1).astype(jnp.float32)

    full = lambda i: (0, 0)
    in_specs = [
        pl.BlockSpec((Cout, K), full),    # weights (bf16)
        pl.BlockSpec((K, Mp), full),      # patches^T (bf16) -- lane-dense
        pl.BlockSpec((Cout, 1), full),    # gamma
        pl.BlockSpec((Cout, 1), full),    # beta
    ]
    operands = [w_mat, pT, g, b]
    flops = 2 * Cout * K * Mp
    bytes_accessed = pT.size * 2 + w_mat.size * 2 + 2 * Cout * 4

    if pool_hw:
        Hp, Wp = Ho // 2, Wo // 2
        P = N * Do * Hp * Wp
        Pp = _round_up(P, 128)
        S = _pool_matrix(N, Do, Ho, Wo, Mp, Pp)
        in_specs.append(pl.BlockSpec((Mp, Pp), full))
        operands.append(S)
        kern = functools.partial(_conv_bn_tanh_pool_kernel, M)
        out_cols = Pp
        flops += 2 * Cout * Mp * Pp
        bytes_accessed += S.size * 4 + Cout * Pp * 4
    else:
        kern = functools.partial(_conv_bn_tanh_kernel, M)
        out_cols = Mp
        bytes_accessed += Cout * Mp * 4

    outT = pl.pallas_call(
        kern,
        out_shape=jax.ShapeDtypeStruct((Cout, out_cols), jnp.float32),
        grid=(1,),
        in_specs=in_specs,
        out_specs=pl.BlockSpec((Cout, out_cols), full),
        compiler_params=pltpu.CompilerParams(
            dimension_semantics=("arbitrary",)),
        cost_estimate=pl.CostEstimate(
            flops=int(flops),
            transcendentals=int(Cout * Mp),
            bytes_accessed=int(bytes_accessed)),
    )(*operands)
    return outT, (Do, Ho, Wo)


@jax.jit
def backbone_step2(x, w1, g1, b1, w2, g2, b2):
    """x: (N, 16, D, H, W) NCDHW -> (N, 32, D, (H-6)//2, (W-6)//2)."""
    N = x.shape[0]
    xc = jnp.transpose(x, (1, 0, 2, 3, 4))          # channel-major (C,N,D,H,W)

    # Layer 1: Conv3d(16->16, (3,5,5), pad=(1,0,0)) + BN1 + Tanh  (one kernel)
    y1T, (D1, H1, W1) = _conv_bn_tanh(xc, w1, g1, b1,
                                      kd=3, kh=5, kw=5, pad_d=1)
    C1 = w1.shape[0]
    y1c = y1T[:, :N * D1 * H1 * W1].reshape(C1, N, D1, H1, W1)

    # Layer 2: Conv3d(16->32, (3,3,3), pad=(1,0,0)) + BN2 + Tanh + AvgPool(1,2,2)
    # (one kernel; pool fused as a matmul epilogue)
    outT, (D2, H2, W2) = _conv_bn_tanh(y1c, w2, g2, b2,
                                       kd=3, kh=3, kw=3, pad_d=1, pool_hw=True)
    C2 = w2.shape[0]
    Hp, Wp = H2 // 2, W2 // 2
    P = N * D2 * Hp * Wp
    out = outT[:, :P].reshape(C2, N, D2, Hp, Wp).transpose(1, 0, 2, 3, 4)
    return out


# --------------------------- pure-JAX reference -----------------------------

def reference(x, w1, g1, b1, w2, g2, b2):
    def block(x, w, g, b, pad_d):
        y = lax.conv_general_dilated(
            x, w, window_strides=(1, 1, 1),
            padding=[(pad_d, pad_d), (0, 0), (0, 0)],
            dimension_numbers=('NCDHW', 'OIDHW', 'NCDHW'))
        mean = jnp.mean(y, axis=(0, 2, 3, 4), keepdims=True)
        var = jnp.mean((y - mean) ** 2, axis=(0, 2, 3, 4), keepdims=True)
        yn = (y - mean) / jnp.sqrt(var + EPS)
        return jnp.tanh(yn * g.reshape(1, -1, 1, 1, 1) + b.reshape(1, -1, 1, 1, 1))

    y = block(x, w1, g1, b1, 1)
    y = block(y, w2, g2, b2, 1)
    N, C, D, H, W = y.shape
    return y.reshape(N, C, D, H // 2, 2, W // 2, 2).mean(axis=(4, 6))


# ----------------------------------- main ------------------------------------

if __name__ == "__main__":
    key = jax.random.PRNGKey(0)
    ks = jax.random.split(key, 7)
    # Shapes consistent with the module: Cin must be 16.
    x = jax.random.normal(ks[0], (2, 16, 4, 16, 16), jnp.float32)

    w1 = 0.05 * jax.random.normal(ks[1], (16, 16, 3, 5, 5), jnp.float32)
    w2 = 0.05 * jax.random.normal(ks[2], (32, 16, 3, 3, 3), jnp.float32)
    g1 = 1.0 + 0.1 * jax.random.normal(ks[3], (16,), jnp.float32)
    b1 = 0.1 * jax.random.normal(ks[4], (16,), jnp.float32)
    g2 = 1.0 + 0.1 * jax.random.normal(ks[5], (32,), jnp.float32)
    b2 = 0.1 * jax.random.normal(ks[6], (32,), jnp.float32)

    out = jax.block_until_ready(backbone_step2(x, w1, g1, b1, w2, g2, b2))
    assert out.shape == (2, 32, 4, 5, 5), out.shape

    ref = jax.block_until_ready(reference(x, w1, g1, b1, w2, g2, b2))
    max_err = float(jnp.max(jnp.abs(out - ref)))
    # bf16 matmul operands (f32 accumulation) => expect ~2-5e-3 vs f32 reference.
    assert max_err < 2e-2, f"mismatch vs reference: {max_err}"

    print("KERNEL_OK")
</pallas_src>

<mosaic_0001>
module attributes {stable_mosaic.version = 11 : i64} {
  func.func @_conv_bn_tanh_kernel(%arg0: i32, %arg1: memref<16x1200xbf16, #tpu.memory_space<vmem>>, %arg2: memref<1200x1152xbf16, #tpu.memory_space<vmem>>, %arg3: memref<16x1xf32, #tpu.memory_space<vmem>>, %arg4: memref<16x1xf32, #tpu.memory_space<vmem>>, %arg5: memref<16x1152xf32, #tpu.memory_space<vmem>>) attributes {dimension_semantics = [#tpu.dimension_semantics<arbitrary>], iteration_bounds = array<i64: 1>, scalar_prefetch = 0 : i64, scratch_operands = 0 : i64, tpu.core_type = #tpu.core_type<tc>, window_params = [{pipeline_mode = #tpu.pipeline_mode<synchronous>, transform_indices = @transform_0, window_bounds = array<i64: 16, 1200>}, {pipeline_mode = #tpu.pipeline_mode<synchronous>, transform_indices = @transform_1, window_bounds = array<i64: 1200, 1152>}, {pipeline_mode = #tpu.pipeline_mode<synchronous>, transform_indices = @transform_2, window_bounds = array<i64: 16, 1>}, {pipeline_mode = #tpu.pipeline_mode<synchronous>, transform_indices = @transform_3, window_bounds = array<i64: 16, 1>}, {pipeline_mode = #tpu.pipeline_mode<synchronous>, transform_indices = @transform_4, window_bounds = array<i64: 16, 1152>}]} {
    %c0 = arith.constant 0 : index
    %c0_0 = arith.constant 0 : index
    %0 = vector.load %arg1[%c0, %c0_0] : memref<16x1200xbf16, #tpu.memory_space<vmem>>, vector<16x1200xbf16>
    %c0_1 = arith.constant 0 : index
    %c0_2 = arith.constant 0 : index
    %1 = vector.load %arg2[%c0_1, %c0_2] : memref<1200x1152xbf16, #tpu.memory_space<vmem>>, vector<1200x1152xbf16>
    %cst = arith.constant dense<0.000000e+00> : vector<16x1152xf32>
    %2 = tpu.matmul %0, %1, %cst {dimension_numbers = #tpu.dot_dimension_numbers<[1], [0], [0], [1], [0, 0, 1, 1], [], []>} : vector<16x1200xbf16>, vector<1200x1152xbf16>, vector<16x1152xf32> -> vector<16x1152xf32>
    %c0_3 = arith.constant 0 : index
    %c0_4 = arith.constant 0 : index
    %3 = vector.load %arg3[%c0_3, %c0_4] : memref<16x1xf32, #tpu.memory_space<vmem>>, vector<16x1xf32>
    %c0_5 = arith.constant 0 : index
    %c0_6 = arith.constant 0 : index
    %4 = vector.load %arg4[%c0_5, %c0_6] : memref<16x1xf32, #tpu.memory_space<vmem>>, vector<16x1xf32>
    %cst_7 = arith.constant dense<0.000000e+00> : vector<16xf32>
    %5 = vector.multi_reduction <add>, %2, %cst_7 [1] : vector<16x1152xf32> to vector<16xf32>
    %6 = vector.shape_cast %5 : vector<16xf32> to vector<16x1xf32>
    %7 = arith.mulf %2, %2 : vector<16x1152xf32>
    %cst_8 = arith.constant dense<0.000000e+00> : vector<16xf32>
    %8 = vector.multi_reduction <add>, %7, %cst_8 [1] : vector<16x1152xf32> to vector<16xf32>
    %9 = vector.shape_cast %8 : vector<16xf32> to vector<16x1xf32>
    %cst_9 = arith.constant 8.68055562E-4 : f32
    %10 = vector.broadcast %cst_9 : f32 to vector<16x1xf32>
    %11 = arith.mulf %6, %10 : vector<16x1xf32>
    %cst_10 = arith.constant 8.68055562E-4 : f32
    %12 = vector.broadcast %cst_10 : f32 to vector<16x1xf32>
    %13 = arith.mulf %9, %12 : vector<16x1xf32>
    %14 = arith.mulf %11, %11 : vector<16x1xf32>
    %15 = arith.subf %13, %14 : vector<16x1xf32>
    %cst_11 = arith.constant 9.99999974E-6 : f32
    %16 = vector.broadcast %cst_11 : f32 to vector<16x1xf32>
    %17 = arith.addf %15, %16 : vector<16x1xf32>
    %18 = math.rsqrt %17 : vector<16x1xf32>
    %19 = arith.mulf %3, %18 : vector<16x1xf32>
    %20 = arith.mulf %11, %19 : vector<16x1xf32>
    %21 = arith.subf %4, %20 : vector<16x1xf32>
    %22 = vector.broadcast %19 : vector<16x1xf32> to vector<16x1152xf32>
    %23 = arith.mulf %2, %22 : vector<16x1152xf32>
    %24 = vector.broadcast %21 : vector<16x1xf32> to vector<16x1152xf32>
    %25 = arith.addf %23, %24 : vector<16x1152xf32>
    %26 = math.tanh %25 : vector<16x1152xf32>
    %c0_12 = arith.constant 0 : index
    %c0_13 = arith.constant 0 : index
    %27 = vector.load %arg5[%c0_12, %c0_13] : memref<16x1152xf32, #tpu.memory_space<vmem>>, vector<16x1152xf32>
    tpu.vector_store %arg5[%c0_12, %c0_13], %26 {strides = array<i32>} : memref<16x1152xf32, #tpu.memory_space<vmem>>, vector<16x1152xf32>,
    return
  }
  func.func @transform_0(%arg0: i32) -> (i32, i32) {
    %c0_i32 = arith.constant 0 : i32
    %c0_i32_0 = arith.constant 0 : i32
    %c0_i32_1 = arith.constant 0 : i32
    return %c0_i32, %c0_i32_0 : i32, i32
  }
  func.func @transform_1(%arg0: i32) -> (i32, i32) {
    %c0_i32 = arith.constant 0 : i32
    %c0_i32_0 = arith.constant 0 : i32
    %c0_i32_1 = arith.constant 0 : i32
    return %c0_i32, %c0_i32_0 : i32, i32
  }
  func.func @transform_2(%arg0: i32) -> (i32, i32) {
    %c0_i32 = arith.constant 0 : i32
    %c0_i32_0 = arith.constant 0 : i32
    %c0_i32_1 = arith.constant 0 : i32
    return %c0_i32, %c0_i32_0 : i32, i32
  }
  func.func @transform_3(%arg0: i32) -> (i32, i32) {
    %c0_i32 = arith.constant 0 : i32
    %c0_i32_0 = arith.constant 0 : i32
    %c0_i32_1 = arith.constant 0 : i32
    return %c0_i32, %c0_i32_0 : i32, i32
  }
  func.func @transform_4(%arg0: i32) -> (i32, i32) {
    %c0_i32 = arith.constant 0 : i32
    %c0_i32_0 = arith.constant 0 : i32
    %c0_i32_1 = arith.constant 0 : i32
    return %c0_i32, %c0_i32_0 : i32, i32
  }
}

module attributes {stable_mosaic.version = 11 : i64} {
  func.func @_conv_bn_tanh_pool_kernel(%arg0: i32, %arg1: memref<32x432xbf16, #tpu.memory_space<vmem>>, %arg2: memref<432x896xbf16, #tpu.memory_space<vmem>>, %arg3: memref<32x1xf32, #tpu.memory_space<vmem>>, %arg4: memref<32x1xf32, #tpu.memory_space<vmem>>, %arg5: memref<896x256xf32, #tpu.memory_space<vmem>>, %arg6: memref<32x256xf32, #tpu.memory_space<vmem>>) attributes {dimension_semantics = [#tpu.dimension_semantics<arbitrary>], iteration_bounds = array<i64: 1>, scalar_prefetch = 0 : i64, scratch_operands = 0 : i64, tpu.core_type = #tpu.core_type<tc>, window_params = [{pipeline_mode = #tpu.pipeline_mode<synchronous>, transform_indices = @transform_0, window_bounds = array<i64: 32, 432>}, {pipeline_mode = #tpu.pipeline_mode<synchronous>, transform_indices = @transform_1, window_bounds = array<i64: 432, 896>}, {pipeline_mode = #tpu.pipeline_mode<synchronous>, transform_indices = @transform_2, window_bounds = array<i64: 32, 1>}, {pipeline_mode = #tpu.pipeline_mode<synchronous>, transform_indices = @transform_3, window_bounds = array<i64: 32, 1>}, {pipeline_mode = #tpu.pipeline_mode<synchronous>, transform_indices = @transform_4, window_bounds = array<i64: 896, 256>}, {pipeline_mode = #tpu.pipeline_mode<synchronous>, transform_indices = @transform_5, window_bounds = array<i64: 32, 256>}]} {
    %c0 = arith.constant 0 : index
    %c0_0 = arith.constant 0 : index
    %0 = vector.load %arg1[%c0, %c0_0] : memref<32x432xbf16, #tpu.memory_space<vmem>>, vector<32x432xbf16>
    %c0_1 = arith.constant 0 : index
    %c0_2 = arith.constant 0 : index
    %1 = vector.load %arg2[%c0_1, %c0_2] : memref<432x896xbf16, #tpu.memory_space<vmem>>, vector<432x896xbf16>
    %cst = arith.constant dense<0.000000e+00> : vector<32x896xf32>
    %2 = tpu.matmul %0, %1, %cst {dimension_numbers = #tpu.dot_dimension_numbers<[1], [0], [0], [1], [0, 0, 1, 1], [], []>} : vector<32x432xbf16>, vector<432x896xbf16>, vector<32x896xf32> -> vector<32x896xf32>
    %c0_3 = arith.constant 0 : index
    %c0_4 = arith.constant 0 : index
    %3 = vector.load %arg3[%c0_3, %c0_4] : memref<32x1xf32, #tpu.memory_space<vmem>>, vector<32x1xf32>
    %c0_5 = arith.constant 0 : index
    %c0_6 = arith.constant 0 : index
    %4 = vector.load %arg4[%c0_5, %c0_6] : memref<32x1xf32, #tpu.memory_space<vmem>>, vector<32x1xf32>
    %cst_7 = arith.constant dense<0.000000e+00> : vector<32xf32>
    %5 = vector.multi_reduction <add>, %2, %cst_7 [1] : vector<32x896xf32> to vector<32xf32>
    %6 = vector.shape_cast %5 : vector<32xf32> to vector<32x1xf32>
    %7 = arith.mulf %2, %2 : vector<32x896xf32>
    %cst_8 = arith.constant dense<0.000000e+00> : vector<32xf32>
    %8 = vector.multi_reduction <add>, %7, %cst_8 [1] : vector<32x896xf32> to vector<32xf32>
    %9 = vector.shape_cast %8 : vector<32xf32> to vector<32x1xf32>
    %cst_9 = arith.constant 1.250000e-03 : f32
    %10 = vector.broadcast %cst_9 : f32 to vector<32x1xf32>
    %11 = arith.mulf %6, %10 : vector<32x1xf32>
    %cst_10 = arith.constant 1.250000e-03 : f32
    %12 = vector.broadcast %cst_10 : f32 to vector<32x1xf32>
    %13 = arith.mulf %9, %12 : vector<32x1xf32>
    %14 = arith.mulf %11, %11 : vector<32x1xf32>
    %15 = arith.subf %13, %14 : vector<32x1xf32>
    %cst_11 = arith.constant 9.99999974E-6 : f32
    %16 = vector.broadcast %cst_11 : f32 to vector<32x1xf32>
    %17 = arith.addf %15, %16 : vector<32x1xf32>
    %18 = math.rsqrt %17 : vector<32x1xf32>
    %19 = arith.mulf %3, %18 : vector<32x1xf32>
    %20 = arith.mulf %11, %19 : vector<32x1xf32>
    %21 = arith.subf %4, %20 : vector<32x1xf32>
    %22 = vector.broadcast %19 : vector<32x1xf32> to vector<32x896xf32>
    %23 = arith.mulf %2, %22 : vector<32x896xf32>
    %24 = vector.broadcast %21 : vector<32x1xf32> to vector<32x896xf32>
    %25 = arith.addf %23, %24 : vector<32x896xf32>
    %26 = math.tanh %25 : vector<32x896xf32>
    %c0_12 = arith.constant 0 : index
    %c0_13 = arith.constant 0 : index
    %27 = vector.load %arg5[%c0_12, %c0_13] : memref<896x256xf32, #tpu.memory_space<vmem>>, vector<896x256xf32>
    %cst_14 = arith.constant dense<0.000000e+00> : vector<32x256xf32>
    %28 = tpu.matmul %26, %27, %cst_14 {dimension_numbers = #tpu.dot_dimension_numbers<[1], [0], [0], [1], [0, 0, 1, 1], [], []>} : vector<32x896xf32>, vector<896x256xf32>, vector<32x256xf32> -> vector<32x256xf32>
    %c0_15 = arith.constant 0 : index
    %c0_16 = arith.constant 0 : index
    %29 = vector.load %arg6[%c0_15, %c0_16] : memref<32x256xf32, #tpu.memory_space<vmem>>, vector<32x256xf32>
    tpu.vector_store %arg6[%c0_15, %c0_16], %28 {strides = array<i32>} : memref<32x256xf32, #tpu.memory_space<vmem>>, vector<32x256xf32>,
    return
  }
  func.func @transform_0(%arg0: i32) -> (i32, i32) {
    %c0_i32 = arith.constant 0 : i32
    %c0_i32_0 = arith.constant 0 : i32
    %c0_i32_1 = arith.constant 0 : i32
    return %c0_i32, %c0_i32_0 : i32, i32
  }
  func.func @transform_1(%arg0: i32) -> (i32, i32) {
    %c0_i32 = arith.constant 0 : i32
    %c0_i32_0 = arith.constant 0 : i32
    %c0_i32_1 = arith.constant 0 : i32
    return %c0_i32, %c0_i32_0 : i32, i32
  }
  func.func @transform_2(%arg0: i32) -> (i32, i32) {
    %c0_i32 = arith.constant 0 : i32
    %c0_i32_0 = arith.constant 0 : i32
    %c0_i32_1 = arith.constant 0 : i32
    return %c0_i32, %c0_i32_0 : i32, i32
  }
  func.func @transform_3(%arg0: i32) -> (i32, i32) {
    %c0_i32 = arith.constant 0 : i32
    %c0_i32_0 = arith.constant 0 : i32
    %c0_i32_1 = arith.constant 0 : i32
    return %c0_i32, %c0_i32_0 : i32, i32
  }
  func.func @transform_4(%arg0: i32) -> (i32, i32) {
    %c0_i32 = arith.constant 0 : i32
    %c0_i32_0 = arith.constant 0 : i32
    %c0_i32_1 = arith.constant 0 : i32
    return %c0_i32, %c0_i32_0 : i32, i32
  }
  func.func @transform_5(%arg0: i32) -> (i32, i32) {
    %c0_i32 = arith.constant 0 : i32
    %c0_i32_0 = arith.constant 0 : i32
    %c0_i32_1 = arith.constant 0 : i32
    return %c0_i32, %c0_i32_0 : i32, i32
  }
}

</mosaic_0001>

<bundles_post_ra>
// kernel: backbone_step2.2
= control target key start
LH: loop header
LB: loop body
LE: loop exit
PB: predicated region body
PF: predicated region fallthrough
CT: control target
= control target key end

     0   :  { %vm4277_vm0 = vcmask 392192   ;;  %s9913_s1 = inlined_call_operand.vmem [shape: bf16[1200,1152], index: 1, kind: input, shape index: {}]   ;;  %s9914_s0 = inlined_call_operand.vmem [shape: bf16[16,1200], index: 0, kind: input, shape index: {}]   ;;  %s9915_s2 = inlined_call_operand.vmem [shape: f32[16,1], index: 2, kind: input, shape index: {}]   ;;  %s9916_s3 = inlined_call_operand.vmem [shape: f32[16,1], index: 3, kind: input, shape index: {}]   ;;  %s9917_s4 = inlined_call_operand.vmem [shape: f32[16,1152], index: 4, kind: output, shape index: {}]  }
   0x1   :  { %v6303_v0 = vld [vmem:[%s9913_s1 + $0x1fc] ss:$36 sps:$4 sm:$0xff]   ;;  %v6309_v4 = vld [vmem:[%s9913_s1 + $0x1b4] ss:$36 sps:$4 sm:$0xff]   ;;  %v6315_v8 = vld [vmem:[%s9913_s1 + $0x16c] ss:$36 sps:$4 sm:$0xff]  }
   0x2   :  { %v6305_v1 = vld [vmem:[%s9913_s1 + $0x67c] ss:$36 sps:$4 sm:$0xff]   ;;  %4281 = vmatprep.subr.bf16.mxu0 %v6303_v0  ;;  %v6311_v5 = vld [vmem:[%s9913_s1 + $0x634] ss:$36 sps:$4 sm:$0xff]   ;;  %v6317_v9 = vld [vmem:[%s9913_s1 + $0x5ec] ss:$36 sps:$4 sm:$0xff]  }
   0x3   :  { %v6307_v2 = vld [vmem:[%s9913_s1 + $0x1f8] ss:$36 sps:$4 sm:$0xff]   ;;  %4324 = vmatprep.subr.bf16.mxu1 %v6305_v1  ;;  %v6313_v6 = vld [vmem:[%s9913_s1 + $0x1b0] ss:$36 sps:$4 sm:$0xff]   ;;  %v6319_v10 = vld [vmem:[%s9913_s1 + $0x168] ss:$36 sps:$4 sm:$0xff]  }
   0x4   :  { %v6308_v3 = vld [vmem:[%s9913_s1 + $0x678] ss:$36 sps:$4 sm:$0xff]   ;;  %4282 = vmatpush1.bf16.msra.mxu0 %v6307_v2  ;;  %v6314_v7 = vld [vmem:[%s9913_s1 + $0x630] ss:$36 sps:$4 sm:$0xff]   ;;  %v6320_v11 = vld [vmem:[%s9913_s1 + $0x5e8] ss:$36 sps:$4 sm:$0xff]  }
   0x5   :  { %4325 = vmatpush1.bf16.msra.mxu1 %v6308_v3  ;;  %4283 = vmatprep.subr.bf16.mxu0 %v6309_v4  ;;  %v6321_v12 = vld [vmem:[%s9913_s1 + $0x124] ss:$36 sps:$4 sm:$0xff]   ;;  %v6327_v16 = vld [vmem:[%s9913_s1 + $0xdc] ss:$36 sps:$4 sm:$0xff]   ;;  %v6333_v20 = vld [vmem:[%s9913_s1 + $0x94] ss:$36 sps:$4 sm:$0xff]  }
   0x6   :  { %4326 = vmatprep.subr.bf16.mxu1 %v6311_v5  ;;  %v6323_v13 = vld [vmem:[%s9913_s1 + $0x5a4] ss:$36 sps:$4 sm:$0xff]   ;;  %v6329_v17 = vld [vmem:[%s9913_s1 + $0x55c] ss:$36 sps:$4 sm:$0xff]   ;;  %v6335_v21 = vld [vmem:[%s9913_s1 + $0x514] ss:$36 sps:$4 sm:$0xff]  }
   0x7   :  { %v6325_v14 = vld [vmem:[%s9913_s1 + $0x120] ss:$36 sps:$4 sm:$0xff]   ;;  %v6331_v18 = vld [vmem:[%s9913_s1 + $0xd8] ss:$36 sps:$4 sm:$0xff]   ;;  %v6337_v22 = vld [vmem:[%s9913_s1 + $0x90] ss:$36 sps:$4 sm:$0xff]  }
   0x8   :  { %4284 = vmatpush1.bf16.msra.mxu0 %v6313_v6  ;;  %v6326_v15 = vld [vmem:[%s9913_s1 + $0x5a0] ss:$36 sps:$4 sm:$0xff]   ;;  %v6332_v19 = vld [vmem:[%s9913_s1 + $0x558] ss:$36 sps:$4 sm:$0xff]   ;;  %v6338_v23 = vld [vmem:[%s9913_s1 + $0x510] ss:$36 sps:$4 sm:$0xff]  }
   0x9   :  { %4327 = vmatpush1.bf16.msra.mxu1 %v6314_v7  ;;  %4285 = vmatprep.subr.bf16.mxu0 %v6315_v8  ;;  %v6339_v24 = vld [vmem:[%s9913_s1 + $0x4c] ss:$36 sps:$4 sm:$0xff]   ;;  %v6345_v28 = vld [vmem:[%s9913_s1 + $0x4] ss:$36 sps:$4 sm:$0xff]   ;;  %v6351_v32 = vld [vmem:[%s9913_s1 + $0x43c] ss:$36 sps:$4 sm:$0xff]  }
   0xa   :  { %4328 = vmatprep.subr.bf16.mxu1 %v6317_v9  ;;  %v6341_v25 = vld [vmem:[%s9913_s1 + $0x4cc] ss:$36 sps:$4 sm:$0xff]   ;;  %v6347_v29 = vld [vmem:[%s9913_s1 + $0x484] ss:$36 sps:$4 sm:$0xff]   ;;  %v6353_v33 = vld [vmem:[%s9913_s1 + $0x8bc] ss:$36 sps:$4 sm:$0xff]  }
   0xb   :  { %v6343_v26 = vld [vmem:[%s9913_s1 + $0x48] ss:$36 sps:$4 sm:$0xff]   ;;  %v6349_v30 = vld [vmem:[%s9913_s1] ss:$36 sps:$4 sm:$0xff]   ;;  %v6355_v34 = vld [vmem:[%s9913_s1 + $0x438] ss:$36 sps:$4 sm:$0xff]  }
   0xc   :  { %4286 = vmatpush1.bf16.msra.mxu0 %v6319_v10  ;;  %v6344_v27 = vld [vmem:[%s9913_s1 + $0x4c8] ss:$36 sps:$4 sm:$0xff]   ;;  %v6350_v31 = vld [vmem:[%s9913_s1 + $0x480] ss:$36 sps:$4 sm:$0xff]   ;;  %v6356_v35 = vld [vmem:[%s9913_s1 + $0x8b8] ss:$36 sps:$4 sm:$0xff]  }
   0xd   :  { %4329 = vmatpush1.bf16.msra.mxu1 %v6320_v11  ;;  %4287 = vmatprep.subr.bf16.mxu0 %v6321_v12  ;;  %v6357_v36 = vld [vmem:[%s9913_s1 + $0x3f4] ss:$36 sps:$4 sm:$0xff]   ;;  %v6363_v40 = vld [vmem:[%s9913_s1 + $0x3ac] ss:$36 sps:$4 sm:$0xff]   ;;  %v6369_v44 = vld [vmem:[%s9913_s1 + $0x364] ss:$36 sps:$4 sm:$0xff]  }
   0xe   :  { %4330 = vmatprep.subr.bf16.mxu1 %v6323_v13  ;;  %v6359_v37 = vld [vmem:[%s9913_s1 + $0x874] ss:$36 sps:$4 sm:$0xff]   ;;  %v6365_v41 = vld [vmem:[%s9913_s1 + $0x82c] ss:$36 sps:$4 sm:$0xff]   ;;  %v6371_v45 = vld [vmem:[%s9913_s1 + $0x7e4] ss:$36 sps:$4 sm:$0xff]  }
   0xf   :  { %v6361_v38 = vld [vmem:[%s9913_s1 + $0x3f0] ss:$36 sps:$4 sm:$0xff]   ;;  %v6367_v42 = vld [vmem:[%s9913_s1 + $0x3a8] ss:$36 sps:$4 sm:$0xff]   ;;  %v6373_v46 = vld [vmem:[%s9913_s1 + $0x360] ss:$36 sps:$4 sm:$0xff]  }
  0x10   :  { %4288 = vmatpush1.bf16.msra.mxu0 %v6325_v14  ;;  %v6362_v39 = vld [vmem:[%s9913_s1 + $0x870] ss:$36 sps:$4 sm:$0xff]   ;;  %v6368_v43 = vld [vmem:[%s9913_s1 + $0x828] ss:$36 sps:$4 sm:$0xff]   ;;  %v6374_v47 = vld [vmem:[%s9913_s1 + $0x7e0] ss:$36 sps:$4 sm:$0xff]  }
  0x11   :  { %4331 = vmatpush1.bf16.msra.mxu1 %v6326_v15  ;;  %4289 = vmatprep.subr.bf16.mxu0 %v6327_v16  ;;  %v7526_v48 = vld [vmem:[%s9914_s0 + $0x4] ss:$40 sps:$4 sm:$0xff]   ;;  %v6375_v49 = vld [vmem:[%s9913_s1 + $0x31c] ss:$36 sps:$4 sm:$0xff]   ;;  %v6381_v54 = vld [vmem:[%s9913_s1 + $0x2d4] ss:$36 sps:$4 sm:$0xff]  }
  0x12   :  { %4332 = vmatprep.subr.bf16.mxu1 %v6329_v17  ;;  %v7534_v50 = vld [vmem:[%s9914_s0 + $0xc] ss:$40 sps:$4 sm:$0xff]   ;;  %v6377_v51 = vld [vmem:[%s9913_s1 + $0x79c] ss:$36 sps:$4 sm:$0xff]   ;;  %4313 = vmatprep.mubr.bf16.mxu0 %v7526_v48  ;;  %v6393_v62 = vld [vmem:[%s9913_s1 + $0x244] ss:$36 sps:$4 sm:$0xff]  }
  0x13   :  { %4356 = vmatprep.mubr.bf16.mxu1 %v7534_v50  ;;  %v6379_v52 = vld [vmem:[%s9913_s1 + $0x318] ss:$36 sps:$4 sm:$0xff]   ;;  %v6385_v56 = vld [vmem:[%s9913_s1 + $0x2d0] ss:$36 sps:$4 sm:$0xff]   ;;  %v6391_v60 = vld [vmem:[%s9913_s1 + $0x288] ss:$36 sps:$4 sm:$0xff]  }
  0x14   :  { %4290 = vmatpush1.bf16.msra.mxu0 %v6331_v18  ;;  %v6380_v53 = vld [vmem:[%s9913_s1 + $0x798] ss:$36 sps:$4 sm:$0xff]   ;;  %v6386_v57 = vld [vmem:[%s9913_s1 + $0x750] ss:$36 sps:$4 sm:$0xff]   ;;  %v6392_v61 = vld [vmem:[%s9913_s1 + $0x708] ss:$36 sps:$4 sm:$0xff]  }
  0x15   :  { %4333 = vmatpush1.bf16.msra.mxu1 %v6332_v19  ;;  %4291 = vmatprep.subr.bf16.mxu0 %v6333_v20  ;;  %v6383_v55 = vld [vmem:[%s9913_s1 + $0x754] ss:$36 sps:$4 sm:$0xff]   ;;  %v6387_v58 = vld [vmem:[%s9913_s1 + $0x28c] ss:$36 sps:$4 sm:$0xff]   ;;  %v6395_v63 = vld [vmem:[%s9913_s1 + $0x6c4] ss:$36 sps:$4 sm:$0xff]  }
  0x16   :  { %4334 = vmatprep.subr.bf16.mxu1 %v6335_v21  ;;  %v6389_v59 = vld [vmem:[%s9913_s1 + $0x70c] ss:$36 sps:$4 sm:$0xff]   ;;  %v6397_v0 = vld [vmem:[%s9913_s1 + $0x240] ss:$36 sps:$4 sm:$0xff]   ;;  %v6405_v6 = vld [vmem:[%s9913_s1 + $0xaf8] ss:$36 sps:$4 sm:$0xff]  }
  0x17   :  { %v6398_v1 = vld [vmem:[%s9913_s1 + $0x6c0] ss:$36 sps:$4 sm:$0xff]   ;;  %v6404_v5 = vld [vmem:[%s9914_s0 + $0x8] ss:$40 sps:$4 sm:$0xff]   ;;  %v6408_v7 = vld [vmem:[%s9913_s1 + $0xf78] ss:$36 sps:$4 sm:$0xff]  }
  0x18   :  { %4292 = vmatpush1.bf16.msra.mxu0 %v6337_v22  ;;  %v6407_v2 = vld [vmem:[%s9913_s1 + $0xafc] ss:$36 sps:$4 sm:$0xff]   ;;  %v6413_v8 = vld [vmem:[%s9913_s1 + $0xab4] ss:$36 sps:$4 sm:$0xff]   ;;  %v6419_v12 = vld [vmem:[%s9913_s1 + $0xa6c] ss:$36 sps:$4 sm:$0xff]  }
  0x19   :  { %4335 = vmatpush1.bf16.msra.mxu1 %v6338_v23  ;;  %4293 = vmatprep.subr.bf16.mxu0 %v6339_v24  ;;  %v6410_v3 = vld [vmem:[%s9913_s1 + $0xf7c] ss:$36 sps:$4 sm:$0xff]   ;;  %v6416_v9 = vld [vmem:[%s9913_s1 + $0xf34] ss:$36 sps:$4 sm:$0xff]   ;;  %v6422_v13 = vld [vmem:[%s9913_s1 + $0xeec] ss:$36 sps:$4 sm:$0xff]  }
  0x1a   :  { %4336 = vmatprep.subr.bf16.mxu1 %v6341_v25  ;;  %v7592_v4 = vld [vmem:[%s9914_s0] ss:$40 sps:$4 sm:$0xff]   ;;  %v6411_v10 = vld [vmem:[%s9913_s1 + $0xab0] ss:$36 sps:$4 sm:$0xff]   ;;  %v6429_v22 = vld [vmem:[%s9913_s1 + $0x9d8] ss:$36 sps:$4 sm:$0xff]  }
  0x1b   :  { %v6414_v11 = vld [vmem:[%s9913_s1 + $0xf30] ss:$36 sps:$4 sm:$0xff]   ;;  %v6417_v14 = vld [vmem:[%s9913_s1 + $0xa68] ss:$36 sps:$4 sm:$0xff]   ;;  %v6423_v18 = vld [vmem:[%s9913_s1 + $0xa20] ss:$36 sps:$4 sm:$0xff]  }
  0x1c   :  { %4294 = vmatpush1.bf16.msra.mxu0 %v6343_v26  ;;  %v6420_v15 = vld [vmem:[%s9913_s1 + $0xee8] ss:$36 sps:$4 sm:$0xff]   ;;  %v6426_v19 = vld [vmem:[%s9913_s1 + $0xea0] ss:$36 sps:$4 sm:$0xff]   ;;  %v6432_v23 = vld [vmem:[%s9913_s1 + $0xe58] ss:$36 sps:$4 sm:$0xff]  }
  0x1d   :  { %4337 = vmatpush1.bf16.msra.mxu1 %v6344_v27  ;;  %4295 = vmatprep.subr.bf16.mxu0 %v6345_v28  ;;  %v6425_v16 = vld [vmem:[%s9913_s1 + $0xa24] ss:$36 sps:$4 sm:$0xff]   ;;  %v6431_v20 = vld [vmem:[%s9913_s1 + $0x9dc] ss:$36 sps:$4 sm:$0xff]   ;;  %v6437_v24 = vld [vmem:[%s9913_s1 + $0x994] ss:$36 sps:$4 sm:$0xff]  }
  0x1e   :  { %4338 = vmatprep.subr.bf16.mxu1 %v6347_v29  ;;  %v6428_v17 = vld [vmem:[%s9913_s1 + $0xea4] ss:$36 sps:$4 sm:$0xff]   ;;  %v6434_v21 = vld [vmem:[%s9913_s1 + $0xe5c] ss:$36 sps:$4 sm:$0xff]   ;;  %v6440_v25 = vld [vmem:[%s9913_s1 + $0xe14] ss:$36 sps:$4 sm:$0xff]  }
  0x1f   :  { %v6435_v26 = vld [vmem:[%s9913_s1 + $0x990] ss:$36 sps:$4 sm:$0xff]  }
  0x20   :  { %4296 = vmatpush1.bf16.msra.mxu0 %v6349_v30  ;;  %v6438_v27 = vld [vmem:[%s9913_s1 + $0xe10] ss:$36 sps:$4 sm:$0xff]   ;;  %v6441_v30 = vld [vmem:[%s9913_s1 + $0x948] ss:$36 sps:$4 sm:$0xff]  }
  0x21   :  { %4339 = vmatpush1.bf16.msra.mxu1 %v6350_v31  ;;  %4297 = vmatprep.subr.bf16.mxu0 %v6351_v32  ;;  %v6443_v28 = vld [vmem:[%s9913_s1 + $0x94c] ss:$36 sps:$4 sm:$0xff]   ;;  %v6449_v32 = vld [vmem:[%s9913_s1 + $0x904] ss:$36 sps:$4 sm:$0xff]  }
  0x22   :  { %4340 = vmatprep.subr.bf16.mxu1 %v6353_v33  ;;  %v6446_v29 = vld [vmem:[%s9913_s1 + $0xdcc] ss:$36 sps:$4 sm:$0xff]   ;;  %v6452_v33 = vld [vmem:[%s9913_s1 + $0xd84] ss:$36 sps:$4 sm:$0xff]  }
  0x23   :  { %v6444_v31 = vld [vmem:[%s9913_s1 + $0xdc8] ss:$36 sps:$4 sm:$0xff]  }
  0x24   :  { %4298 = vmatpush2.bf16.msra.mxu0 %v6355_v34  ;;  %v7685_v34 = vld [vmem:[%s9914_s0 + $0x14] ss:$40 sps:$4 sm:$0xff]  }
  0x25   :  { %4341 = vmatpush2.bf16.msra.mxu1 %v6356_v35  ;;  %4299 = vmatprep.subr.bf16.mxu0 %v6357_v36  ;;  %v6503_v35 = vld [vmem:[%s9914_s0 + $0x1c] ss:$40 sps:$4 sm:$0xff]  }
  0x26   :  { %4342 = vmatprep.subr.bf16.mxu1 %v6359_v37  ;;  %v6447_v36 = vld [vmem:[%s9913_s1 + $0x900] ss:$36 sps:$4 sm:$0xff]  }
  0x27   :  { %v6450_v37 = vld [vmem:[%s9913_s1 + $0xd80] ss:$36 sps:$4 sm:$0xff]  }
  0x28   :  { %4300 = vmatpush2.bf16.msra.mxu0 %v6361_v38  ;;  %v6455_v38 = vld [vmem:[%s9913_s1 + $0xd3c] ss:$36 sps:$4 sm:$0xff]  }
  0x29   :  { %4343 = vmatpush2.bf16.msra.mxu1 %v6362_v39  ;;  %4301 = vmatprep.subr.bf16.mxu0 %v6363_v40  ;;  %v6458_v39 = vld [vmem:[%s9913_s1 + $0x11bc] ss:$36 sps:$4 sm:$0xff]  }
  0x2a   :  { %4344 = vmatprep.subr.bf16.mxu1 %v6365_v41  ;;  %v6453_v40 = vld [vmem:[%s9913_s1 + $0xd38] ss:$36 sps:$4 sm:$0xff]  }
  0x2b   :  { %v6456_v41 = vld [vmem:[%s9913_s1 + $0x11b8] ss:$36 sps:$4 sm:$0xff]  }
  0x2c   :  { %4302 = vmatpush2.bf16.msra.mxu0 %v6367_v42  ;;  %v6461_v42 = vld [vmem:[%s9913_s1 + $0xcf4] ss:$36 sps:$4 sm:$0xff]  }
  0x2d   :  { %4345 = vmatpush2.bf16.msra.mxu1 %v6368_v43  ;;  %4303 = vmatprep.subr.bf16.mxu0 %v6369_v44  ;;  %v6464_v43 = vld [vmem:[%s9913_s1 + $0x1174] ss:$36 sps:$4 sm:$0xff]  }
  0x2e   :  { %4346 = vmatprep.subr.bf16.mxu1 %v6371_v45  ;;  %v6459_v44 = vld [vmem:[%s9913_s1 + $0xcf0] ss:$36 sps:$4 sm:$0xff]  }
  0x2f   :  { %v6462_v45 = vld [vmem:[%s9913_s1 + $0x1170] ss:$36 sps:$4 sm:$0xff]  }
  0x30   :  { %4304 = vmatpush2.bf16.msra.mxu0 %v6373_v46  ;;  %v6467_v46 = vld [vmem:[%s9913_s1 + $0xcac] ss:$36 sps:$4 sm:$0xff]  }
  0x31   :  { %4347 = vmatpush2.bf16.msra.mxu1 %v6374_v47  ;;  %4305 = vmatprep.subr.bf16.mxu0 %v6375_v49  ;;  %v6470_v47 = vld [vmem:[%s9913_s1 + $0x112c] ss:$36 sps:$4 sm:$0xff]  }
  0x32   :  { %4348 = vmatprep.subr.bf16.mxu1 %v6377_v51  ;;  %v6465_v49 = vld [vmem:[%s9913_s1 + $0xca8] ss:$36 sps:$4 sm:$0xff]  }
  0x33   :  { %v6468_v51 = vld [vmem:[%s9913_s1 + $0x1128] ss:$36 sps:$4 sm:$0xff]  }
  0x34   :  { %4306 = vmatpush2.bf16.msra.mxu0 %v6379_v52  ;;  %v6473_v52 = vld [vmem:[%s9913_s1 + $0xc64] ss:$36 sps:$4 sm:$0xff]  }
  0x35   :  { %4349 = vmatpush2.bf16.msra.mxu1 %v6380_v53  ;;  %4307 = vmatprep.subr.bf16.mxu0 %v6381_v54  ;;  %v6476_v53 = vld [vmem:[%s9913_s1 + $0x10e4] ss:$36 sps:$4 sm:$0xff]  }
  0x36   :  { %4350 = vmatprep.subr.bf16.mxu1 %v6383_v55  ;;  %v6471_v54 = vld [vmem:[%s9913_s1 + $0xc60] ss:$36 sps:$4 sm:$0xff]  }
  0x37   :  { %v6474_v55 = vld [vmem:[%s9913_s1 + $0x10e0] ss:$36 sps:$4 sm:$0xff]  }
  0x38   :  { %4308 = vmatpush2.bf16.msra.mxu0 %v6385_v56  ;;  %v6479_v56 = vld [vmem:[%s9913_s1 + $0xc1c] ss:$36 sps:$4 sm:$0xff]  }
  0x39   :  { %4351 = vmatpush2.bf16.msra.mxu1 %v6386_v57  ;;  %4309 = vmatprep.subr.bf16.mxu0 %v6387_v58  ;;  %v6482_v57 = vld [vmem:[%s9913_s1 + $0x109c] ss:$36 sps:$4 sm:$0xff]  }
  0x3a   :  { %4352 = vmatprep.subr.bf16.mxu1 %v6389_v59  ;;  %v6477_v58 = vld [vmem:[%s9913_s1 + $0xc18] ss:$36 sps:$4 sm:$0xff]  }
  0x3b   :  { %v6480_v59 = vld [vmem:[%s9913_s1 + $0x1098] ss:$36 sps:$4 sm:$0xff]  }
  0x3c   :  { %4310 = vmatpush2.bf16.msra.mxu0 %v6391_v60  ;;  %v6485_v60 = vld [vmem:[%s9913_s1 + $0xbd4] ss:$36 sps:$4 sm:$0xff]  }
  0x3d   :  { %4353 = vmatpush2.bf16.msra.mxu1 %v6392_v61  ;;  %4311 = vmatprep.subr.bf16.mxu0 %v6393_v62  ;;  %v6488_v61 = vld [vmem:[%s9913_s1 + $0x1054] ss:$36 sps:$4 sm:$0xff]  }
  0x3e   :  { %4354 = vmatprep.subr.bf16.mxu1 %v6395_v63  ;;  %v6483_v62 = vld [vmem:[%s9913_s1 + $0xbd0] ss:$36 sps:$4 sm:$0xff]  }
  0x3f   :  { %v6486_v63 = vld [vmem:[%s9913_s1 + $0x1050] ss:$36 sps:$4 sm:$0xff]  }
  0x40   :  { %4312 = vmatpush2.bf16.msra.mxu0 %v6397_v0  ;;  %v6491_v0 = vld [vmem:[%s9913_s1 + $0xb8c] ss:$36 sps:$4 sm:$0xff]  }
  0x41   :  { %4355 = vmatpush2.bf16.msra.mxu1 %v6398_v1  ;;  %4367 = vmatprep.subr.bf16.mxu0 %v6407_v2  ;;  %v6494_v1 = vld [vmem:[%s9913_s1 + $0x100c] ss:$36 sps:$4 sm:$0xff]  }
  0x42   :  { %4410 = vmatprep.subr.bf16.mxu1 %v6410_v3  ;;  %v6489_v2 = vld [vmem:[%s9913_s1 + $0xb88] ss:$36 sps:$4 sm:$0xff]  }
  0x43   :  { %4314 = vmatmul.mubr.bf16.vlgmr.msra.gmra.mxu0 %v7592_v4  ;;  %v6492_v3 = vld [vmem:[%s9913_s1 + $0x1008] ss:$36 sps:$4 sm:$0xff]  }
  0x44   :  { %4357 = vmatmul.mubr.bf16.vlgmr.msra.gmra.mxu1 %v6404_v5  ;;  %4368 = vmatpush1.bf16.msra.mxu0 %v6405_v6  ;;  %v6497_v5 = vld [vmem:[%s9913_s1 + $0xb44] ss:$36 sps:$4 sm:$0xff]  }
  0x45   :  { %4411 = vmatpush1.bf16.msra.mxu1 %v6408_v7  ;;  %4369 = vmatprep.subr.bf16.mxu0 %v6413_v8  ;;  %v6500_v6 = vld [vmem:[%s9913_s1 + $0xfc4] ss:$36 sps:$4 sm:$0xff]  }
  0x46   :  { %4412 = vmatprep.subr.bf16.mxu1 %v6416_v9  ;;  %4399 = vmatprep.mubr.bf16.mxu0 %v7685_v34  ;;  %v6495_v7 = vld [vmem:[%s9913_s1 + $0xb40] ss:$36 sps:$4 sm:$0xff]  }
  0x47   :  { %4442 = vmatprep.mubr.bf16.mxu1 %v6503_v35  ;;  %v6498_v8 = vld [vmem:[%s9913_s1 + $0xfc0] ss:$36 sps:$4 sm:$0xff]   ;;  %v6540_v35 = vld [vmem:[%s9913_s1 + $0x98] ss:$36 sps:$4 sm:$0xff]  }
  0x48   :  { %4370 = vmatpush1.bf16.msra.mxu0 %v6411_v10  ;;  %v6509_v9 = vld [vmem:[%s9913_s1 + $0x13fc] ss:$36 sps:$4 sm:$0xff]   ;;  %v6512_v10 = vld [vmem:[%s9913_s1 + $0x204] ss:$36 sps:$4 sm:$0xff]  }
  0x49   :  { %4413 = vmatpush1.bf16.msra.mxu1 %v6414_v11  ;;  %4371 = vmatprep.subr.bf16.mxu0 %v6419_v12  ;;  %v7802_v11 = vld [vmem:[%s9914_s0 + $0x10] ss:$40 sps:$4 sm:$0xff]  }
  0x4a   :  { %4414 = vmatprep.subr.bf16.mxu1 %v6422_v13  ;;  %v6506_v12 = vld [vmem:[%s9914_s0 + $0x18] ss:$40 sps:$4 sm:$0xff]  }
  0x4b   :  { %v6507_v13 = vld [vmem:[%s9913_s1 + $0x13f8] ss:$36 sps:$4 sm:$0xff]  }
  0x4c   :  { %4372 = vmatpush1.bf16.msra.mxu0 %v6417_v14  ;;  %v6510_v14 = vld [vmem:[%s9913_s1 + $0x200] ss:$36 sps:$4 sm:$0xff]  }
  0x4d   :  { %4415 = vmatpush1.bf16.msra.mxu1 %v6420_v15  ;;  %4373 = vmatprep.subr.bf16.mxu0 %v6425_v16  ;;  %v6515_v15 = vld [vmem:[%s9913_s1 + $0x13b4] ss:$36 sps:$4 sm:$0xff]   ;;  %v6518_v16 = vld [vmem:[%s9913_s1 + $0x1bc] ss:$36 sps:$4 sm:$0xff]  }
  0x4e   :  { %4416 = vmatprep.subr.bf16.mxu1 %v6428_v17  ;;  %v7822_v17 = vld [vmem:[%s9914_s0 + $0x24] ss:$40 sps:$4 sm:$0xff]  }
  0x50   :  { %4374 = vmatpush1.bf16.msra.mxu0 %v6423_v18  ;;  %v6513_v18 = vld [vmem:[%s9913_s1 + $0x13b0] ss:$36 sps:$4 sm:$0xff]  }
  0x51   :  { %4417 = vmatpush1.bf16.msra.mxu1 %v6426_v19  ;;  %4375 = vmatprep.subr.bf16.mxu0 %v6431_v20  ;;  %v6516_v19 = vld [vmem:[%s9913_s1 + $0x1b8] ss:$36 sps:$4 sm:$0xff]   ;;  %v6521_v20 = vld [vmem:[%s9913_s1 + $0x136c] ss:$36 sps:$4 sm:$0xff]  }
  0x52   :  { %4418 = vmatprep.subr.bf16.mxu1 %v6434_v21  ;;  %v6524_v21 = vld [vmem:[%s9913_s1 + $0x174] ss:$36 sps:$4 sm:$0xff]  }
  0x54   :  { %4376 = vmatpush1.bf16.msra.mxu0 %v6429_v22  ;;  %v6519_v22 = vld [vmem:[%s9913_s1 + $0x1368] ss:$36 sps:$4 sm:$0xff]  }
  0x55   :  { %4419 = vmatpush1.bf16.msra.mxu1 %v6432_v23  ;;  %4377 = vmatprep.subr.bf16.mxu0 %v6437_v24  ;;  %v6522_v23 = vld [vmem:[%s9913_s1 + $0x170] ss:$36 sps:$4 sm:$0xff]   ;;  %v6527_v24 = vld [vmem:[%s9913_s1 + $0x1324] ss:$36 sps:$4 sm:$0xff]  }
  0x56   :  { %4420 = vmatprep.subr.bf16.mxu1 %v6440_v25  ;;  %v6525_v25 = vld [vmem:[%s9913_s1 + $0x1320] ss:$36 sps:$4 sm:$0xff]  }
  0x58   :  { %4378 = vmatpush1.bf16.msra.mxu0 %v6435_v26  ;;  %v6528_v26 = vld [vmem:[%s9913_s1 + $0x128] ss:$36 sps:$4 sm:$0xff]  }
  0x59   :  { %4421 = vmatpush1.bf16.msra.mxu1 %v6438_v27  ;;  %4379 = vmatprep.subr.bf16.mxu0 %v6443_v28  ;;  %v6533_v27 = vld [vmem:[%s9913_s1 + $0x12dc] ss:$36 sps:$4 sm:$0xff]   ;;  %v6536_v28 = vld [vmem:[%s9913_s1 + $0xe4] ss:$36 sps:$4 sm:$0xff]  }
  0x5a   :  { %4422 = vmatprep.subr.bf16.mxu1 %v6446_v29  ;;  %v6531_v29 = vld [vmem:[%s9913_s1 + $0x12d8] ss:$36 sps:$4 sm:$0xff]  }
  0x5c   :  { %4380 = vmatpush1.bf16.msra.mxu0 %v6441_v30  ;;  %v6534_v30 = vld [vmem:[%s9913_s1 + $0xe0] ss:$36 sps:$4 sm:$0xff]  }
  0x5d   :  { %4423 = vmatpush1.bf16.msra.mxu1 %v6444_v31  ;;  %4381 = vmatprep.subr.bf16.mxu0 %v6449_v32  ;;  %v6539_v31 = vld [vmem:[%s9913_s1 + $0x1294] ss:$36 sps:$4 sm:$0xff]   ;;  %v6542_v32 = vld [vmem:[%s9913_s1 + $0x9c] ss:$36 sps:$4 sm:$0xff]  }
  0x5e   :  { %4424 = vmatprep.subr.bf16.mxu1 %v6452_v33  ;;  %v6537_v33 = vld [vmem:[%s9913_s1 + $0x1290] ss:$36 sps:$4 sm:$0xff]  }
  0x60   :  { %4382 = vmatpush1.bf16.msra.mxu0 %v6447_v36  ;;  %v6545_v36 = vld [vmem:[%s9913_s1 + $0x124c] ss:$36 sps:$4 sm:$0xff]  }
  0x61   :  { %4425 = vmatpush1.bf16.msra.mxu1 %v6450_v37  ;;  %4383 = vmatprep.subr.bf16.mxu0 %v6455_v38  ;;  %v6548_v37 = vld [vmem:[%s9913_s1 + $0x54] ss:$36 sps:$4 sm:$0xff]   ;;  %v6543_v38 = vld [vmem:[%s9913_s1 + $0x1248] ss:$36 sps:$4 sm:$0xff]  }
  0x62   :  { %4426 = vmatprep.subr.bf16.mxu1 %v6458_v39  ;;  %v6546_v39 = vld [vmem:[%s9913_s1 + $0x50] ss:$36 sps:$4 sm:$0xff]  }
  0x64   :  { %4384 = vmatpush2.bf16.msra.mxu0 %v6453_v40  ;;  %v6551_v40 = vld [vmem:[%s9913_s1 + $0x1204] ss:$36 sps:$4 sm:$0xff]  }
  0x65   :  { %4427 = vmatpush2.bf16.msra.mxu1 %v6456_v41  ;;  %4385 = vmatprep.subr.bf16.mxu0 %v6461_v42  ;;  %v6554_v41 = vld [vmem:[%s9913_s1 + $0xc] ss:$36 sps:$4 sm:$0xff]   ;;  %v6549_v42 = vld [vmem:[%s9913_s1 + $0x1200] ss:$36 sps:$4 sm:$0xff]  }
  0x66   :  { %4428 = vmatprep.subr.bf16.mxu1 %v6464_v43  ;;  %v6552_v43 = vld [vmem:[%s9913_s1 + $0x8] ss:$36 sps:$4 sm:$0xff]  }
  0x68   :  { %4386 = vmatpush2.bf16.msra.mxu0 %v6459_v44  ;;  %v6557_v44 = vld [vmem:[%s9913_s1 + $0x14d4] ss:$36 sps:$4 sm:$0xff]  }
  0x69   :  { %4429 = vmatpush2.bf16.msra.mxu1 %v6462_v45  ;;  %4387 = vmatprep.subr.bf16.mxu0 %v6467_v46  ;;  %v6560_v45 = vld [vmem:[%s9913_s1 + $0x444] ss:$36 sps:$4 sm:$0xff]   ;;  %v6555_v46 = vld [vmem:[%s9913_s1 + $0x14d0] ss:$36 sps:$4 sm:$0xff]  }
  0x6a   :  { %4430 = vmatprep.subr.bf16.mxu1 %v6470_v47  ;;  %v6558_v47 = vld [vmem:[%s9913_s1 + $0x440] ss:$36 sps:$4 sm:$0xff]  }
  0x6c   :  { %4388 = vmatpush2.bf16.msra.mxu0 %v6465_v49  ;;  %v6563_v49 = vld [vmem:[%s9913_s1 + $0x148c] ss:$36 sps:$4 sm:$0xff]  }
  0x6d   :  { %4431 = vmatpush2.bf16.msra.mxu1 %v6468_v51  ;;  %4389 = vmatprep.subr.bf16.mxu0 %v6473_v52  ;;  %v6566_v51 = vld [vmem:[%s9913_s1 + $0x3fc] ss:$36 sps:$4 sm:$0xff]   ;;  %v6561_v52 = vld [vmem:[%s9913_s1 + $0x1488] ss:$36 sps:$4 sm:$0xff]  }
  0x6e   :  { %4432 = vmatprep.subr.bf16.mxu1 %v6476_v53  ;;  %v6564_v53 = vld [vmem:[%s9913_s1 + $0x3f8] ss:$36 sps:$4 sm:$0xff]  }
  0x70   :  { %4390 = vmatpush2.bf16.msra.mxu0 %v6471_v54  ;;  %v6569_v54 = vld [vmem:[%s9913_s1 + $0x1444] ss:$36 sps:$4 sm:$0xff]  }
  0x71   :  { %4433 = vmatpush2.bf16.msra.mxu1 %v6474_v55  ;;  %4391 = vmatprep.subr.bf16.mxu0 %v6479_v56  ;;  %v6572_v55 = vld [vmem:[%s9913_s1 + $0x3b4] ss:$36 sps:$4 sm:$0xff]   ;;  %v6567_v56 = vld [vmem:[%s9913_s1 + $0x1440] ss:$36 sps:$4 sm:$0xff]  }
  0x72   :  { %4434 = vmatprep.subr.bf16.mxu1 %v6482_v57  ;;  %v6570_v57 = vld [vmem:[%s9913_s1 + $0x3b0] ss:$36 sps:$4 sm:$0xff]  }
  0x74   :  { %4392 = vmatpush2.bf16.msra.mxu0 %v6477_v58  ;;  %v6578_v58 = vld [vmem:[%s9913_s1 + $0x36c] ss:$36 sps:$4 sm:$0xff]  }
  0x75   :  { %4435 = vmatpush2.bf16.msra.mxu1 %v6480_v59  ;;  %4393 = vmatprep.subr.bf16.mxu0 %v6485_v60  ;;  %v6581_v59 = vld [vmem:[%s9913_s1 + $0x684] ss:$36 sps:$4 sm:$0xff]  }
  0x76   :  { %4436 = vmatprep.subr.bf16.mxu1 %v6488_v61  ;;  %v7951_v60 = vld [vmem:[%s9914_s0 + $0x20] ss:$40 sps:$4 sm:$0xff]  }
  0x77   :  { %v6576_v61 = vld [vmem:[%s9913_s1 + $0x368] ss:$36 sps:$4 sm:$0xff]  }
  0x78   :  { %4394 = vmatpush2.bf16.msra.mxu0 %v6483_v62  ;;  %v6579_v62 = vld [vmem:[%s9913_s1 + $0x680] ss:$36 sps:$4 sm:$0xff]  }
  0x79   :  { %4437 = vmatpush2.bf16.msra.mxu1 %v6486_v63  ;;  %4395 = vmatprep.subr.bf16.mxu0 %v6491_v0  ;;  %v6584_v63 = vld [vmem:[%s9913_s1 + $0x324] ss:$36 sps:$4 sm:$0xff]   ;;  %v6587_v0 = vld [vmem:[%s9913_s1 + $0x63c] ss:$36 sps:$4 sm:$0xff]  }
  0x7a   :  { %4438 = vmatprep.subr.bf16.mxu1 %v6494_v1  ;;  %v6582_v1 = vld [vmem:[%s9913_s1 + $0x320] ss:$36 sps:$4 sm:$0xff]  }
  0x7c   :  { %4396 = vmatpush2.bf16.msra.mxu0 %v6489_v2  ;;  %v6585_v2 = vld [vmem:[%s9913_s1 + $0x638] ss:$36 sps:$4 sm:$0xff]  }
  0x7d   :  { %4439 = vmatpush2.bf16.msra.mxu1 %v6492_v3  ;;  %4397 = vmatprep.subr.bf16.mxu0 %v6497_v5  ;;  %v6590_v3 = vld [vmem:[%s9913_s1 + $0x2dc] ss:$36 sps:$4 sm:$0xff]   ;;  %v6593_v5 = vld [vmem:[%s9913_s1 + $0x5f4] ss:$36 sps:$4 sm:$0xff]  }
  0x7e   :  { %4440 = vmatprep.subr.bf16.mxu1 %v6500_v6  ;;  %v6588_v6 = vld [vmem:[%s9913_s1 + $0x2d8] ss:$36 sps:$4 sm:$0xff]  }
  0x80   :  { %4398 = vmatpush2.bf16.msra.mxu0 %v6495_v7  ;;  %v6591_v7 = vld [vmem:[%s9913_s1 + $0x5f0] ss:$36 sps:$4 sm:$0xff]  }
  0x81   :  { %4441 = vmatpush2.bf16.msra.mxu1 %v6498_v8  ;;  %4453 = vmatprep.subr.bf16.mxu0 %v6509_v9  ;;  %v6596_v8 = vld [vmem:[%s9913_s1 + $0x294] ss:$36 sps:$4 sm:$0xff]  }
  0x82   :  { %4496 = vmatprep.subr.bf16.mxu1 %v6512_v10  ;;  %v6594_v9 = vld [vmem:[%s9913_s1 + $0x290] ss:$36 sps:$4 sm:$0xff]   ;;  %v6597_v10 = vld [vmem:[%s9913_s1 + $0x5a8] ss:$36 sps:$4 sm:$0xff]  }
  0x83   :  { %4400 = vmatmul.mubr.bf16.vlgmr.msra.gmra.mxu0 %v7802_v11 }
  0x84   :  { %4443 = vmatmul.mubr.bf16.vlgmr.msra.gmra.mxu1 %v6506_v12  ;;  %4454 = vmatpush1.bf16.msra.mxu0 %v6507_v13  ;;  %v6602_v12 = vld [vmem:[%s9913_s1 + $0x24c] ss:$36 sps:$4 sm:$0xff]   ;;  %v6605_v13 = vld [vmem:[%s9913_s1 + $0x564] ss:$36 sps:$4 sm:$0xff]  }
  0x85   :  { %4497 = vmatpush1.bf16.msra.mxu1 %v6510_v14  ;;  %4455 = vmatprep.subr.bf16.mxu0 %v6515_v15  ;;  %v6600_v14 = vld [vmem:[%s9913_s1 + $0x248] ss:$36 sps:$4 sm:$0xff]   ;;  %v6603_v15 = vld [vmem:[%s9913_s1 + $0x560] ss:$36 sps:$4 sm:$0xff]  }
  0x86   :  { %4498 = vmatprep.subr.bf16.mxu1 %v6518_v16  ;;  %6207 = vmatprep.mubr.msk.bf16.mxu0 %vm4277_vm0, %v7822_v17  ;;  %v6608_v16 = vld [vmem:[%s9913_s1 + $0x51c] ss:$36 sps:$4 sm:$0xff]  }
  0x87   :  { %4528 = vmatprep.mubr.bf16.mxu1 %v7526_v48  ;;  %v6530_v48 = vld [vmem:[%s9913_s1 + $0x12c] ss:$36 sps:$4 sm:$0xff]  }
  0x88   :  { %4456 = vmatpush1.bf16.msra.mxu0 %v6513_v18  ;;  %v6611_v18 = vld [vmem:[%s9913_s1 + $0xb04] ss:$36 sps:$4 sm:$0xff]  }
  0x89   :  { %4499 = vmatpush1.bf16.msra.mxu1 %v6516_v19  ;;  %4457 = vmatprep.subr.bf16.mxu0 %v6521_v20  ;;  %v6606_v19 = vld [vmem:[%s9913_s1 + $0x518] ss:$36 sps:$4 sm:$0xff]   ;;  %v6609_v20 = vld [vmem:[%s9913_s1 + $0xb00] ss:$36 sps:$4 sm:$0xff]  }
  0x8a   :  { %4500 = vmatprep.subr.bf16.mxu1 %v6524_v21  ;;  %v6614_v21 = vld [vmem:[%s9913_s1 + $0x4d4] ss:$36 sps:$4 sm:$0xff]  }
  0x8c   :  { %4458 = vmatpush1.bf16.msra.mxu0 %v6519_v22  ;;  %v6617_v22 = vld [vmem:[%s9913_s1 + $0xabc] ss:$36 sps:$4 sm:$0xff]  }
  0x8d   :  { %4501 = vmatpush1.bf16.msra.mxu1 %v6522_v23  ;;  %4459 = vmatprep.subr.bf16.mxu0 %v6527_v24  ;;  %v6612_v23 = vld [vmem:[%s9913_s1 + $0x4d0] ss:$36 sps:$4 sm:$0xff]   ;;  %v6615_v24 = vld [vmem:[%s9913_s1 + $0xab8] ss:$36 sps:$4 sm:$0xff]  }
  0x8e   :  { %4502 = vmatprep.subr.bf16.mxu1 %v6530_v48  ;;  %v6620_v48 = vld [vmem:[%s9913_s1 + $0x48c] ss:$36 sps:$4 sm:$0xff]  }
  0x90   :  { %4460 = vmatpush1.bf16.msra.mxu0 %v6525_v25  ;;  %v6618_v25 = vld [vmem:[%s9913_s1 + $0x488] ss:$36 sps:$4 sm:$0xff]  }
  0x91   :  { %4503 = vmatpush1.bf16.msra.mxu1 %v6528_v26  ;;  %4461 = vmatprep.subr.bf16.mxu0 %v6533_v27  ;;  %v6621_v26 = vld [vmem:[%s9913_s1 + $0xa70] ss:$36 sps:$4 sm:$0xff]   ;;  %v6626_v27 = vld [vmem:[%s9913_s1 + $0x8c4] ss:$36 sps:$4 sm:$0xff]  }
  0x92   :  { %4504 = vmatprep.subr.bf16.mxu1 %v6536_v28  ;;  %v6624_v28 = vld [vmem:[%s9913_s1 + $0x8c0] ss:$36 sps:$4 sm:$0xff]  }
  0x94   :  { %4462 = vmatpush1.bf16.msra.mxu0 %v6531_v29  ;;  %v6627_v29 = vld [vmem:[%s9913_s1 + $0xa28] ss:$36 sps:$4 sm:$0xff]  }
  0x95   :  { %4505 = vmatpush1.bf16.msra.mxu1 %v6534_v30  ;;  %4463 = vmatprep.subr.bf16.mxu0 %v6539_v31  ;;  %v6632_v30 = vld [vmem:[%s9913_s1 + $0x87c] ss:$36 sps:$4 sm:$0xff]   ;;  %v6635_v31 = vld [vmem:[%s9913_s1 + $0x9e4] ss:$36 sps:$4 sm:$0xff]  }
  0x96   :  { %4506 = vmatprep.subr.bf16.mxu1 %v6542_v32  ;;  %v6630_v32 = vld [vmem:[%s9913_s1 + $0x878] ss:$36 sps:$4 sm:$0xff]  }
  0x98   :  { %4464 = vmatpush1.bf16.msra.mxu0 %v6537_v33  ;;  %v6633_v33 = vld [vmem:[%s9913_s1 + $0x9e0] ss:$36 sps:$4 sm:$0xff]  }
  0x99   :  { %4507 = vmatpush1.bf16.msra.mxu1 %v6540_v35  ;;  %4465 = vmatprep.subr.bf16.mxu0 %v6545_v36  ;;  %v6638_v35 = vld [vmem:[%s9913_s1 + $0x834] ss:$36 sps:$4 sm:$0xff]   ;;  %v6641_v36 = vld [vmem:[%s9913_s1 + $0x99c] ss:$36 sps:$4 sm:$0xff]  }
  0x9a   :  { %4508 = vmatprep.subr.bf16.mxu1 %v6548_v37  ;;  %v6636_v37 = vld [vmem:[%s9913_s1 + $0x830] ss:$36 sps:$4 sm:$0xff]  }
  0x9c   :  { %4466 = vmatpush1.bf16.msra.mxu0 %v6543_v38  ;;  %v6639_v38 = vld [vmem:[%s9913_s1 + $0x998] ss:$36 sps:$4 sm:$0xff]  }
  0x9d   :  { %4509 = vmatpush1.bf16.msra.mxu1 %v6546_v39  ;;  %4467 = vmatprep.subr.bf16.mxu0 %v6551_v40  ;;  %v6644_v39 = vld [vmem:[%s9913_s1 + $0x7ec] ss:$36 sps:$4 sm:$0xff]   ;;  %v6647_v40 = vld [vmem:[%s9913_s1 + $0x954] ss:$36 sps:$4 sm:$0xff]  }
  0x9e   :  { %4510 = vmatprep.subr.bf16.mxu1 %v6554_v41  ;;  %v6642_v41 = vld [vmem:[%s9913_s1 + $0x7e8] ss:$36 sps:$4 sm:$0xff]  }
  0xa0   :  { %4468 = vmatpush1.bf16.msra.mxu0 %v6549_v42  ;;  %v6645_v42 = vld [vmem:[%s9913_s1 + $0x950] ss:$36 sps:$4 sm:$0xff]  }
  0xa1   :  { %4511 = vmatpush1.bf16.msra.mxu1 %v6552_v43  ;;  %4479 = vmatprep.subr.bf16.mxu0 %v6557_v44  ;;  %v6650_v43 = vld [vmem:[%s9913_s1 + $0x7a4] ss:$36 sps:$4 sm:$0xff]   ;;  %v6653_v44 = vld [vmem:[%s9913_s1 + $0x90c] ss:$36 sps:$4 sm:$0xff]  }
  0xa2   :  { %4512 = vmatprep.subr.bf16.mxu1 %v6560_v45  ;;  %v6648_v45 = vld [vmem:[%s9913_s1 + $0x7a0] ss:$36 sps:$4 sm:$0xff]  }
  0xa4   :  { %4480 = vmatpush2.bf16.msra.mxu0 %v6555_v46  ;;  %v6651_v46 = vld [vmem:[%s9913_s1 + $0x908] ss:$36 sps:$4 sm:$0xff]  }
  0xa5   :  { %4513 = vmatpush2.bf16.msra.mxu1 %v6558_v47  ;;  %4481 = vmatprep.subr.bf16.mxu0 %v6563_v49  ;;  %v6656_v47 = vld [vmem:[%s9913_s1 + $0x75c] ss:$36 sps:$4 sm:$0xff]   ;;  %v6659_v49 = vld [vmem:[%s9913_s1 + $0xd44] ss:$36 sps:$4 sm:$0xff]  }
  0xa6   :  { %4514 = vmatprep.subr.bf16.mxu1 %v6566_v51  ;;  %v6654_v51 = vld [vmem:[%s9913_s1 + $0x758] ss:$36 sps:$4 sm:$0xff]  }
  0xa8   :  { %4482 = vmatpush2.bf16.msra.mxu0 %v6561_v52  ;;  %v6657_v52 = vld [vmem:[%s9913_s1 + $0xd40] ss:$36 sps:$4 sm:$0xff]  }
  0xa9   :  { %4515 = vmatpush2.bf16.msra.mxu1 %v6564_v53  ;;  %4483 = vmatprep.subr.bf16.mxu0 %v6569_v54  ;;  %v6662_v53 = vld [vmem:[%s9913_s1 + $0x714] ss:$36 sps:$4 sm:$0xff]   ;;  %v6665_v54 = vld [vmem:[%s9913_s1 + $0xcfc] ss:$36 sps:$4 sm:$0xff]  }
  0xaa   :  { %4516 = vmatprep.subr.bf16.mxu1 %v6572_v55  ;;  %v6660_v55 = vld [vmem:[%s9913_s1 + $0x710] ss:$36 sps:$4 sm:$0xff]  }
  0xac   :  { %4484 = vmatpush2.bf16.msra.mxu0 %v6567_v56  ;;  %v6663_v56 = vld [vmem:[%s9913_s1 + $0xcf8] ss:$36 sps:$4 sm:$0xff]  }
  0xad   :  { %4517 = vmatpush2.bf16.msra.mxu1 %v6570_v57  ;;  %4539 = vmatprep.subr.bf16.mxu0 %v6581_v59  ;;  %v6668_v57 = vld [vmem:[%s9913_s1 + $0x6cc] ss:$36 sps:$4 sm:$0xff]  }
  0xae   :  { %4518 = vmatprep.subr.bf16.mxu1 %v6578_v58  ;;  %v6671_v58 = vld [vmem:[%s9913_s1 + $0xcb4] ss:$36 sps:$4 sm:$0xff]   ;;  %v6666_v59 = vld [vmem:[%s9913_s1 + $0x6c8] ss:$36 sps:$4 sm:$0xff]  }
  0xaf   :  { %4486 = vmatmul.mubr.bf16.vlgmr.msra.gmra.mxu0 %v7951_v60 }
  0xb0   :  { %4540 = vmatpush1.bf16.msra.mxu0 %v6579_v62  ;;  %4571 = vmatprep.mubr.bf16.mxu0 %v7534_v50  ;;  %v6599_v50 = vld [vmem:[%s9913_s1 + $0x5ac] ss:$36 sps:$4 sm:$0xff]  }
  0xb1   :  { %4519 = vmatpush2.bf16.msra.mxu1 %v6576_v61  ;;  %4541 = vmatprep.subr.bf16.mxu0 %v6587_v0  ;;  %v6669_v61 = vld [vmem:[%s9913_s1 + $0xcb0] ss:$36 sps:$4 sm:$0xff]   ;;  %v6672_v0 = vld [vmem:[%s9913_s1 + $0xc68] ss:$36 sps:$4 sm:$0xff]  }
  0xb2   :  { %4520 = vmatprep.subr.bf16.mxu1 %v6584_v63  ;;  %v6674_v62 = vld [vmem:[%s9913_s1 + $0xc6c] ss:$36 sps:$4 sm:$0xff]   ;;  %v6677_v63 = vld [vmem:[%s9913_s1 + $0xf84] ss:$36 sps:$4 sm:$0xff]  }
  0xb4   :  { %4542 = vmatpush1.bf16.msra.mxu0 %v6585_v2  ;;  %v6680_v2 = vld [vmem:[%s9913_s1 + $0xc24] ss:$36 sps:$4 sm:$0xff]  }
  0xb5   :  { %4521 = vmatpush2.bf16.msra.mxu1 %v6582_v1  ;;  %4543 = vmatprep.subr.bf16.mxu0 %v6593_v5  ;;  %v6675_v1 = vld [vmem:[%s9913_s1 + $0xf80] ss:$36 sps:$4 sm:$0xff]   ;;  %v7333_v5 = vld [vmem:[%s9914_s0 + $0x8] ss:$40 sps:$4 sm:$0xff]  }
  0xb6   :  { %4522 = vmatprep.subr.bf16.mxu1 %v6590_v3  ;;  %v6683_v3 = vld [vmem:[%s9913_s1 + $0xf3c] ss:$36 sps:$4 sm:$0xff]  }
  0xb8   :  { %4544 = vmatpush1.bf16.msra.mxu0 %v6591_v7  ;;  %v6681_v7 = vld [vmem:[%s9913_s1 + $0xf38] ss:$36 sps:$4 sm:$0xff]  }
  0xb9   :  { %4523 = vmatpush2.bf16.msra.mxu1 %v6588_v6  ;;  %4545 = vmatprep.subr.bf16.mxu0 %v6599_v50  ;;  %v6678_v6 = vld [vmem:[%s9913_s1 + $0xc20] ss:$36 sps:$4 sm:$0xff]   ;;  %v6689_v50 = vld [vmem:[%s9913_s1 + $0xef4] ss:$36 sps:$4 sm:$0xff]  }
  0xba   :  { %4524 = vmatprep.subr.bf16.mxu1 %v6596_v8  ;;  %v6686_v8 = vld [vmem:[%s9913_s1 + $0xbdc] ss:$36 sps:$4 sm:$0xff]  }
  0xbc   :  { %4546 = vmatpush1.bf16.msra.mxu0 %v6597_v10  ;;  %v6684_v10 = vld [vmem:[%s9913_s1 + $0xbd8] ss:$36 sps:$4 sm:$0xff]  }
  0xbd   :  { %4525 = vmatpush2.bf16.msra.mxu1 %v6594_v9  ;;  %4547 = vmatprep.subr.bf16.mxu0 %v6605_v13  ;;  %v7334_v9 = vld [vmem:[%s9914_s0 + $0x1c] ss:$40 sps:$4 sm:$0xff]   ;;  %v6692_v13 = vld [vmem:[%s9913_s1 + $0xb94] ss:$36 sps:$4 sm:$0xff]  }
  0xbe   :  { %4526 = vmatprep.subr.bf16.mxu1 %v6602_v12  ;;  %v6687_v12 = vld [vmem:[%s9913_s1 + $0xef0] ss:$36 sps:$4 sm:$0xff]  }
  0xc0   :  { %4548 = vmatpush1.bf16.msra.mxu0 %v6603_v15  ;;  %v6690_v15 = vld [vmem:[%s9913_s1 + $0xb90] ss:$36 sps:$4 sm:$0xff]  }
  0xc1   :  { %4527 = vmatpush2.bf16.msra.mxu1 %v6600_v14  ;;  %4549 = vmatprep.subr.bf16.mxu0 %v6608_v16  ;;  %v6695_v14 = vld [vmem:[%s9913_s1 + $0xeac] ss:$36 sps:$4 sm:$0xff]  }
  0xc2   :  { %4582 = vmatprep.subr.bf16.mxu1 %v6611_v18  ;;  %v6693_v16 = vld [vmem:[%s9913_s1 + $0xea8] ss:$36 sps:$4 sm:$0xff]  }
  0xc3   :  { %v6698_v18 = vld [vmem:[%s9913_s1 + $0xb4c] ss:$36 sps:$4 sm:$0xff]  }
  0xc4   :  { %4529 = vmatmul.mubr.bf16.vlgmr.msra.gmra.mxu1 %v7592_v4  ;;  %4550 = vmatpush1.bf16.msra.mxu0 %v6606_v19  ;;  %v6623_v4 = vld [vmem:[%s9913_s1 + $0xa74] ss:$36 sps:$4 sm:$0xff]   ;;  %v6701_v19 = vld [vmem:[%s9913_s1 + $0xe64] ss:$36 sps:$4 sm:$0xff]  }
  0xc5   :  { %4583 = vmatpush1.bf16.msra.mxu1 %v6609_v20  ;;  %4551 = vmatprep.subr.bf16.mxu0 %v6614_v21  ;;  %v6696_v20 = vld [vmem:[%s9913_s1 + $0xb48] ss:$36 sps:$4 sm:$0xff]   ;;  %v6699_v21 = vld [vmem:[%s9913_s1 + $0xe60] ss:$36 sps:$4 sm:$0xff]  }
  0xc6   :  { %4584 = vmatprep.subr.bf16.mxu1 %v6617_v22  ;;  %4614 = vmatprep.mubr.bf16.mxu1 %v7685_v34  ;;  %v6629_v34 = vld [vmem:[%s9913_s1 + $0xa2c] ss:$36 sps:$4 sm:$0xff]   ;;  %v6704_v22 = vld [vmem:[%s9913_s1 + $0xe1c] ss:$36 sps:$4 sm:$0xff]  }
  0xc8   :  { %4552 = vmatpush1.bf16.msra.mxu0 %v6612_v23  ;;  %v6707_v23 = vld [vmem:[%s9913_s1 + $0x1404] ss:$36 sps:$4 sm:$0xff]  }
  0xc9   :  { %4585 = vmatpush1.bf16.msra.mxu1 %v6615_v24  ;;  %4553 = vmatprep.subr.bf16.mxu0 %v6620_v48  ;;  %v6702_v24 = vld [vmem:[%s9913_s1 + $0xe18] ss:$36 sps:$4 sm:$0xff]   ;;  %v6705_v48 = vld [vmem:[%s9913_s1 + $0x1400] ss:$36 sps:$4 sm:$0xff]  }
  0xca   :  { %4586 = vmatprep.subr.bf16.mxu1 %v6623_v4  ;;  %v6710_v4 = vld [vmem:[%s9913_s1 + $0xdd4] ss:$36 sps:$4 sm:$0xff]  }
  0xcc   :  { %4554 = vmatpush1.bf16.msra.mxu0 %v6618_v25  ;;  %v6713_v25 = vld [vmem:[%s9913_s1 + $0x13bc] ss:$36 sps:$4 sm:$0xff]  }
  0xcd   :  { %4587 = vmatpush1.bf16.msra.mxu1 %v6621_v26  ;;  %4555 = vmatprep.subr.bf16.mxu0 %v6626_v27 }
  0xce   :  { %4588 = vmatprep.subr.bf16.mxu1 %v6629_v34  ;;  %v6708_v34 = vld [vmem:[%s9913_s1 + $0xdd0] ss:$36 sps:$4 sm:$0xff]  }
  0xd0   :  { %4556 = vmatpush2.bf16.msra.mxu0 %v6624_v28  ;;  %v6711_v28 = vld [vmem:[%s9913_s1 + $0x13b8] ss:$36 sps:$4 sm:$0xff]  }
  0xd1   :  { %4589 = vmatpush1.bf16.msra.mxu1 %v6627_v29  ;;  %4557 = vmatprep.subr.bf16.mxu0 %v6632_v30  ;;  %v6716_v30 = vld [vmem:[%s9913_s1 + $0xd8c] ss:$36 sps:$4 sm:$0xff]  }
  0xd2   :  { %4590 = vmatprep.subr.bf16.mxu1 %v6635_v31 }
  0xd4   :  { %4558 = vmatpush2.bf16.msra.mxu0 %v6630_v32 }
  0xd5   :  { %4591 = vmatpush1.bf16.msra.mxu1 %v6633_v33  ;;  %4559 = vmatprep.subr.bf16.mxu0 %v6638_v35 }
  0xd6   :  { %4592 = vmatprep.subr.bf16.mxu1 %v6641_v36 }
  0xd8   :  { %4560 = vmatpush2.bf16.msra.mxu0 %v6636_v37  ;;  %v6714_v37 = vld [vmem:[%s9913_s1 + $0xd88] ss:$36 sps:$4 sm:$0xff]  }
  0xd9   :  { %4593 = vmatpush1.bf16.msra.mxu1 %v6639_v38  ;;  %4561 = vmatprep.subr.bf16.mxu0 %v6644_v39  ;;  %v6717_v38 = vld [vmem:[%s9913_s1 + $0x1370] ss:$36 sps:$4 sm:$0xff]  }
  0xda   :  { %4594 = vmatprep.subr.bf16.mxu1 %v6647_v40  ;;  %v6722_v40 = vld [vmem:[%s9913_s1 + $0x11c4] ss:$36 sps:$4 sm:$0xff]  }
  0xdc   :  { %4562 = vmatpush2.bf16.msra.mxu0 %v6642_v41 }
  0xdd   :  { %4595 = vmatpush1.bf16.msra.mxu1 %v6645_v42  ;;  %4563 = vmatprep.subr.bf16.mxu0 %v6650_v43  ;;  %v6725_v42 = vld [vmem:[%s9913_s1 + $0x132c] ss:$36 sps:$4 sm:$0xff]  }
  0xde   :  { %4596 = vmatprep.subr.bf16.mxu1 %v6653_v44  ;;  %v6720_v44 = vld [vmem:[%s9913_s1 + $0x11c0] ss:$36 sps:$4 sm:$0xff]  }
  0xe0   :  { %4564 = vmatpush2.bf16.msra.mxu0 %v6648_v45  ;;  %v6723_v45 = vld [vmem:[%s9913_s1 + $0x1328] ss:$36 sps:$4 sm:$0xff]  }
  0xe1   :  { %4597 = vmatpush1.bf16.msra.mxu1 %v6651_v46  ;;  %4565 = vmatprep.subr.bf16.mxu0 %v6656_v47  ;;  %v6728_v46 = vld [vmem:[%s9913_s1 + $0x117c] ss:$36 sps:$4 sm:$0xff]   ;;  %v6731_v47 = vld [vmem:[%s9913_s1 + $0x12e4] ss:$36 sps:$4 sm:$0xff]  }
  0xe2   :  { %4598 = vmatprep.subr.bf16.mxu1 %v6659_v49  ;;  %v6726_v49 = vld [vmem:[%s9913_s1 + $0x1178] ss:$36 sps:$4 sm:$0xff]  }
  0xe4   :  { %4566 = vmatpush2.bf16.msra.mxu0 %v6654_v51  ;;  %v6729_v51 = vld [vmem:[%s9913_s1 + $0x12e0] ss:$36 sps:$4 sm:$0xff]  }
  0xe5   :  { %4599 = vmatpush2.bf16.msra.mxu1 %v6657_v52  ;;  %4567 = vmatprep.subr.bf16.mxu0 %v6662_v53  ;;  %v6734_v52 = vld [vmem:[%s9913_s1 + $0x1134] ss:$36 sps:$4 sm:$0xff]   ;;  %v6737_v53 = vld [vmem:[%s9913_s1 + $0x129c] ss:$36 sps:$4 sm:$0xff]  }
  0xe6   :  { %4600 = vmatprep.subr.bf16.mxu1 %v6665_v54  ;;  %v6732_v54 = vld [vmem:[%s9913_s1 + $0x1130] ss:$36 sps:$4 sm:$0xff]  }
  0xe8   :  { %4568 = vmatpush2.bf16.msra.mxu0 %v6660_v55  ;;  %v6735_v55 = vld [vmem:[%s9913_s1 + $0x1298] ss:$36 sps:$4 sm:$0xff]  }
  0xe9   :  { %4601 = vmatpush2.bf16.msra.mxu1 %v6663_v56  ;;  %4569 = vmatprep.subr.bf16.mxu0 %v6668_v57  ;;  %v6740_v56 = vld [vmem:[%s9913_s1 + $0x10ec] ss:$36 sps:$4 sm:$0xff]   ;;  %v6743_v57 = vld [vmem:[%s9913_s1 + $0x1254] ss:$36 sps:$4 sm:$0xff]  }
  0xea   :  { %4602 = vmatprep.subr.bf16.mxu1 %v6671_v58  ;;  %v6738_v58 = vld [vmem:[%s9913_s1 + $0x10e8] ss:$36 sps:$4 sm:$0xff]  }
  0xec   :  { %4570 = vmatpush2.bf16.msra.mxu0 %v6666_v59  ;;  %v6741_v59 = vld [vmem:[%s9913_s1 + $0x1250] ss:$36 sps:$4 sm:$0xff]  }
  0xed   :  { %4603 = vmatpush2.bf16.msra.mxu1 %v6669_v61  ;;  %4625 = vmatprep.subr.bf16.mxu0 %v6677_v63  ;;  %v6746_v61 = vld [vmem:[%s9913_s1 + $0x10a4] ss:$36 sps:$4 sm:$0xff]  }
  0xee   :  { %4604 = vmatprep.subr.bf16.mxu1 %v6674_v62  ;;  %v6749_v62 = vld [vmem:[%s9913_s1 + $0x120c] ss:$36 sps:$4 sm:$0xff]   ;;  %v6744_v63 = vld [vmem:[%s9913_s1 + $0x10a0] ss:$36 sps:$4 sm:$0xff]  }
  0xef   :  { %4572 = vmatmul.mubr.bf16.vlgmr.msra.gmra.mxu0 %v7333_v5  ;;  %v6753_v5 = vld [vmem:[%s9913_s1 + $0x14d8] ss:$36 sps:$4 sm:$0xff]  }
  0xf0   :  { %4626 = vmatpush1.bf16.msra.mxu0 %v6675_v1  ;;  %4657 = vmatprep.mubr.bf16.mxu0 %v7334_v9  ;;  %v6752_v1 = vld [vmem:[%s9913_s1 + $0x105c] ss:$36 sps:$4 sm:$0xff]   ;;  %v6764_v9 = vld [vmem:[%s9913_s1 + $0xfcc] ss:$36 sps:$4 sm:$0xff]  }
  0xf1   :  { %4605 = vmatpush2.bf16.msra.mxu1 %v6672_v0  ;;  %4627 = vmatprep.subr.bf16.mxu0 %v6683_v3  ;;  %v6747_v0 = vld [vmem:[%s9913_s1 + $0x1208] ss:$36 sps:$4 sm:$0xff]   ;;  %v6750_v3 = vld [vmem:[%s9913_s1 + $0x1058] ss:$36 sps:$4 sm:$0xff]  }
  0xf2   :  { %4606 = vmatprep.subr.bf16.mxu1 %v6680_v2  ;;  %v6755_v2 = vld [vmem:[%s9913_s1 + $0x14dc] ss:$36 sps:$4 sm:$0xff]  }
  0xf4   :  { %4628 = vmatpush1.bf16.msra.mxu0 %v6681_v7  ;;  %v6761_v7 = vld [vmem:[%s9913_s1 + $0x1494] ss:$36 sps:$4 sm:$0xff]  }
  0xf5   :  { %4607 = vmatpush2.bf16.msra.mxu1 %v6678_v6  ;;  %4629 = vmatprep.subr.bf16.mxu0 %v6689_v50  ;;  %v6758_v6 = vld [vmem:[%s9913_s1 + $0x1014] ss:$36 sps:$4 sm:$0xff]  }
  0xf6   :  { %4608 = vmatprep.subr.bf16.mxu1 %v6686_v8  ;;  %v6756_v8 = vld [vmem:[%s9913_s1 + $0x1010] ss:$36 sps:$4 sm:$0xff]  }
  0xf7   :  { %v6759_v50 = vld [vmem:[%s9913_s1 + $0x1490] ss:$36 sps:$4 sm:$0xff]  }
  0xf8   :  { %4630 = vmatpush1.bf16.msra.mxu0 %v6687_v12  ;;  %v6762_v12 = vld [vmem:[%s9913_s1 + $0xfc8] ss:$36 sps:$4 sm:$0xff]  }
  0xf9   :  { %4609 = vmatpush2.bf16.msra.mxu1 %v6684_v10  ;;  %4631 = vmatprep.subr.bf16.mxu0 %v6695_v14  ;;  %v6767_v10 = vld [vmem:[%s9913_s1 + $0x144c] ss:$36 sps:$4 sm:$0xff]  }
  0xfa   :  { %4610 = vmatprep.subr.bf16.mxu1 %v6692_v13  ;;  %v6765_v13 = vld [vmem:[%s9913_s1 + $0x1448] ss:$36 sps:$4 sm:$0xff]  }
  0xfb   :  { %v6770_v14 = vld [vmem:[%s9913_s1 + $0x20c] ss:$36 sps:$4 sm:$0xff]  }
  0xfc   :  { %4632 = vmatpush1.bf16.msra.mxu0 %v6693_v16  ;;  %v6768_v16 = vld [vmem:[%s9913_s1 + $0x208] ss:$36 sps:$4 sm:$0xff]  }
  0xfd   :  { %4611 = vmatpush2.bf16.msra.mxu1 %v6690_v15  ;;  %4633 = vmatprep.subr.bf16.mxu0 %v6701_v19  ;;  %v6773_v15 = vld [vmem:[%s9913_s1 + $0x68c] ss:$36 sps:$4 sm:$0xff]   ;;  %v6776_v19 = vld [vmem:[%s9913_s1 + $0x1c4] ss:$36 sps:$4 sm:$0xff]  }
  0xfe   :  { %4612 = vmatprep.subr.bf16.mxu1 %v6698_v18  ;;  %v6771_v18 = vld [vmem:[%s9913_s1 + $0x688] ss:$36 sps:$4 sm:$0xff]  }
 0x100   :  { %4634 = vmatpush1.bf16.msra.mxu0 %v6699_v21  ;;  %v6774_v21 = vld [vmem:[%s9913_s1 + $0x1c0] ss:$36 sps:$4 sm:$0xff]  }
 0x101   :  { %4613 = vmatpush2.bf16.msra.mxu1 %v6696_v20  ;;  %4635 = vmatprep.subr.bf16.mxu0 %v6704_v22  ;;  %v6779_v20 = vld [vmem:[%s9913_s1 + $0x644] ss:$36 sps:$4 sm:$0xff]  }
 0x102   :  { %4668 = vmatprep.subr.bf16.mxu1 %v6707_v23  ;;  %v6777_v22 = vld [vmem:[%s9913_s1 + $0x640] ss:$36 sps:$4 sm:$0xff]  }
 0x103   :  { %v4315_v26 = vpop.f32.mrf.mxu0  ;;  %v7335_v23 = vld [vmem:[%s9914_s0 + $0x18] ss:$40 sps:$4 sm:$0xff]  }
 0x104   :  { %v4358_v27 = vpop.f32.mrf.mxu1  ;;  %4615 = vmatmul.mubr.bf16.vlgmr.msra.gmra.mxu1 %v7802_v11  ;;  %4636 = vmatpush1.bf16.msra.mxu0 %v6702_v24  ;;  %v6719_v11 = vld [vmem:[%s9913_s1 + $0x1374] ss:$36 sps:$4 sm:$0xff]   ;;  %v6782_v24 = vld [vmem:[%s9913_s1 + $0x17c] ss:$36 sps:$4 sm:$0xff]  }
 0x105   :  { %v8234_v29 = vadd.f32 %v4358_v27, %v4315_v26  ;;  %4669 = vmatpush1.bf16.msra.mxu1 %v6705_v48  ;;  %v4317_v31 = vpop.f32.mrf.mxu0  ;;  %4637 = vmatprep.subr.bf16.mxu0 %v6710_v4  ;;  %v6785_v48 = vld [vmem:[%s9913_s1 + $0x5fc] ss:$36 sps:$4 sm:$0xff]   ;;  %v7337_v26 = vld [vmem:[%s9914_s0 + $0xc] ss:$40 sps:$4 sm:$0xff]  }
 0x106   :  { %v4360_v32 = vpop.f32.mrf.mxu1  ;;  %4670 = vmatprep.subr.bf16.mxu1 %v6713_v25  ;;  %6208 = vmatprep.mubr.msk.bf16.mxu1 %vm4277_vm0, %v7822_v17  ;;  %v6780_v4 = vld [vmem:[%s9913_s1 + $0x178] ss:$36 sps:$4 sm:$0xff]   ;;  %v7336_v25 = vld [vmem:[%s9914_s0 + $0x4] ss:$40 sps:$4 sm:$0xff]  }
 0x107   :  { %v8242_v33 = vadd.f32 %v4360_v32, %v4317_v31  ;;  %v4319_v35 = vpop.f32.mrf.mxu0  ;;  %v6788_v27 = vld [vmem:[%s9913_s1 + $0x134] ss:$36 sps:$4 sm:$0xff]   ;;  %v6794_v31 = vld [vmem:[%s9913_s1 + $0xec] ss:$36 sps:$4 sm:$0xff]  }
 0x108   :  { %v4362_v36 = vpop.f32.mrf.mxu1  ;;  %4638 = vmatpush1.bf16.msra.mxu0 %v6708_v34  ;;  %v6791_v34 = vld [vmem:[%s9913_s1 + $0x5b4] ss:$36 sps:$4 sm:$0xff]   ;;  %v6797_v32 = vld [vmem:[%s9913_s1 + $0x56c] ss:$36 sps:$4 sm:$0xff]  }
 0x109   :  { %v8252_v39 = vadd.f32 %v4362_v36, %v4319_v35  ;;  %4671 = vmatpush1.bf16.msra.mxu1 %v6711_v28  ;;  %v4321_v41 = vpop.f32.mrf.mxu0  ;;  %4639 = vmatprep.subr.bf16.mxu0 %v6716_v30  ;;  %v6786_v28 = vld [vmem:[%s9913_s1 + $0x130] ss:$36 sps:$4 sm:$0xff]   ;;  %v6795_v35 = vld [vmem:[%s9913_s1 + $0x568] ss:$36 sps:$4 sm:$0xff]  }
 0x10a   :  { %v4364_v17 = vpop.f32.mrf.mxu1  ;;  %4672 = vmatprep.subr.bf16.mxu1 %v6719_v11  ;;  %v6789_v30 = vld [vmem:[%s9913_s1 + $0x5b0] ss:$36 sps:$4 sm:$0xff]   ;;  %v6792_v11 = vld [vmem:[%s9913_s1 + $0xe8] ss:$36 sps:$4 sm:$0xff]  }
 0x10b   :  { %v8260_v43 = vadd.f32 %v4364_v17, %v4321_v41  ;;  %v6800_v36 = vld [vmem:[%s9913_s1 + $0xa4] ss:$36 sps:$4 sm:$0xff]   ;;  %v6806_v41 = vld [vmem:[%s9913_s1 + $0x5c] ss:$36 sps:$4 sm:$0xff]  }
 0x10c   :  { %4640 = vmatpush1.bf16.msra.mxu0 %v6714_v37  ;;  %v6803_v37 = vld [vmem:[%s9913_s1 + $0x524] ss:$36 sps:$4 sm:$0xff]   ;;  %v6809_v17 = vld [vmem:[%s9913_s1 + $0x4dc] ss:$36 sps:$4 sm:$0xff]  }
 0x10d   :  { %4673 = vmatpush1.bf16.msra.mxu1 %v6717_v38  ;;  %4641 = vmatprep.subr.bf16.mxu0 %v6722_v40  ;;  %v6798_v38 = vld [vmem:[%s9913_s1 + $0xa0] ss:$36 sps:$4 sm:$0xff]  }
 0x10e   :  { %4674 = vmatprep.subr.bf16.mxu1 %v6725_v42  ;;  %v6801_v40 = vld [vmem:[%s9913_s1 + $0x520] ss:$36 sps:$4 sm:$0xff]   ;;  %v6804_v42 = vld [vmem:[%s9913_s1 + $0x58] ss:$36 sps:$4 sm:$0xff]  }
 0x110   :  { %4642 = vmatpush2.bf16.msra.mxu0 %v6720_v44  ;;  %v6807_v44 = vld [vmem:[%s9913_s1 + $0x4d8] ss:$36 sps:$4 sm:$0xff]  }
 0x111   :  { %4675 = vmatpush1.bf16.msra.mxu1 %v6723_v45  ;;  %4643 = vmatprep.subr.bf16.mxu0 %v6728_v46 }
 0x112   :  { %4676 = vmatprep.subr.bf16.mxu1 %v6731_v47 }
 0x114   :  { %4644 = vmatpush2.bf16.msra.mxu0 %v6726_v49 }
 0x115   :  { %4677 = vmatpush1.bf16.msra.mxu1 %v6729_v51  ;;  %4645 = vmatprep.subr.bf16.mxu0 %v6734_v52  ;;  %v6812_v52 = vld [vmem:[%s9913_s1 + $0x14] ss:$36 sps:$4 sm:$0xff]  }
 0x116   :  { %4678 = vmatprep.subr.bf16.mxu1 %v6737_v53  ;;  %v6815_v53 = vld [vmem:[%s9913_s1 + $0x494] ss:$36 sps:$4 sm:$0xff]  }
 0x118   :  { %4646 = vmatpush2.bf16.msra.mxu0 %v6732_v54 }
 0x119   :  { %4679 = vmatpush1.bf16.msra.mxu1 %v6735_v55  ;;  %4647 = vmatprep.subr.bf16.mxu0 %v6740_v56  ;;  %v6813_v56 = vld [vmem:[%s9913_s1 + $0x490] ss:$36 sps:$4 sm:$0xff]  }
 0x11a   :  { %4680 = vmatprep.subr.bf16.mxu1 %v6743_v57 }
 0x11c   :  { %4648 = vmatpush2.bf16.msra.mxu0 %v6738_v58 }
 0x11d   :  { %4681 = vmatpush1.bf16.msra.mxu1 %v6741_v59  ;;  %4649 = vmatprep.subr.bf16.mxu0 %v6746_v61 }
 0x11e   :  { %4682 = vmatprep.subr.bf16.mxu1 %v6749_v62 }
 0x120   :  { %4650 = vmatpush2.bf16.msra.mxu0 %v6744_v63  ;;  %v6821_v63 = vld [vmem:[%s9913_s1 + $0x8cc] ss:$36 sps:$4 sm:$0xff]  }
 0x121   :  { %4683 = vmatpush1.bf16.msra.mxu1 %v6747_v0  ;;  %4651 = vmatprep.subr.bf16.mxu0 %v6752_v1 }
 0x122   :  { %4694 = vmatprep.subr.bf16.mxu1 %v6755_v2 }
 0x124   :  { %4652 = vmatpush2.bf16.msra.mxu0 %v6750_v3 }
 0x125   :  { %4695 = vmatpush2.bf16.msra.mxu1 %v6753_v5  ;;  %4653 = vmatprep.subr.bf16.mxu0 %v6758_v6  ;;  %v6819_v5 = vld [vmem:[%s9913_s1 + $0x8c8] ss:$36 sps:$4 sm:$0xff]  }
 0x126   :  { %4696 = vmatprep.subr.bf16.mxu1 %v6761_v7  ;;  %v6824_v6 = vld [vmem:[%s9913_s1 + $0x404] ss:$36 sps:$4 sm:$0xff]  }
 0x127   :  { %v6822_v7 = vld [vmem:[%s9913_s1 + $0x400] ss:$36 sps:$4 sm:$0xff]  }
 0x128   :  { %4654 = vmatpush2.bf16.msra.mxu0 %v6756_v8  ;;  %v6825_v8 = vld [vmem:[%s9913_s1 + $0x880] ss:$36 sps:$4 sm:$0xff]  }
 0x129   :  { %4697 = vmatpush2.bf16.msra.mxu1 %v6759_v50  ;;  %4655 = vmatprep.subr.bf16.mxu0 %v6764_v9  ;;  %v6830_v50 = vld [vmem:[%s9913_s1 + $0x3bc] ss:$36 sps:$4 sm:$0xff]  }
 0x12a   :  { %4698 = vmatprep.subr.bf16.mxu1 %v6767_v10  ;;  %v6833_v9 = vld [vmem:[%s9913_s1 + $0x83c] ss:$36 sps:$4 sm:$0xff]  }
 0x12b   :  { %v6828_v10 = vld [vmem:[%s9913_s1 + $0x3b8] ss:$36 sps:$4 sm:$0xff]  }
 0x12c   :  { %4656 = vmatpush2.bf16.msra.mxu0 %v6762_v12  ;;  %v6831_v12 = vld [vmem:[%s9913_s1 + $0x838] ss:$36 sps:$4 sm:$0xff]  }
 0x12d   :  { %4699 = vmatpush2.bf16.msra.mxu1 %v6765_v13  ;;  %4711 = vmatprep.subr.bf16.mxu0 %v6770_v14  ;;  %v6836_v13 = vld [vmem:[%s9913_s1 + $0x374] ss:$36 sps:$4 sm:$0xff]  }
 0x12e   :  { %4754 = vmatprep.subr.bf16.mxu1 %v6773_v15  ;;  %v6839_v14 = vld [vmem:[%s9913_s1 + $0x7f4] ss:$36 sps:$4 sm:$0xff]  }
 0x12f   :  { %4658 = vmatmul.mubr.bf16.vlgmr.msra.gmra.mxu0 %v7335_v23  ;;  %v6834_v15 = vld [vmem:[%s9913_s1 + $0x370] ss:$36 sps:$4 sm:$0xff]   ;;  %v6851_v23 = vld [vmem:[%s9913_s1 + $0x764] ss:$36 sps:$4 sm:$0xff]  }
 0x130   :  { %4701 = vmatmul.mubr.bf16.vlgmr.msra.gmra.mxu1 %v7951_v60  ;;  %4712 = vmatpush1.bf16.msra.mxu0 %v6768_v16  ;;  %v6783_v60 = vld [vmem:[%s9913_s1 + $0x5f8] ss:$36 sps:$4 sm:$0xff]   ;;  %v6837_v16 = vld [vmem:[%s9913_s1 + $0x7f0] ss:$36 sps:$4 sm:$0xff]  }
 0x131   :  { %4755 = vmatpush1.bf16.msra.mxu1 %v6771_v18  ;;  %4713 = vmatprep.subr.bf16.mxu0 %v6776_v19  ;;  %v6842_v18 = vld [vmem:[%s9913_s1 + $0x32c] ss:$36 sps:$4 sm:$0xff]  }
 0x132   :  { %4756 = vmatprep.subr.bf16.mxu1 %v6779_v20  ;;  %4743 = vmatprep.mubr.bf16.mxu0 %v7336_v25  ;;  %v6845_v19 = vld [vmem:[%s9913_s1 + $0x7ac] ss:$36 sps:$4 sm:$0xff]   ;;  %v6852_v25 = vld [vmem:[%s9913_s1 + $0x298] ss:$36 sps:$4 sm:$0xff]  }
 0x133   :  { %4786 = vmatprep.mubr.bf16.mxu1 %v7337_v26  ;;  %v6840_v20 = vld [vmem:[%s9913_s1 + $0x328] ss:$36 sps:$4 sm:$0xff]   ;;  %v6855_v26 = vld [vmem:[%s9913_s1 + $0x718] ss:$36 sps:$4 sm:$0xff]  }
 0x134   :  { %4714 = vmatpush1.bf16.msra.mxu0 %v6774_v21  ;;  %v6843_v21 = vld [vmem:[%s9913_s1 + $0x7a8] ss:$36 sps:$4 sm:$0xff]  }
 0x135   :  { %4757 = vmatpush1.bf16.msra.mxu1 %v6777_v22  ;;  %4715 = vmatprep.subr.bf16.mxu0 %v6782_v24  ;;  %v6848_v22 = vld [vmem:[%s9913_s1 + $0x2e4] ss:$36 sps:$4 sm:$0xff]  }
 0x136   :  { %4758 = vmatprep.subr.bf16.mxu1 %v6785_v48  ;;  %v6846_v24 = vld [vmem:[%s9913_s1 + $0x2e0] ss:$36 sps:$4 sm:$0xff]  }
 0x137   :  { %v6849_v48 = vld [vmem:[%s9913_s1 + $0x760] ss:$36 sps:$4 sm:$0xff]  }
 0x138   :  { %4716 = vmatpush1.bf16.msra.mxu0 %v6780_v4  ;;  %v6854_v4 = vld [vmem:[%s9913_s1 + $0x29c] ss:$36 sps:$4 sm:$0xff]  }
 0x139   :  { %4759 = vmatpush1.bf16.msra.mxu1 %v6783_v60  ;;  %4717 = vmatprep.subr.bf16.mxu0 %v6788_v27  ;;  %v6857_v60 = vld [vmem:[%s9913_s1 + $0x71c] ss:$36 sps:$4 sm:$0xff]   ;;  %v6860_v27 = vld [vmem:[%s9913_s1 + $0x254] ss:$36 sps:$4 sm:$0xff]  }
 0x13a   :  { %4760 = vmatprep.subr.bf16.mxu1 %v6791_v34  ;;  %v6863_v34 = vld [vmem:[%s9913_s1 + $0x6d4] ss:$36 sps:$4 sm:$0xff]  }
 0x13c   :  { %4718 = vmatpush1.bf16.msra.mxu0 %v6786_v28  ;;  %v6858_v28 = vld [vmem:[%s9913_s1 + $0x250] ss:$36 sps:$4 sm:$0xff]  }
 0x13d   :  { %4761 = vmatpush1.bf16.msra.mxu1 %v6789_v30  ;;  %4719 = vmatprep.subr.bf16.mxu0 %v6794_v31  ;;  %v6861_v30 = vld [vmem:[%s9913_s1 + $0x6d0] ss:$36 sps:$4 sm:$0xff]  }
 0x13e   :  { %4762 = vmatprep.subr.bf16.mxu1 %v6797_v32  ;;  %v6866_v31 = vld [vmem:[%s9913_s1 + $0xb0c] ss:$36 sps:$4 sm:$0xff]  }
 0x13f   :  { %v6869_v32 = vld [vmem:[%s9913_s1 + $0xf8c] ss:$36 sps:$4 sm:$0xff]  }
 0x140   :  { %4720 = vmatpush1.bf16.msra.mxu0 %v6792_v11  ;;  %v6864_v11 = vld [vmem:[%s9913_s1 + $0xb08] ss:$36 sps:$4 sm:$0xff]  }
 0x141   :  { %4763 = vmatpush1.bf16.msra.mxu1 %v6795_v35  ;;  %4721 = vmatprep.subr.bf16.mxu0 %v6800_v36  ;;  %v6867_v35 = vld [vmem:[%s9913_s1 + $0xf88] ss:$36 sps:$4 sm:$0xff]  }
 0x142   :  { %4764 = vmatprep.subr.bf16.mxu1 %v6803_v37  ;;  %v6872_v36 = vld [vmem:[%s9913_s1 + $0xac4] ss:$36 sps:$4 sm:$0xff]  }
 0x143   :  { %v4401_v45 = vpop.f32.mrf.mxu0  ;;  %v6875_v37 = vld [vmem:[%s9913_s1 + $0xf44] ss:$36 sps:$4 sm:$0xff]  }
 0x144   :  { %v4444_v46 = vpop.f32.mrf.mxu1  ;;  %v4402_v47 = vadd.f32 %v4401_v45, %v8234_v29  ;;  %4722 = vmatpush1.bf16.msra.mxu0 %v6798_v38  ;;  %v6810_v29 = vld [vmem:[%s9913_s1 + $0x10] ss:$36 sps:$4 sm:$0xff]   ;;  %v6870_v38 = vld [vmem:[%s9913_s1 + $0xac0] ss:$36 sps:$4 sm:$0xff]  }
 0x145   :  { %4765 = vmatpush1.bf16.msra.mxu1 %v6801_v40  ;;  %v4403_v49 = vpop.f32.mrf.mxu0  ;;  %4723 = vmatprep.subr.bf16.mxu0 %v6806_v41  ;;  %v6873_v40 = vld [vmem:[%s9913_s1 + $0xf40] ss:$36 sps:$4 sm:$0xff]  }
 0x146   :  { %v4446_v51 = vpop.f32.mrf.mxu1  ;;  %4766 = vmatprep.subr.bf16.mxu1 %v6809_v17  ;;  %v8453_v54 = vadd.f32 %v4444_v46, %v4402_v47  ;;  %v4404_v55 = vadd.f32 %v4403_v49, %v8242_v33  ;;  %v6818_v33 = vld [vmem:[%s9913_s1 + $0x44c] ss:$36 sps:$4 sm:$0xff]   ;;  %v8593_v17 = vld [vmem:[%s9914_s0] ss:$40 sps:$4 sm:$0xff]  }
 0x147   :  { %v4405_v57 = vpop.f32.mrf.mxu0  ;;  %v6878_v46 = vld [vmem:[%s9913_s1 + $0xa7c] ss:$36 sps:$4 sm:$0xff]  }
 0x148   :  { %v4448_v58 = vpop.f32.mrf.mxu1  ;;  %v8462_v59 = vadd.f32 %v4446_v51, %v4404_v55  ;;  %v4406_v61 = vadd.f32 %v4405_v57, %v8252_v39  ;;  %4724 = vmatpush1.bf16.msra.mxu0 %v6804_v42  ;;  %v6816_v39 = vld [vmem:[%s9913_s1 + $0x448] ss:$36 sps:$4 sm:$0xff]   ;;  %v6881_v47 = vld [vmem:[%s9913_s1 + $0xefc] ss:$36 sps:$4 sm:$0xff]  }
 0x149   :  { %4767 = vmatpush1.bf16.msra.mxu1 %v6807_v44  ;;  %v4407_v62 = vpop.f32.mrf.mxu0  ;;  %4725 = vmatprep.subr.bf16.mxu0 %v6812_v52  ;;  %v7339_v42 = vld [vmem:[%s9914_s0 + $0x8] ss:$40 sps:$4 sm:$0xff]   ;;  %v6876_v51 = vld [vmem:[%s9913_s1 + $0xa78] ss:$36 sps:$4 sm:$0xff]  }
 0x14a   :  { %4768 = vmatprep.subr.bf16.mxu1 %v6815_v53  ;;  %v8471_v0 = vadd.f32 %v4448_v58, %v4406_v61  ;;  %v4408_v1 = vadd.f32 %v4407_v62, %v8260_v43  ;;  %v4450_v2 = vpop.f32.mrf.mxu1  ;;  %v6827_v43 = vld [vmem:[%s9913_s1 + $0x884] ss:$36 sps:$4 sm:$0xff]   ;;  %v6879_v52 = vld [vmem:[%s9913_s1 + $0xef8] ss:$36 sps:$4 sm:$0xff]   ;;  %v6882_v61 = vld [vmem:[%s9913_s1 + $0xa30] ss:$36 sps:$4 sm:$0xff]  }
 0x14b   :  { %v8620_v53 = vld [vmem:[%s9914_s0 + $0x14] ss:$40 sps:$4 sm:$0xff]  }
 0x14c   :  { %v8474_v3 = vadd.f32 %v4450_v2, %v4408_v1  ;;  %4726 = vmatpush1.bf16.msra.mxu0 %v6810_v29  ;;  %v6884_v29 = vld [vmem:[%s9913_s1 + $0xa34] ss:$36 sps:$4 sm:$0xff]   ;;  %v6891_v1 = vld [vmem:[%s9913_s1 + $0xe68] ss:$36 sps:$4 sm:$0xff]  }
 0x14d   :  { %4769 = vmatpush1.bf16.msra.mxu1 %v6813_v56  ;;  %4727 = vmatprep.subr.bf16.mxu0 %v6818_v33  ;;  %v6887_v56 = vld [vmem:[%s9913_s1 + $0xeb4] ss:$36 sps:$4 sm:$0xff]   ;;  %v6890_v33 = vld [vmem:[%s9913_s1 + $0x9ec] ss:$36 sps:$4 sm:$0xff]   ;;  %v6896_v2 = vld [vmem:[%s9913_s1 + $0x9a4] ss:$36 sps:$4 sm:$0xff]  }
 0x14e   :  { %4770 = vmatprep.subr.bf16.mxu1 %v6821_v63  ;;  %v6885_v62 = vld [vmem:[%s9913_s1 + $0xeb0] ss:$36 sps:$4 sm:$0xff]  }
 0x14f   :  { %v6893_v63 = vld [vmem:[%s9913_s1 + $0xe6c] ss:$36 sps:$4 sm:$0xff]  }
 0x150   :  { %4728 = vmatpush2.bf16.msra.mxu0 %v6816_v39  ;;  %v6894_v39 = vld [vmem:[%s9913_s1 + $0x9a0] ss:$36 sps:$4 sm:$0xff]  }
 0x151   :  { %4771 = vmatpush2.bf16.msra.mxu1 %v6819_v5  ;;  %4729 = vmatprep.subr.bf16.mxu0 %v6824_v6  ;;  %v6897_v5 = vld [vmem:[%s9913_s1 + $0xe20] ss:$36 sps:$4 sm:$0xff]  }
 0x152   :  { %4772 = vmatprep.subr.bf16.mxu1 %v6827_v43  ;;  %v6902_v6 = vld [vmem:[%s9913_s1 + $0x95c] ss:$36 sps:$4 sm:$0xff]  }
 0x153   :  { %v6905_v43 = vld [vmem:[%s9913_s1 + $0xddc] ss:$36 sps:$4 sm:$0xff]  }
 0x154   :  { %4730 = vmatpush2.bf16.msra.mxu0 %v6822_v7  ;;  %v6900_v7 = vld [vmem:[%s9913_s1 + $0x958] ss:$36 sps:$4 sm:$0xff]  }
 0x155   :  { %4773 = vmatpush2.bf16.msra.mxu1 %v6825_v8  ;;  %4731 = vmatprep.subr.bf16.mxu0 %v6830_v50  ;;  %v6903_v8 = vld [vmem:[%s9913_s1 + $0xdd8] ss:$36 sps:$4 sm:$0xff]  }
 0x156   :  { %4774 = vmatprep.subr.bf16.mxu1 %v6833_v9  ;;  %v6908_v50 = vld [vmem:[%s9913_s1 + $0x914] ss:$36 sps:$4 sm:$0xff]  }
 0x157   :  { %v6911_v9 = vld [vmem:[%s9913_s1 + $0xd94] ss:$36 sps:$4 sm:$0xff]  }
 0x158   :  { %4732 = vmatpush2.bf16.msra.mxu0 %v6828_v10  ;;  %v6906_v10 = vld [vmem:[%s9913_s1 + $0x910] ss:$36 sps:$4 sm:$0xff]  }
 0x159   :  { %4775 = vmatpush2.bf16.msra.mxu1 %v6831_v12  ;;  %4733 = vmatprep.subr.bf16.mxu0 %v6836_v13  ;;  %v6909_v12 = vld [vmem:[%s9913_s1 + $0xd90] ss:$36 sps:$4 sm:$0xff]  }
 0x15a   :  { %4776 = vmatprep.subr.bf16.mxu1 %v6839_v14  ;;  %v6914_v13 = vld [vmem:[%s9913_s1 + $0xd4c] ss:$36 sps:$4 sm:$0xff]  }
 0x15b   :  { %v6917_v14 = vld [vmem:[%s9913_s1 + $0x11cc] ss:$36 sps:$4 sm:$0xff]  }
 0x15c   :  { %4734 = vmatpush2.bf16.msra.mxu0 %v6834_v15  ;;  %v6912_v15 = vld [vmem:[%s9913_s1 + $0xd48] ss:$36 sps:$4 sm:$0xff]  }
 0x15d   :  { %4777 = vmatpush2.bf16.msra.mxu1 %v6837_v16  ;;  %4735 = vmatprep.subr.bf16.mxu0 %v6842_v18  ;;  %v6915_v16 = vld [vmem:[%s9913_s1 + $0x11c8] ss:$36 sps:$4 sm:$0xff]  }
 0x15e   :  { %4778 = vmatprep.subr.bf16.mxu1 %v6845_v19  ;;  %v6920_v18 = vld [vmem:[%s9913_s1 + $0xd04] ss:$36 sps:$4 sm:$0xff]  }
 0x15f   :  { %v6923_v19 = vld [vmem:[%s9913_s1 + $0x1184] ss:$36 sps:$4 sm:$0xff]  }
 0x160   :  { %4736 = vmatpush2.bf16.msra.mxu0 %v6840_v20  ;;  %v6918_v20 = vld [vmem:[%s9913_s1 + $0xd00] ss:$36 sps:$4 sm:$0xff]  }
 0x161   :  { %4779 = vmatpush2.bf16.msra.mxu1 %v6843_v21  ;;  %4737 = vmatprep.subr.bf16.mxu0 %v6848_v22  ;;  %v6921_v21 = vld [vmem:[%s9913_s1 + $0x1180] ss:$36 sps:$4 sm:$0xff]  }
 0x162   :  { %4780 = vmatprep.subr.bf16.mxu1 %v6851_v23  ;;  %v6926_v22 = vld [vmem:[%s9913_s1 + $0xcbc] ss:$36 sps:$4 sm:$0xff]  }
 0x163   :  { %v6929_v23 = vld [vmem:[%s9913_s1 + $0x113c] ss:$36 sps:$4 sm:$0xff]  }
 0x164   :  { %4738 = vmatpush2.bf16.msra.mxu0 %v6846_v24  ;;  %v6924_v24 = vld [vmem:[%s9913_s1 + $0xcb8] ss:$36 sps:$4 sm:$0xff]  }
 0x165   :  { %4781 = vmatpush2.bf16.msra.mxu1 %v6849_v48  ;;  %4739 = vmatprep.subr.bf16.mxu0 %v6854_v4  ;;  %v6927_v48 = vld [vmem:[%s9913_s1 + $0x1138] ss:$36 sps:$4 sm:$0xff]  }
 0x166   :  { %4782 = vmatprep.subr.bf16.mxu1 %v6857_v60  ;;  %v6932_v4 = vld [vmem:[%s9913_s1 + $0xc74] ss:$36 sps:$4 sm:$0xff]  }
 0x167   :  { %v6935_v60 = vld [vmem:[%s9913_s1 + $0x10f4] ss:$36 sps:$4 sm:$0xff]  }
 0x168   :  { %4740 = vmatpush2.bf16.msra.mxu0 %v6852_v25  ;;  %v6930_v25 = vld [vmem:[%s9913_s1 + $0xc70] ss:$36 sps:$4 sm:$0xff]  }
 0x169   :  { %4783 = vmatpush2.bf16.msra.mxu1 %v6855_v26  ;;  %4741 = vmatprep.subr.bf16.mxu0 %v6860_v27  ;;  %v6933_v26 = vld [vmem:[%s9913_s1 + $0x10f0] ss:$36 sps:$4 sm:$0xff]  }
 0x16a   :  { %4784 = vmatprep.subr.bf16.mxu1 %v6863_v34  ;;  %v6938_v27 = vld [vmem:[%s9913_s1 + $0xc2c] ss:$36 sps:$4 sm:$0xff]  }
 0x16b   :  { %v6941_v34 = vld [vmem:[%s9913_s1 + $0x10ac] ss:$36 sps:$4 sm:$0xff]  }
 0x16c   :  { %4742 = vmatpush2.bf16.msra.mxu0 %v6858_v28  ;;  %v6936_v28 = vld [vmem:[%s9913_s1 + $0xc28] ss:$36 sps:$4 sm:$0xff]  }
 0x16d   :  { %4785 = vmatpush2.bf16.msra.mxu1 %v6861_v30  ;;  %4797 = vmatprep.subr.bf16.mxu0 %v6866_v31  ;;  %v6939_v30 = vld [vmem:[%s9913_s1 + $0x10a8] ss:$36 sps:$4 sm:$0xff]  }
 0x16e   :  { %4840 = vmatprep.subr.bf16.mxu1 %v6869_v32  ;;  %v6944_v31 = vld [vmem:[%s9913_s1 + $0xbe4] ss:$36 sps:$4 sm:$0xff]  }
 0x16f   :  { %v4487_v41 = vpop.f32.mrf.mxu0  ;;  %4744 = vmatmul.mubr.bf16.vlgmr.msra.gmra.mxu0 %v8593_v17  ;;  %v6947_v32 = vld [vmem:[%s9913_s1 + $0x1064] ss:$36 sps:$4 sm:$0xff]  }
 0x170   :  { %4787 = vmatmul.mubr.bf16.vlgmr.msra.gmra.mxu1 %v7339_v42  ;;  %v8600_v44 = vadd.f32 %v4487_v41, %v8453_v54  ;;  %4798 = vmatpush1.bf16.msra.mxu0 %v6864_v11  ;;  %v7341_v54 = vld [vmem:[%s9914_s0 + $0x1c] ss:$40 sps:$4 sm:$0xff]   ;;  %v6956_v41 = vld [vmem:[%s9913_s1 + $0xb54] ss:$36 sps:$4 sm:$0xff]  }
 0x171   :  { %4841 = vmatpush1.bf16.msra.mxu1 %v6867_v35  ;;  %v4489_v45 = vpop.f32.mrf.mxu0  ;;  %4799 = vmatprep.subr.bf16.mxu0 %v6872_v36  ;;  %v6942_v11 = vld [vmem:[%s9913_s1 + $0xbe0] ss:$36 sps:$4 sm:$0xff]   ;;  %v6959_v42 = vld [vmem:[%s9913_s1 + $0xfd4] ss:$36 sps:$4 sm:$0xff]  }
 0x172   :  { %9920 = vst [vmem:[#allocation2_spill] sm:$0xff] %v8600_v44  ;;  %4842 = vmatprep.subr.bf16.mxu1 %v6875_v37  ;;  %v8609_v49 = vadd.f32 %v4489_v45, %v8462_v59  ;;  %4829 = vmatprep.mubr.bf16.mxu0 %v8620_v53  ;;  %v6945_v35 = vld [vmem:[%s9913_s1 + $0x1060] ss:$36 sps:$4 sm:$0xff]   ;;  %v6954_v45 = vld [vmem:[%s9913_s1 + $0xb50] ss:$36 sps:$4 sm:$0xff]  }
 0x173   :  { %4872 = vmatprep.mubr.bf16.mxu1 %v7341_v54  ;;  %v4491_v55 = vpop.f32.mrf.mxu0  ;;  %v6950_v36 = vld [vmem:[%s9913_s1 + $0xb9c] ss:$36 sps:$4 sm:$0xff]   ;;  %v6960_v54 = vld [vmem:[%s9913_s1 + $0x1408] ss:$36 sps:$4 sm:$0xff]  }
 0x174   :  { %9921 = vst [vmem:[#allocation3_spill] sm:$0xff] %v8609_v49  ;;  %v8633_v57 = vadd.f32 %v4491_v55, %v8471_v0  ;;  %4800 = vmatpush1.bf16.msra.mxu0 %v6870_v38  ;;  %v6888_v0 = vld [vmem:[%s9913_s1 + $0x9e8] ss:$36 sps:$4 sm:$0xff]   ;;  %v6953_v37 = vld [vmem:[%s9913_s1 + $0x101c] ss:$36 sps:$4 sm:$0xff]  }
 0x175   :  { %4843 = vmatpush1.bf16.msra.mxu1 %v6873_v40  ;;  %v4493_v58 = vpop.f32.mrf.mxu0  ;;  %4801 = vmatprep.subr.bf16.mxu0 %v6878_v46  ;;  %v6948_v38 = vld [vmem:[%s9913_s1 + $0xb98] ss:$36 sps:$4 sm:$0xff]   ;;  %v6957_v46 = vld [vmem:[%s9913_s1 + $0xfd0] ss:$36 sps:$4 sm:$0xff]  }
 0x176   :  { %4844 = vmatprep.subr.bf16.mxu1 %v6881_v47  ;;  %v8636_v59 = vadd.f32 %v4493_v58, %v8474_v3  ;;  %v6899_v3 = vld [vmem:[%s9913_s1 + $0xe24] ss:$36 sps:$4 sm:$0xff]   ;;  %v6951_v40 = vld [vmem:[%s9913_s1 + $0x1018] ss:$36 sps:$4 sm:$0xff]   ;;  %v6963_v55 = vld [vmem:[%s9913_s1 + $0x210] ss:$36 sps:$4 sm:$0xff]  }
 0x178   :  { %4802 = vmatpush1.bf16.msra.mxu0 %v6876_v51  ;;  %v6962_v51 = vld [vmem:[%s9913_s1 + $0x140c] ss:$36 sps:$4 sm:$0xff]  }
 0x179   :  { %4845 = vmatpush1.bf16.msra.mxu1 %v6879_v52  ;;  %4803 = vmatprep.subr.bf16.mxu0 %v6884_v29  ;;  %v6965_v52 = vld [vmem:[%s9913_s1 + $0x214] ss:$36 sps:$4 sm:$0xff]   ;;  %v6968_v29 = vld [vmem:[%s9913_s1 + $0x13c4] ss:$36 sps:$4 sm:$0xff]  }
 0x17a   :  { %4846 = vmatprep.subr.bf16.mxu1 %v6887_v56  ;;  %v6971_v56 = vld [vmem:[%s9913_s1 + $0x1cc] ss:$36 sps:$4 sm:$0xff]  }
 0x17c   :  { %4804 = vmatpush1.bf16.msra.mxu0 %v6882_v61  ;;  %v6966_v61 = vld [vmem:[%s9913_s1 + $0x13c0] ss:$36 sps:$4 sm:$0xff]  }
 0x17d   :  { %4847 = vmatpush1.bf16.msra.mxu1 %v6885_v62  ;;  %4805 = vmatprep.subr.bf16.mxu0 %v6890_v33  ;;  %v6969_v62 = vld [vmem:[%s9913_s1 + $0x1c8] ss:$36 sps:$4 sm:$0xff]  }
 0x17e   :  { %4848 = vmatprep.subr.bf16.mxu1 %v6893_v63  ;;  %v8815_v63 = vld [vmem:[%s9914_s0 + $0x10] ss:$40 sps:$4 sm:$0xff]  }
 0x180   :  { %4806 = vmatpush1.bf16.msra.mxu0 %v6888_v0  ;;  %v8821_v0 = vld [vmem:[%s9914_s0 + $0x18] ss:$40 sps:$4 sm:$0xff]  }
 0x181   :  { %4849 = vmatpush1.bf16.msra.mxu1 %v6891_v1  ;;  %4807 = vmatprep.subr.bf16.mxu0 %v6896_v2  ;;  %v6974_v1 = vld [vmem:[%s9913_s1 + $0x137c] ss:$36 sps:$4 sm:$0xff]   ;;  %v6977_v2 = vld [vmem:[%s9913_s1 + $0x184] ss:$36 sps:$4 sm:$0xff]  }
 0x182   :  { %4850 = vmatprep.subr.bf16.mxu1 %v6899_v3 }
 0x184   :  { %4808 = vmatpush1.bf16.msra.mxu0 %v6894_v39  ;;  %v4530_v47 = vpop.f32.mrf.mxu1 }
 0x185   :  { %4851 = vmatpush1.bf16.msra.mxu1 %v6897_v5  ;;  %4809 = vmatprep.subr.bf16.mxu0 %v6902_v6 }
 0x186   :  { %4852 = vmatprep.subr.bf16.mxu1 %v6905_v43  ;;  %v4532_v58 = vpop.f32.mrf.mxu1  ;;  %v6972_v43 = vld [vmem:[%s9913_s1 + $0x1378] ss:$36 sps:$4 sm:$0xff]  }
 0x188   :  { %4810 = vmatpush1.bf16.msra.mxu0 %v6900_v7  ;;  %v4534_v39 = vpop.f32.mrf.mxu1  ;;  %v6975_v7 = vld [vmem:[%s9913_s1 + $0x180] ss:$36 sps:$4 sm:$0xff]  }
 0x189   :  { %4853 = vmatpush1.bf16.msra.mxu1 %v6903_v8  ;;  %4811 = vmatprep.subr.bf16.mxu0 %v6908_v50  ;;  %v8843_v8 = vld [vmem:[%s9914_s0 + $0x24] ss:$40 sps:$4 sm:$0xff]  }
 0x18a   :  { %4854 = vmatprep.subr.bf16.mxu1 %v6911_v9  ;;  %v8850_v50 = vld [vmem:[%s9914_s0 + $0x4] ss:$40 sps:$4 sm:$0xff]  }
 0x18c   :  { %4812 = vmatpush1.bf16.msra.mxu0 %v6906_v10  ;;  %v6980_v10 = vld [vmem:[%s9913_s1 + $0x1334] ss:$36 sps:$4 sm:$0xff]  }
 0x18d   :  { %4855 = vmatpush1.bf16.msra.mxu1 %v6909_v12  ;;  %4813 = vmatprep.subr.bf16.mxu0 %v6914_v13  ;;  %v6983_v12 = vld [vmem:[%s9913_s1 + $0x13c] ss:$36 sps:$4 sm:$0xff]  }
 0x18e   :  { %4856 = vmatprep.subr.bf16.mxu1 %v6917_v14  ;;  %v4536_v14 = vpop.f32.mrf.mxu1 }
 0x190   :  { %4814 = vmatpush2.bf16.msra.mxu0 %v6912_v15 }
 0x191   :  { %4857 = vmatpush2.bf16.msra.mxu1 %v6915_v16  ;;  %4815 = vmatprep.subr.bf16.mxu0 %v6920_v18  ;;  %v6978_v18 = vld [vmem:[%s9913_s1 + $0x1330] ss:$36 sps:$4 sm:$0xff]  }
 0x192   :  { %4858 = vmatprep.subr.bf16.mxu1 %v6923_v19  ;;  %v6981_v19 = vld [vmem:[%s9913_s1 + $0x138] ss:$36 sps:$4 sm:$0xff]  }
 0x194   :  { %4816 = vmatpush2.bf16.msra.mxu0 %v6918_v20  ;;  %v6986_v20 = vld [vmem:[%s9913_s1 + $0x12ec] ss:$36 sps:$4 sm:$0xff]  }
 0x195   :  { %4859 = vmatpush2.bf16.msra.mxu1 %v6921_v21  ;;  %4817 = vmatprep.subr.bf16.mxu0 %v6926_v22  ;;  %v6989_v21 = vld [vmem:[%s9913_s1 + $0xf4] ss:$36 sps:$4 sm:$0xff]   ;;  %v6984_v22 = vld [vmem:[%s9913_s1 + $0x12e8] ss:$36 sps:$4 sm:$0xff]  }
 0x196   :  { %4860 = vmatprep.subr.bf16.mxu1 %v6929_v23  ;;  %v6987_v23 = vld [vmem:[%s9913_s1 + $0xf0] ss:$36 sps:$4 sm:$0xff]  }
 0x198   :  { %4818 = vmatpush2.bf16.msra.mxu0 %v6924_v24  ;;  %v6992_v24 = vld [vmem:[%s9913_s1 + $0x12a4] ss:$36 sps:$4 sm:$0xff]  }
 0x199   :  { %4861 = vmatpush2.bf16.msra.mxu1 %v6927_v48  ;;  %4819 = vmatprep.subr.bf16.mxu0 %v6932_v4  ;;  %v6995_v48 = vld [vmem:[%s9913_s1 + $0xac] ss:$36 sps:$4 sm:$0xff]   ;;  %v6990_v4 = vld [vmem:[%s9913_s1 + $0x12a0] ss:$36 sps:$4 sm:$0xff]  }
 0x19a   :  { %4862 = vmatprep.subr.bf16.mxu1 %v6935_v60  ;;  %v6993_v60 = vld [vmem:[%s9913_s1 + $0xa8] ss:$36 sps:$4 sm:$0xff]  }
 0x19c   :  { %4820 = vmatpush2.bf16.msra.mxu0 %v6930_v25  ;;  %v6998_v25 = vld [vmem:[%s9913_s1 + $0x125c] ss:$36 sps:$4 sm:$0xff]  }
 0x19d   :  { %4863 = vmatpush2.bf16.msra.mxu1 %v6933_v26  ;;  %4821 = vmatprep.subr.bf16.mxu0 %v6938_v27  ;;  %v7001_v26 = vld [vmem:[%s9913_s1 + $0x64] ss:$36 sps:$4 sm:$0xff]   ;;  %v6996_v27 = vld [vmem:[%s9913_s1 + $0x1258] ss:$36 sps:$4 sm:$0xff]  }
 0x19e   :  { %4864 = vmatprep.subr.bf16.mxu1 %v6941_v34  ;;  %v6999_v34 = vld [vmem:[%s9913_s1 + $0x60] ss:$36 sps:$4 sm:$0xff]  }
 0x1a0   :  { %4822 = vmatpush2.bf16.msra.mxu0 %v6936_v28  ;;  %v7004_v28 = vld [vmem:[%s9913_s1 + $0x1214] ss:$36 sps:$4 sm:$0xff]  }
 0x1a1   :  { %4865 = vmatpush2.bf16.msra.mxu1 %v6939_v30  ;;  %4823 = vmatprep.subr.bf16.mxu0 %v6944_v31  ;;  %v7007_v30 = vld [vmem:[%s9913_s1 + $0x1c] ss:$36 sps:$4 sm:$0xff]   ;;  %v7002_v31 = vld [vmem:[%s9913_s1 + $0x1210] ss:$36 sps:$4 sm:$0xff]  }
 0x1a2   :  { %4866 = vmatprep.subr.bf16.mxu1 %v6947_v32  ;;  %v7005_v32 = vld [vmem:[%s9913_s1 + $0x18] ss:$36 sps:$4 sm:$0xff]  }
 0x1a4   :  { %4824 = vmatpush2.bf16.msra.mxu0 %v6942_v11  ;;  %v7010_v11 = vld [vmem:[%s9913_s1 + $0x14e4] ss:$36 sps:$4 sm:$0xff]  }
 0x1a5   :  { %4867 = vmatpush2.bf16.msra.mxu1 %v6945_v35  ;;  %4825 = vmatprep.subr.bf16.mxu0 %v6950_v36  ;;  %v7013_v35 = vld [vmem:[%s9913_s1 + $0x454] ss:$36 sps:$4 sm:$0xff]   ;;  %v7008_v36 = vld [vmem:[%s9913_s1 + $0x14e0] ss:$36 sps:$4 sm:$0xff]  }
 0x1a6   :  { %4868 = vmatprep.subr.bf16.mxu1 %v6953_v37  ;;  %v7011_v37 = vld [vmem:[%s9913_s1 + $0x450] ss:$36 sps:$4 sm:$0xff]  }
 0x1a8   :  { %4826 = vmatpush2.bf16.msra.mxu0 %v6948_v38  ;;  %v7016_v38 = vld [vmem:[%s9913_s1 + $0x149c] ss:$36 sps:$4 sm:$0xff]  }
 0x1a9   :  { %4869 = vmatpush2.bf16.msra.mxu1 %v6951_v40  ;;  %4827 = vmatprep.subr.bf16.mxu0 %v6956_v41  ;;  %v7019_v40 = vld [vmem:[%s9913_s1 + $0x40c] ss:$36 sps:$4 sm:$0xff]   ;;  %v7014_v41 = vld [vmem:[%s9913_s1 + $0x1498] ss:$36 sps:$4 sm:$0xff]  }
 0x1aa   :  { %4870 = vmatprep.subr.bf16.mxu1 %v6959_v42  ;;  %v7017_v42 = vld [vmem:[%s9913_s1 + $0x408] ss:$36 sps:$4 sm:$0xff]  }
 0x1ac   :  { %4828 = vmatpush2.bf16.msra.mxu0 %v6954_v45  ;;  %v7022_v45 = vld [vmem:[%s9913_s1 + $0x1454] ss:$36 sps:$4 sm:$0xff]  }
 0x1ad   :  { %4871 = vmatpush2.bf16.msra.mxu1 %v6957_v46  ;;  %4883 = vmatprep.subr.bf16.mxu0 %v6962_v51  ;;  %v7025_v46 = vld [vmem:[%s9913_s1 + $0x3c4] ss:$36 sps:$4 sm:$0xff]  }
 0x1ae   :  { %4926 = vmatprep.subr.bf16.mxu1 %v6965_v52  ;;  %v7023_v51 = vld [vmem:[%s9913_s1 + $0x3c0] ss:$36 sps:$4 sm:$0xff]  }
 0x1af   :  { %v4573_v33 = vpop.f32.mrf.mxu0  ;;  %4830 = vmatmul.mubr.bf16.vlgmr.msra.gmra.mxu0 %v8815_v63  ;;  %v7028_v52 = vld [vmem:[%s9913_s1 + $0x37c] ss:$36 sps:$4 sm:$0xff]  }
 0x1b0   :  { %4873 = vmatmul.mubr.bf16.vlgmr.msra.gmra.mxu1 %v8821_v0  ;;  %v8830_v3 = vadd.f32 %v4573_v33, %v4530_v47  ;;  %4884 = vmatpush1.bf16.msra.mxu0 %v6960_v54  ;;  %v7020_v47 = vld [vmem:[%s9913_s1 + $0x1450] ss:$36 sps:$4 sm:$0xff]   ;;  %v7035_v33 = vld [vmem:[%s9913_s1 + $0x648] ss:$36 sps:$4 sm:$0xff]  }
 0x1b1   :  { %4927 = vmatpush1.bf16.msra.mxu1 %v6963_v55  ;;  %v4575_v5 = vpop.f32.mrf.mxu0  ;;  %4885 = vmatprep.subr.bf16.mxu0 %v6968_v29  ;;  %v7031_v54 = vld [vmem:[%s9913_s1 + $0x694] ss:$36 sps:$4 sm:$0xff]  }
 0x1b2   :  { %4928 = vmatprep.subr.bf16.mxu1 %v6971_v56  ;;  %v8832_v6 = vadd.f32 %v4575_v5, %v4532_v58  ;;  %6209 = vmatprep.mubr.msk.bf16.mxu0 %vm4277_vm0, %v8843_v8  ;;  %v7026_v55 = vld [vmem:[%s9913_s1 + $0x378] ss:$36 sps:$4 sm:$0xff]   ;;  %v7029_v29 = vld [vmem:[%s9913_s1 + $0x690] ss:$36 sps:$4 sm:$0xff]   ;;  %v7038_v5 = vld [vmem:[%s9913_s1 + $0x2e8] ss:$36 sps:$4 sm:$0xff]  }
 0x1b3   :  { %4958 = vmatprep.mubr.bf16.mxu1 %v8850_v50  ;;  %v4577_v9 = vpop.f32.mrf.mxu0  ;;  %v7034_v56 = vld [vmem:[%s9913_s1 + $0x334] ss:$36 sps:$4 sm:$0xff]   ;;  %v7037_v58 = vld [vmem:[%s9913_s1 + $0x64c] ss:$36 sps:$4 sm:$0xff]  }
 0x1b4   :  { %v8859_v13 = vadd.f32 %v4577_v9, %v4534_v39  ;;  %4886 = vmatpush1.bf16.msra.mxu0 %v6966_v61  ;;  %v8974_v61 = vld [vmem:[%s9914_s0 + $0x20] ss:$40 sps:$4 sm:$0xff]   ;;  %v8992_v39 = vld [vmem:[%s9914_s0 + $0xc] ss:$40 sps:$4 sm:$0xff]  }
 0x1b5   :  { %4929 = vmatpush1.bf16.msra.mxu1 %v6969_v62  ;;  %v4579_v15 = vpop.f32.mrf.mxu0  ;;  %4887 = vmatprep.subr.bf16.mxu0 %v6974_v1  ;;  %v7032_v62 = vld [vmem:[%s9913_s1 + $0x330] ss:$36 sps:$4 sm:$0xff]   ;;  %v7049_v9 = vld [vmem:[%s9913_s1 + $0x5bc] ss:$36 sps:$4 sm:$0xff]  }
 0x1b6   :  { %4930 = vmatprep.subr.bf16.mxu1 %v6977_v2  ;;  %v8861_v16 = vadd.f32 %v4579_v15, %v4536_v14  ;;  %v7040_v1 = vld [vmem:[%s9913_s1 + $0x2ec] ss:$36 sps:$4 sm:$0xff]   ;;  %v7043_v2 = vld [vmem:[%s9913_s1 + $0x604] ss:$36 sps:$4 sm:$0xff]   ;;  %v7052_v14 = vld [vmem:[%s9913_s1 + $0x25c] ss:$36 sps:$4 sm:$0xff]  }
 0x1b7   :  { %v7055_v15 = vld [vmem:[%s9913_s1 + $0x574] ss:$36 sps:$4 sm:$0xff]  }
 0x1b8   :  { %4888 = vmatpush1.bf16.msra.mxu0 %v6972_v43  ;;  %v7041_v43 = vld [vmem:[%s9913_s1 + $0x600] ss:$36 sps:$4 sm:$0xff]  }
 0x1b9   :  { %4931 = vmatpush1.bf16.msra.mxu1 %v6975_v7  ;;  %4889 = vmatprep.subr.bf16.mxu0 %v6980_v10  ;;  %v7046_v7 = vld [vmem:[%s9913_s1 + $0x2a4] ss:$36 sps:$4 sm:$0xff]  }
 0x1ba   :  { %4932 = vmatprep.subr.bf16.mxu1 %v6983_v12  ;;  %v7044_v10 = vld [vmem:[%s9913_s1 + $0x2a0] ss:$36 sps:$4 sm:$0xff]   ;;  %v7047_v12 = vld [vmem:[%s9913_s1 + $0x5b8] ss:$36 sps:$4 sm:$0xff]  }
 0x1bc   :  { %4890 = vmatpush1.bf16.msra.mxu0 %v6978_v18 }
 0x1bd   :  { %4933 = vmatpush1.bf16.msra.mxu1 %v6981_v19  ;;  %4891 = vmatprep.subr.bf16.mxu0 %v6986_v20  ;;  %v7050_v19 = vld [vmem:[%s9913_s1 + $0x258] ss:$36 sps:$4 sm:$0xff]   ;;  %v7053_v20 = vld [vmem:[%s9913_s1 + $0x570] ss:$36 sps:$4 sm:$0xff]  }
 0x1be   :  { %4934 = vmatprep.subr.bf16.mxu1 %v6989_v21  ;;  %v7058_v21 = vld [vmem:[%s9913_s1 + $0x52c] ss:$36 sps:$4 sm:$0xff]  }
 0x1c0   :  { %4892 = vmatpush1.bf16.msra.mxu0 %v6984_v22  ;;  %v7061_v22 = vld [vmem:[%s9913_s1 + $0xb14] ss:$36 sps:$4 sm:$0xff]  }
 0x1c1   :  { %4935 = vmatpush1.bf16.msra.mxu1 %v6987_v23  ;;  %4893 = vmatprep.subr.bf16.mxu0 %v6992_v24  ;;  %v7056_v24 = vld [vmem:[%s9913_s1 + $0x528] ss:$36 sps:$4 sm:$0xff]  }
 0x1c2   :  { %4936 = vmatprep.subr.bf16.mxu1 %v6995_v48  ;;  %v7059_v48 = vld [vmem:[%s9913_s1 + $0xb10] ss:$36 sps:$4 sm:$0xff]  }
 0x1c4   :  { %4894 = vmatpush1.bf16.msra.mxu0 %v6990_v4  ;;  %v4616_v18 = vpop.f32.mrf.mxu1  ;;  %v7064_v4 = vld [vmem:[%s9913_s1 + $0x4e4] ss:$36 sps:$4 sm:$0xff]  }
 0x1c5   :  { %4937 = vmatpush1.bf16.msra.mxu1 %v6993_v60  ;;  %4895 = vmatprep.subr.bf16.mxu0 %v6998_v25  ;;  %v7067_v60 = vld [vmem:[%s9913_s1 + $0xacc] ss:$36 sps:$4 sm:$0xff]   ;;  %v4617_v25 = vadd.f32 %v4616_v18, %v8830_v3  ;;  %v7112_v18 = vld [vmem:[%s9913_s1 + $0x724] ss:$36 sps:$4 sm:$0xff]  }
 0x1c6   :  { %4938 = vmatprep.subr.bf16.mxu1 %v7001_v26  ;;  %v4618_v23 = vpop.f32.mrf.mxu1  ;;  %v7065_v3 = vld [vmem:[%s9913_s1 + $0xac8] ss:$36 sps:$4 sm:$0xff]  }
 0x1c8   :  { %4896 = vmatpush1.bf16.msra.mxu0 %v6996_v27  ;;  %v4620_v26 = vpop.f32.mrf.mxu1 }
 0x1c9   :  { %4939 = vmatpush1.bf16.msra.mxu1 %v6999_v34  ;;  %4897 = vmatprep.subr.bf16.mxu0 %v7004_v28  ;;  %v4619_v34 = vadd.f32 %v4618_v23, %v8832_v6  ;;  %v4621_v6 = vadd.f32 %v4620_v26, %v8859_v13  ;;  %v7118_v23 = vld [vmem:[%s9913_s1 + $0x6dc] ss:$36 sps:$4 sm:$0xff]   ;;  %v7125_v26 = vld [vmem:[%s9913_s1 + $0xf90] ss:$36 sps:$4 sm:$0xff]  }
 0x1ca   :  { %4940 = vmatprep.subr.bf16.mxu1 %v7007_v30  ;;  %v7062_v30 = vld [vmem:[%s9913_s1 + $0x4e0] ss:$36 sps:$4 sm:$0xff]  }
 0x1cc   :  { %4898 = vmatpush1.bf16.msra.mxu0 %v7002_v31 }
 0x1cd   :  { %4941 = vmatpush1.bf16.msra.mxu1 %v7005_v32  ;;  %4909 = vmatprep.subr.bf16.mxu0 %v7010_v11  ;;  %v4622_v32 = vpop.f32.mrf.mxu1 }
 0x1ce   :  { %4942 = vmatprep.subr.bf16.mxu1 %v7013_v35  ;;  %v7073_v35 = vld [vmem:[%s9913_s1 + $0xa84] ss:$36 sps:$4 sm:$0xff]  }
 0x1d0   :  { %4910 = vmatpush2.bf16.msra.mxu0 %v7008_v36 }
 0x1d1   :  { %4943 = vmatpush2.bf16.msra.mxu1 %v7011_v37  ;;  %4911 = vmatprep.subr.bf16.mxu0 %v7016_v38  ;;  %v7068_v38 = vld [vmem:[%s9913_s1 + $0x498] ss:$36 sps:$4 sm:$0xff]  }
 0x1d2   :  { %4944 = vmatprep.subr.bf16.mxu1 %v7019_v40  ;;  %v4623_v40 = vadd.f32 %v4622_v32, %v8861_v16  ;;  %v7074_v16 = vld [vmem:[%s9913_s1 + $0x8d0] ss:$36 sps:$4 sm:$0xff]   ;;  %v7139_v32 = vld [vmem:[%s9913_s1 + $0xf04] ss:$36 sps:$4 sm:$0xff]  }
 0x1d4   :  { %4912 = vmatpush2.bf16.msra.mxu0 %v7014_v41  ;;  %v7071_v41 = vld [vmem:[%s9913_s1 + $0xa80] ss:$36 sps:$4 sm:$0xff]  }
 0x1d5   :  { %4945 = vmatpush2.bf16.msra.mxu1 %v7017_v42  ;;  %4913 = vmatprep.subr.bf16.mxu0 %v7022_v45  ;;  %v7079_v42 = vld [vmem:[%s9913_s1 + $0xa3c] ss:$36 sps:$4 sm:$0xff]  }
 0x1d6   :  { %4946 = vmatprep.subr.bf16.mxu1 %v7025_v46  ;;  %v7077_v46 = vld [vmem:[%s9913_s1 + $0xa38] ss:$36 sps:$4 sm:$0xff]  }
 0x1d8   :  { %4914 = vmatpush2.bf16.msra.mxu0 %v7020_v47  ;;  %v7082_v47 = vld [vmem:[%s9913_s1 + $0x88c] ss:$36 sps:$4 sm:$0xff]  }
 0x1d9   :  { %4947 = vmatpush2.bf16.msra.mxu1 %v7023_v51  ;;  %4969 = vmatprep.subr.bf16.mxu0 %v7031_v54  ;;  %v7085_v51 = vld [vmem:[%s9913_s1 + $0x9f4] ss:$36 sps:$4 sm:$0xff]  }
 0x1da   :  { %4948 = vmatprep.subr.bf16.mxu1 %v7028_v52  ;;  %v7080_v52 = vld [vmem:[%s9913_s1 + $0x888] ss:$36 sps:$4 sm:$0xff]   ;;  %v7083_v54 = vld [vmem:[%s9913_s1 + $0x9f0] ss:$36 sps:$4 sm:$0xff]  }
 0x1db   :  { %4916 = vmatmul.mubr.bf16.vlgmr.msra.gmra.mxu0 %v8974_v61 }
 0x1dc   :  { %4970 = vmatpush1.bf16.msra.mxu0 %v7029_v29  ;;  %5001 = vmatprep.mubr.bf16.mxu0 %v8992_v39  ;;  %v7091_v29 = vld [vmem:[%s9913_s1 + $0x9ac] ss:$36 sps:$4 sm:$0xff]  }
 0x1dd   :  { %4949 = vmatpush2.bf16.msra.mxu1 %v7026_v55  ;;  %4971 = vmatprep.subr.bf16.mxu0 %v7037_v58  ;;  %v7088_v55 = vld [vmem:[%s9913_s1 + $0x844] ss:$36 sps:$4 sm:$0xff]  }
 0x1de   :  { %4950 = vmatprep.subr.bf16.mxu1 %v7034_v56  ;;  %v7086_v56 = vld [vmem:[%s9913_s1 + $0x840] ss:$36 sps:$4 sm:$0xff]   ;;  %v7089_v58 = vld [vmem:[%s9913_s1 + $0x9a8] ss:$36 sps:$4 sm:$0xff]  }
 0x1e0   :  { %4972 = vmatpush1.bf16.msra.mxu0 %v7035_v33  ;;  %v7097_v33 = vld [vmem:[%s9913_s1 + $0x964] ss:$36 sps:$4 sm:$0xff]  }
 0x1e1   :  { %4951 = vmatpush2.bf16.msra.mxu1 %v7032_v62  ;;  %4973 = vmatprep.subr.bf16.mxu0 %v7043_v2  ;;  %v7094_v62 = vld [vmem:[%s9913_s1 + $0x7fc] ss:$36 sps:$4 sm:$0xff]  }
 0x1e2   :  { %4952 = vmatprep.subr.bf16.mxu1 %v7040_v1  ;;  %v7092_v1 = vld [vmem:[%s9913_s1 + $0x7f8] ss:$36 sps:$4 sm:$0xff]   ;;  %v7095_v2 = vld [vmem:[%s9913_s1 + $0x960] ss:$36 sps:$4 sm:$0xff]  }
 0x1e4   :  { %4974 = vmatpush1.bf16.msra.mxu0 %v7041_v43  ;;  %v7103_v43 = vld [vmem:[%s9913_s1 + $0x91c] ss:$36 sps:$4 sm:$0xff]  }
 0x1e5   :  { %4953 = vmatpush2.bf16.msra.mxu1 %v7038_v5  ;;  %4975 = vmatprep.subr.bf16.mxu0 %v7049_v9  ;;  %v7100_v5 = vld [vmem:[%s9913_s1 + $0x7b4] ss:$36 sps:$4 sm:$0xff]  }
 0x1e6   :  { %4954 = vmatprep.subr.bf16.mxu1 %v7046_v7  ;;  %v7098_v7 = vld [vmem:[%s9913_s1 + $0x7b0] ss:$36 sps:$4 sm:$0xff]   ;;  %v7101_v9 = vld [vmem:[%s9913_s1 + $0x918] ss:$36 sps:$4 sm:$0xff]  }
 0x1e8   :  { %4976 = vmatpush1.bf16.msra.mxu0 %v7047_v12  ;;  %v7109_v12 = vld [vmem:[%s9913_s1 + $0xd54] ss:$36 sps:$4 sm:$0xff]  }
 0x1e9   :  { %4955 = vmatpush2.bf16.msra.mxu1 %v7044_v10  ;;  %4977 = vmatprep.subr.bf16.mxu0 %v7055_v15  ;;  %v7106_v10 = vld [vmem:[%s9913_s1 + $0x76c] ss:$36 sps:$4 sm:$0xff]  }
 0x1ea   :  { %4956 = vmatprep.subr.bf16.mxu1 %v7052_v14  ;;  %v7104_v14 = vld [vmem:[%s9913_s1 + $0x768] ss:$36 sps:$4 sm:$0xff]   ;;  %v7107_v15 = vld [vmem:[%s9913_s1 + $0xd50] ss:$36 sps:$4 sm:$0xff]  }
 0x1ec   :  { %4978 = vmatpush1.bf16.msra.mxu0 %v7053_v20  ;;  %v7353_v20 = vmov 0  }
 0x1ed   :  { %4957 = vmatpush2.bf16.msra.mxu1 %v7050_v19  ;;  %4979 = vmatprep.subr.bf16.mxu0 %v7058_v21  ;;  %v7115_v19 = vld [vmem:[%s9913_s1 + $0xd0c] ss:$36 sps:$4 sm:$0xff]   ;;  %v7110_v21 = vld [vmem:[%s9913_s1 + $0x720] ss:$36 sps:$4 sm:$0xff]  }
 0x1ee   :  { %5012 = vmatprep.subr.bf16.mxu1 %v7061_v22  ;;  %6301 = vset.pattern.permute.xlu0 %v7353_v20  ;;  %v7113_v22 = vld [vmem:[%s9913_s1 + $0xd08] ss:$36 sps:$4 sm:$0xff]  }
 0x1ef   :  { %v4659_v27 = vpop.f32.mrf.mxu0  ;;  %6302 = vset.pattern.permute.xlu1 %v7353_v20 }
 0x1f0   :  { %4959 = vmatmul.mubr.bf16.vlgmr.msra.gmra.mxu1 %v8593_v17  ;;  %v9046_v28 = vadd.f32 %v4659_v27, %v4617_v25  ;;  %4980 = vmatpush1.bf16.msra.mxu0 %v7056_v24  ;;  %v7070_v17 = vld [vmem:[%s9913_s1 + $0x49c] ss:$36 sps:$4 sm:$0xff]   ;;  %v7121_v24 = vld [vmem:[%s9913_s1 + $0xcc4] ss:$36 sps:$4 sm:$0xff]  }
 0x1f1   :  { %5013 = vmatpush1.bf16.msra.mxu1 %v7059_v48  ;;  %v4661_v31 = vpop.f32.mrf.mxu0  ;;  %4981 = vmatprep.subr.bf16.mxu0 %v7064_v4  ;;  %v7116_v48 = vld [vmem:[%s9913_s1 + $0x6d8] ss:$36 sps:$4 sm:$0xff]   ;;  %v7119_v4 = vld [vmem:[%s9913_s1 + $0xcc0] ss:$36 sps:$4 sm:$0xff]  }
 0x1f2   :  { %5014 = vmatprep.subr.bf16.mxu1 %v7067_v60  ;;  %v9058_v11 = vadd.f32 %v4661_v31, %v4619_v34  ;;  %5044 = vmatprep.mubr.bf16.mxu1 %v8620_v53  ;;  %v7076_v53 = vld [vmem:[%s9913_s1 + $0x8d4] ss:$36 sps:$4 sm:$0xff]   ;;  %v7124_v25 = vld [vmem:[%s9913_s1 + $0xc7c] ss:$36 sps:$4 sm:$0xff]   ;;  %v7133_v34 = vld [vmem:[%s9913_s1 + $0xf4c] ss:$36 sps:$4 sm:$0xff]  }
 0x1f3   :  { %v4663_v36 = vpop.f32.mrf.mxu0  ;;  %v7127_v60 = vld [vmem:[%s9913_s1 + $0xf94] ss:$36 sps:$4 sm:$0xff]   ;;  %v9194_v31 = vld [vmem:[%s9914_s0 + $0x8] ss:$40 sps:$4 sm:$0xff]  }
 0x1f4   :  { %v9064_v37 = vadd.f32 %v4663_v36, %v4621_v6  ;;  %4982 = vmatpush1.bf16.msra.mxu0 %v7062_v30  ;;  %v7122_v27 = vld [vmem:[%s9913_s1 + $0xc78] ss:$36 sps:$4 sm:$0xff]   ;;  %v7128_v6 = vld [vmem:[%s9913_s1 + $0xc30] ss:$36 sps:$4 sm:$0xff]   ;;  %v7137_v36 = vld [vmem:[%s9913_s1 + $0xf00] ss:$36 sps:$4 sm:$0xff]  }
 0x1f5   :  { %5015 = vmatpush1.bf16.msra.mxu1 %v7065_v3  ;;  %v4665_v13 = vpop.f32.mrf.mxu0  ;;  %4983 = vmatprep.subr.bf16.mxu0 %v7070_v17  ;;  %v7130_v30 = vld [vmem:[%s9913_s1 + $0xc34] ss:$36 sps:$4 sm:$0xff]   ;;  %v7131_v3 = vld [vmem:[%s9913_s1 + $0xf48] ss:$36 sps:$4 sm:$0xff]   ;;  %v9203_v17 = vld [vmem:[%s9914_s0 + $0x1c] ss:$40 sps:$4 sm:$0xff]  }
 0x1f6   :  { %5016 = vmatprep.subr.bf16.mxu1 %v7073_v35  ;;  %v9079_v45 = vadd.f32 %v4665_v13, %v4623_v40  ;;  %v7136_v35 = vld [vmem:[%s9913_s1 + $0xbec] ss:$36 sps:$4 sm:$0xff]   ;;  %v7145_v40 = vld [vmem:[%s9913_s1 + $0xebc] ss:$36 sps:$4 sm:$0xff]   ;;  %v7142_v13 = vld [vmem:[%s9913_s1 + $0xba4] ss:$36 sps:$4 sm:$0xff]  }
 0x1f8   :  { %4984 = vmatpush1.bf16.msra.mxu0 %v7068_v38  ;;  %v7134_v38 = vld [vmem:[%s9913_s1 + $0xbe8] ss:$36 sps:$4 sm:$0xff]  }
 0x1f9   :  { %5017 = vmatpush1.bf16.msra.mxu1 %v7071_v41  ;;  %4985 = vmatprep.subr.bf16.mxu0 %v7076_v53  ;;  %v7143_v41 = vld [vmem:[%s9913_s1 + $0xeb8] ss:$36 sps:$4 sm:$0xff]   ;;  %v7140_v53 = vld [vmem:[%s9913_s1 + $0xba0] ss:$36 sps:$4 sm:$0xff]  }
 0x1fa   :  { %5018 = vmatprep.subr.bf16.mxu1 %v7079_v42  ;;  %v7151_v42 = vld [vmem:[%s9913_s1 + $0xe74] ss:$36 sps:$4 sm:$0xff]  }
 0x1fc   :  { %4986 = vmatpush2.bf16.msra.mxu0 %v7074_v16  ;;  %v7148_v16 = vld [vmem:[%s9913_s1 + $0xb5c] ss:$36 sps:$4 sm:$0xff]  }
 0x1fd   :  { %5019 = vmatpush1.bf16.msra.mxu1 %v7077_v46  ;;  %4987 = vmatprep.subr.bf16.mxu0 %v7082_v47  ;;  %v7149_v46 = vld [vmem:[%s9913_s1 + $0xe70] ss:$36 sps:$4 sm:$0xff]   ;;  %v7146_v47 = vld [vmem:[%s9913_s1 + $0xb58] ss:$36 sps:$4 sm:$0xff]  }
 0x1fe   :  { %5020 = vmatprep.subr.bf16.mxu1 %v7085_v51  ;;  %v7154_v51 = vld [vmem:[%s9913_s1 + $0xe2c] ss:$36 sps:$4 sm:$0xff]  }
 0x200   :  { %4988 = vmatpush2.bf16.msra.mxu0 %v7080_v52  ;;  %v7157_v52 = vld [vmem:[%s9913_s1 + $0x1414] ss:$36 sps:$4 sm:$0xff]  }
 0x201   :  { %5021 = vmatpush1.bf16.msra.mxu1 %v7083_v54  ;;  %4989 = vmatprep.subr.bf16.mxu0 %v7088_v55  ;;  %v7152_v54 = vld [vmem:[%s9913_s1 + $0xe28] ss:$36 sps:$4 sm:$0xff]   ;;  %v7155_v55 = vld [vmem:[%s9913_s1 + $0x1410] ss:$36 sps:$4 sm:$0xff]  }
 0x202   :  { %5022 = vmatprep.subr.bf16.mxu1 %v7091_v29  ;;  %v7160_v29 = vld [vmem:[%s9913_s1 + $0xde4] ss:$36 sps:$4 sm:$0xff]  }
 0x204   :  { %4990 = vmatpush2.bf16.msra.mxu0 %v7086_v56  ;;  %v7163_v56 = vld [vmem:[%s9913_s1 + $0x13cc] ss:$36 sps:$4 sm:$0xff]  }
 0x205   :  { %5023 = vmatpush1.bf16.msra.mxu1 %v7089_v58  ;;  %4991 = vmatprep.subr.bf16.mxu0 %v7094_v62  ;;  %v7158_v58 = vld [vmem:[%s9913_s1 + $0xde0] ss:$36 sps:$4 sm:$0xff]   ;;  %v7161_v62 = vld [vmem:[%s9913_s1 + $0x13c8] ss:$36 sps:$4 sm:$0xff]  }
 0x206   :  { %5024 = vmatprep.subr.bf16.mxu1 %v7097_v33  ;;  %v7166_v33 = vld [vmem:[%s9913_s1 + $0xd9c] ss:$36 sps:$4 sm:$0xff]  }
 0x208   :  { %4992 = vmatpush2.bf16.msra.mxu0 %v7092_v1  ;;  %v7169_v1 = vld [vmem:[%s9913_s1 + $0x1384] ss:$36 sps:$4 sm:$0xff]  }
 0x209   :  { %5025 = vmatpush1.bf16.msra.mxu1 %v7095_v2  ;;  %4993 = vmatprep.subr.bf16.mxu0 %v7100_v5  ;;  %v7164_v2 = vld [vmem:[%s9913_s1 + $0xd98] ss:$36 sps:$4 sm:$0xff]   ;;  %v7167_v5 = vld [vmem:[%s9913_s1 + $0x1380] ss:$36 sps:$4 sm:$0xff]  }
 0x20a   :  { %5026 = vmatprep.subr.bf16.mxu1 %v7103_v43  ;;  %v7172_v43 = vld [vmem:[%s9913_s1 + $0x11d4] ss:$36 sps:$4 sm:$0xff]  }
 0x20c   :  { %4994 = vmatpush2.bf16.msra.mxu0 %v7098_v7  ;;  %v7175_v7 = vld [vmem:[%s9913_s1 + $0x133c] ss:$36 sps:$4 sm:$0xff]  }
 0x20d   :  { %5027 = vmatpush1.bf16.msra.mxu1 %v7101_v9  ;;  %4995 = vmatprep.subr.bf16.mxu0 %v7106_v10  ;;  %v7170_v9 = vld [vmem:[%s9913_s1 + $0x11d0] ss:$36 sps:$4 sm:$0xff]   ;;  %v7173_v10 = vld [vmem:[%s9913_s1 + $0x1338] ss:$36 sps:$4 sm:$0xff]  }
 0x20e   :  { %5028 = vmatprep.subr.bf16.mxu1 %v7109_v12  ;;  %v7178_v12 = vld [vmem:[%s9913_s1 + $0x118c] ss:$36 sps:$4 sm:$0xff]  }
 0x210   :  { %4996 = vmatpush2.bf16.msra.mxu0 %v7104_v14  ;;  %v7181_v14 = vld [vmem:[%s9913_s1 + $0x12f4] ss:$36 sps:$4 sm:$0xff]  }
 0x211   :  { %5029 = vmatpush2.bf16.msra.mxu1 %v7107_v15  ;;  %4997 = vmatprep.subr.bf16.mxu0 %v7112_v18  ;;  %v7176_v15 = vld [vmem:[%s9913_s1 + $0x1188] ss:$36 sps:$4 sm:$0xff]   ;;  %v7179_v18 = vld [vmem:[%s9913_s1 + $0x12f0] ss:$36 sps:$4 sm:$0xff]  }
 0x212   :  { %5030 = vmatprep.subr.bf16.mxu1 %v7115_v19  ;;  %v7184_v19 = vld [vmem:[%s9913_s1 + $0x1144] ss:$36 sps:$4 sm:$0xff]  }
 0x214   :  { %4998 = vmatpush2.bf16.msra.mxu0 %v7110_v21  ;;  %v7187_v21 = vld [vmem:[%s9913_s1 + $0x12ac] ss:$36 sps:$4 sm:$0xff]  }
 0x215   :  { %5031 = vmatpush2.bf16.msra.mxu1 %v7113_v22  ;;  %4999 = vmatprep.subr.bf16.mxu0 %v7118_v23  ;;  %v7182_v22 = vld [vmem:[%s9913_s1 + $0x1140] ss:$36 sps:$4 sm:$0xff]   ;;  %v7185_v23 = vld [vmem:[%s9913_s1 + $0x12a8] ss:$36 sps:$4 sm:$0xff]  }
 0x216   :  { %5032 = vmatprep.subr.bf16.mxu1 %v7121_v24  ;;  %v7190_v24 = vld [vmem:[%s9913_s1 + $0x10fc] ss:$36 sps:$4 sm:$0xff]  }
 0x218   :  { %5000 = vmatpush2.bf16.msra.mxu0 %v7116_v48  ;;  %v7193_v48 = vld [vmem:[%s9913_s1 + $0x1264] ss:$36 sps:$4 sm:$0xff]  }
 0x219   :  { %5033 = vmatpush2.bf16.msra.mxu1 %v7119_v4  ;;  %5055 = vmatprep.subr.bf16.mxu0 %v7127_v60  ;;  %v7188_v4 = vld [vmem:[%s9913_s1 + $0x10f8] ss:$36 sps:$4 sm:$0xff]   ;;  %v7191_v60 = vld [vmem:[%s9913_s1 + $0x1260] ss:$36 sps:$4 sm:$0xff]  }
 0x21a   :  { %5034 = vmatprep.subr.bf16.mxu1 %v7124_v25  ;;  %v7196_v25 = vld [vmem:[%s9913_s1 + $0x10b4] ss:$36 sps:$4 sm:$0xff]  }
 0x21b   :  { %5002 = vmatmul.mubr.bf16.vlgmr.msra.gmra.mxu0 %v9194_v31 }
 0x21c   :  { %5056 = vmatpush1.bf16.msra.mxu0 %v7125_v26  ;;  %5087 = vmatprep.mubr.bf16.mxu0 %v9203_v17  ;;  %v7199_v26 = vld [vmem:[%s9913_s1 + $0x121c] ss:$36 sps:$4 sm:$0xff]  }
 0x21d   :  { %5035 = vmatpush2.bf16.msra.mxu1 %v7122_v27  ;;  %5057 = vmatprep.subr.bf16.mxu0 %v7133_v34  ;;  %v7194_v27 = vld [vmem:[%s9913_s1 + $0x10b0] ss:$36 sps:$4 sm:$0xff]   ;;  %v7197_v34 = vld [vmem:[%s9913_s1 + $0x1218] ss:$36 sps:$4 sm:$0xff]  }
 0x21e   :  { %5036 = vmatprep.subr.bf16.mxu1 %v7130_v30  ;;  %v7202_v30 = vld [vmem:[%s9913_s1 + $0x106c] ss:$36 sps:$4 sm:$0xff]  }
 0x220   :  { %5058 = vmatpush1.bf16.msra.mxu0 %v7131_v3  ;;  %v7205_v3 = vld [vmem:[%s9913_s1 + $0x14ec] ss:$36 sps:$4 sm:$0xff]  }
 0x221   :  { %5037 = vmatpush2.bf16.msra.mxu1 %v7128_v6  ;;  %5059 = vmatprep.subr.bf16.mxu0 %v7139_v32  ;;  %v7200_v6 = vld [vmem:[%s9913_s1 + $0x1068] ss:$36 sps:$4 sm:$0xff]  }
 0x222   :  { %5038 = vmatprep.subr.bf16.mxu1 %v7136_v35  ;;  %v7203_v32 = vld [vmem:[%s9913_s1 + $0x14e8] ss:$36 sps:$4 sm:$0xff]  }
 0x223   :  { %v7208_v35 = vld [vmem:[%s9913_s1 + $0x1024] ss:$36 sps:$4 sm:$0xff]  }
 0x224   :  { %5060 = vmatpush1.bf16.msra.mxu0 %v7137_v36  ;;  %v7211_v36 = vld [vmem:[%s9913_s1 + $0x14a4] ss:$36 sps:$4 sm:$0xff]  }
 0x225   :  { %5039 = vmatpush2.bf16.msra.mxu1 %v7134_v38  ;;  %5061 = vmatprep.subr.bf16.mxu0 %v7145_v40  ;;  %v7206_v38 = vld [vmem:[%s9913_s1 + $0x1020] ss:$36 sps:$4 sm:$0xff]  }
 0x226   :  { %5040 = vmatprep.subr.bf16.mxu1 %v7142_v13  ;;  %v7209_v40 = vld [vmem:[%s9913_s1 + $0x14a0] ss:$36 sps:$4 sm:$0xff]  }
 0x227   :  { %v7214_v13 = vld [vmem:[%s9913_s1 + $0xfdc] ss:$36 sps:$4 sm:$0xff]  }
 0x228   :  { %5062 = vmatpush1.bf16.msra.mxu0 %v7143_v41  ;;  %v7217_v41 = vld [vmem:[%s9913_s1 + $0x145c] ss:$36 sps:$4 sm:$0xff]  }
 0x229   :  { %5041 = vmatpush2.bf16.msra.mxu1 %v7140_v53  ;;  %5063 = vmatprep.subr.bf16.mxu0 %v7151_v42  ;;  %v7212_v53 = vld [vmem:[%s9913_s1 + $0xfd8] ss:$36 sps:$4 sm:$0xff]  }
 0x22a   :  { %5042 = vmatprep.subr.bf16.mxu1 %v7148_v16  ;;  %v7215_v42 = vld [vmem:[%s9913_s1 + $0x1458] ss:$36 sps:$4 sm:$0xff]  }
 0x22b   :  { %v7229_v16 = vld [vmem:[%s9913_s1 + $0xd58] ss:$36 sps:$4 sm:$0xff]  }
 0x22c   :  { %5064 = vmatpush1.bf16.msra.mxu0 %v7149_v46  ;;  %v7218_v46 = vld [vmem:[%s9913_s1 + $0x458] ss:$36 sps:$4 sm:$0xff]  }
 0x22d   :  { %5043 = vmatpush2.bf16.msra.mxu1 %v7146_v47  ;;  %5065 = vmatprep.subr.bf16.mxu0 %v7154_v51  ;;  %v7231_v47 = vld [vmem:[%s9913_s1 + $0xb18] ss:$36 sps:$4 sm:$0xff]  }
 0x22e   :  { %5098 = vmatprep.subr.bf16.mxu1 %v7157_v52  ;;  %v7219_v51 = vld [vmem:[%s9913_s1 + $0x218] ss:$36 sps:$4 sm:$0xff]   ;;  %v7233_v52 = vld [vmem:[%s9913_s1 + $0xd10] ss:$36 sps:$4 sm:$0xff]  }
 0x230   :  { %5045 = vmatmul.mubr.bf16.vlgmr.msra.gmra.mxu1 %v8815_v63  ;;  %5066 = vmatpush1.bf16.msra.mxu0 %v7152_v54  ;;  %v7220_v54 = vld [vmem:[%s9913_s1 + $0x410] ss:$36 sps:$4 sm:$0xff]  }
 0x231   :  { %5099 = vmatpush1.bf16.msra.mxu1 %v7155_v55  ;;  %5067 = vmatprep.subr.bf16.mxu0 %v7160_v29  ;;  %v7235_v55 = vld [vmem:[%s9913_s1 + $0xad0] ss:$36 sps:$4 sm:$0xff]  }
 0x232   :  { %5100 = vmatprep.subr.bf16.mxu1 %v7163_v56  ;;  %6210 = vmatprep.mubr.msk.bf16.mxu1 %vm4277_vm0, %v8843_v8  ;;  %v7221_v29 = vld [vmem:[%s9913_s1 + $0x1d0] ss:$36 sps:$4 sm:$0xff]   ;;  %v7237_v56 = vld [vmem:[%s9913_s1 + $0xcc8] ss:$36 sps:$4 sm:$0xff]  }
 0x234   :  { %5068 = vmatpush1.bf16.msra.mxu0 %v7158_v58  ;;  %v7350_v58 = vld [vmem:[%s9914_s0 + $0x14] ss:$40 sps:$4 sm:$0xff]  }
 0x235   :  { %5101 = vmatpush1.bf16.msra.mxu1 %v7161_v62  ;;  %5069 = vmatprep.subr.bf16.mxu0 %v7166_v33  ;;  %v7239_v62 = vld [vmem:[%s9913_s1 + $0xa88] ss:$36 sps:$4 sm:$0xff]  }
 0x236   :  { %5102 = vmatprep.subr.bf16.mxu1 %v7169_v1  ;;  %v7223_v33 = vld [vmem:[%s9913_s1 + $0x188] ss:$36 sps:$4 sm:$0xff]   ;;  %v7224_v1 = vld [vmem:[%s9913_s1 + $0x380] ss:$36 sps:$4 sm:$0xff]  }
 0x238   :  { %5070 = vmatpush1.bf16.msra.mxu0 %v7164_v2  ;;  %v7243_v2 = vld [vmem:[%s9913_s1 + $0xa40] ss:$36 sps:$4 sm:$0xff]  }
 0x239   :  { %5103 = vmatpush1.bf16.msra.mxu1 %v7167_v5  ;;  %5071 = vmatprep.subr.bf16.mxu0 %v7172_v43  ;;  %v7225_v5 = vld [vmem:[%s9913_s1 + $0x140] ss:$36 sps:$4 sm:$0xff]   ;;  %v7245_v43 = vld [vmem:[%s9913_s1 + $0xc38] ss:$36 sps:$4 sm:$0xff]  }
 0x23a   :  { %5104 = vmatprep.subr.bf16.mxu1 %v7175_v7  ;;  %v7226_v7 = vld [vmem:[%s9913_s1 + $0x338] ss:$36 sps:$4 sm:$0xff]  }
 0x23c   :  { %5072 = vmatpush2.bf16.msra.mxu0 %v7170_v9  ;;  %v7247_v9 = vld [vmem:[%s9913_s1 + $0x9f8] ss:$36 sps:$4 sm:$0xff]  }
 0x23d   :  { %5105 = vmatpush1.bf16.msra.mxu1 %v7173_v10  ;;  %5073 = vmatprep.subr.bf16.mxu0 %v7178_v12  ;;  %v7227_v10 = vld [vmem:[%s9913_s1 + $0xf8] ss:$36 sps:$4 sm:$0xff]   ;;  %v7249_v12 = vld [vmem:[%s9913_s1 + $0xbf0] ss:$36 sps:$4 sm:$0xff]  }
 0x23e   :  { %5106 = vmatprep.subr.bf16.mxu1 %v7181_v14  ;;  %v7228_v14 = vld [vmem:[%s9913_s1 + $0x2f0] ss:$36 sps:$4 sm:$0xff]  }
 0x240   :  { %5074 = vmatpush2.bf16.msra.mxu0 %v7176_v15  ;;  %v7251_v15 = vld [vmem:[%s9913_s1 + $0x9b0] ss:$36 sps:$4 sm:$0xff]  }
 0x241   :  { %5107 = vmatpush1.bf16.msra.mxu1 %v7179_v18  ;;  %5075 = vmatprep.subr.bf16.mxu0 %v7184_v19  ;;  %v7230_v18 = vld [vmem:[%s9913_s1 + $0xb0] ss:$36 sps:$4 sm:$0xff]   ;;  %v7253_v19 = vld [vmem:[%s9913_s1 + $0xba8] ss:$36 sps:$4 sm:$0xff]  }
 0x242   :  { %5108 = vmatprep.subr.bf16.mxu1 %v7187_v21  ;;  %v7232_v21 = vld [vmem:[%s9913_s1 + $0x2a8] ss:$36 sps:$4 sm:$0xff]  }
 0x244   :  { %5076 = vmatpush2.bf16.msra.mxu0 %v7182_v22  ;;  %v7255_v22 = vld [vmem:[%s9913_s1 + $0x968] ss:$36 sps:$4 sm:$0xff]  }
 0x245   :  { %5109 = vmatpush1.bf16.msra.mxu1 %v7185_v23  ;;  %5077 = vmatprep.subr.bf16.mxu0 %v7190_v24  ;;  %v7234_v23 = vld [vmem:[%s9913_s1 + $0x68] ss:$36 sps:$4 sm:$0xff]   ;;  %v7257_v24 = vld [vmem:[%s9913_s1 + $0xb60] ss:$36 sps:$4 sm:$0xff]  }
 0x246   :  { %5110 = vmatprep.subr.bf16.mxu1 %v7193_v48  ;;  %v7236_v48 = vld [vmem:[%s9913_s1 + $0x260] ss:$36 sps:$4 sm:$0xff]  }
 0x248   :  { %5078 = vmatpush2.bf16.msra.mxu0 %v7188_v4  ;;  %v7259_v4 = vld [vmem:[%s9913_s1 + $0x920] ss:$36 sps:$4 sm:$0xff]  }
 0x249   :  { %5111 = vmatpush1.bf16.msra.mxu1 %v7191_v60  ;;  %5079 = vmatprep.subr.bf16.mxu0 %v7196_v25  ;;  %v7238_v60 = vld [vmem:[%s9913_s1 + $0x20] ss:$36 sps:$4 sm:$0xff]   ;;  %v7240_v25 = vld [vmem:[%s9913_s1 + $0x8d8] ss:$36 sps:$4 sm:$0xff]  }
 0x24a   :  { %5112 = vmatprep.subr.bf16.mxu1 %v7199_v26  ;;  %v7262_v26 = vld [vmem:[%s9913_s1 + $0x1418] ss:$36 sps:$4 sm:$0xff]  }
 0x24c   :  { %5080 = vmatpush2.bf16.msra.mxu0 %v7194_v27  ;;  %v7242_v27 = vld [vmem:[%s9913_s1 + $0x698] ss:$36 sps:$4 sm:$0xff]  }
 0x24d   :  { %5113 = vmatpush1.bf16.msra.mxu1 %v7197_v34  ;;  %5081 = vmatprep.subr.bf16.mxu0 %v7202_v30  ;;  %v7244_v34 = vld [vmem:[%s9913_s1 + $0x890] ss:$36 sps:$4 sm:$0xff]   ;;  %v7351_v30 = vld [vmem:[%s9914_s0] ss:$40 sps:$4 sm:$0xff]  }
 0x24e   :  { %5124 = vmatprep.subr.bf16.mxu1 %v7205_v3  ;;  %v7265_v3 = vld [vmem:[%s9913_s1 + $0x13d0] ss:$36 sps:$4 sm:$0xff]  }
 0x250   :  { %5082 = vmatpush2.bf16.msra.mxu0 %v7200_v6  ;;  %v7246_v6 = vld [vmem:[%s9913_s1 + $0x650] ss:$36 sps:$4 sm:$0xff]  }
 0x251   :  { %5125 = vmatpush2.bf16.msra.mxu1 %v7203_v32  ;;  %5083 = vmatprep.subr.bf16.mxu0 %v7208_v35  ;;  %v7268_v32 = vld [vmem:[%s9913_s1 + $0x1388] ss:$36 sps:$4 sm:$0xff]  }
 0x252   :  { %5126 = vmatprep.subr.bf16.mxu1 %v7211_v36  ;;  %v7250_v35 = vld [vmem:[%s9913_s1 + $0x608] ss:$36 sps:$4 sm:$0xff]   ;;  %v7254_v36 = vld [vmem:[%s9913_s1 + $0x5c0] ss:$36 sps:$4 sm:$0xff]  }
 0x254   :  { %5084 = vmatpush2.bf16.msra.mxu0 %v7206_v38  ;;  %v7256_v38 = vld [vmem:[%s9913_s1 + $0x7b8] ss:$36 sps:$4 sm:$0xff]  }
 0x255   :  { %5127 = vmatpush2.bf16.msra.mxu1 %v7209_v40  ;;  %5085 = vmatprep.subr.bf16.mxu0 %v7214_v13  ;;  %v7274_v40 = vld [vmem:[%s9913_s1 + $0x12f8] ss:$36 sps:$4 sm:$0xff]  }
 0x256   :  { %5128 = vmatprep.subr.bf16.mxu1 %v7217_v41  ;;  %v7258_v13 = vld [vmem:[%s9913_s1 + $0x578] ss:$36 sps:$4 sm:$0xff]   ;;  %v7260_v41 = vld [vmem:[%s9913_s1 + $0x770] ss:$36 sps:$4 sm:$0xff]  }
 0x258   :  { %5086 = vmatpush2.bf16.msra.mxu0 %v7212_v53  ;;  %v7277_v53 = vld [vmem:[%s9913_s1 + $0x12b0] ss:$36 sps:$4 sm:$0xff]  }
 0x259   :  { %5129 = vmatpush2.bf16.msra.mxu1 %v7215_v42  ;;  %6256 = vmatprep.subr.bf16.mxu0 %v7229_v16  ;;  %v7261_v42 = vld [vmem:[%s9913_s1 + $0x530] ss:$36 sps:$4 sm:$0xff]   ;;  %v7263_v16 = vld [vmem:[%s9913_s1 + $0x728] ss:$36 sps:$4 sm:$0xff]  }
 0x25a   :  { %6212 = vmatprep.subr.bf16.mxu1 %v7218_v46  ;;  %v7280_v46 = vld [vmem:[%s9913_s1 + $0x1268] ss:$36 sps:$4 sm:$0xff]  }
 0x25b   :  { %5088 = vmatmul.mubr.bf16.vlgmr.msra.gmra.mxu0 %v8821_v0  ;;  %v7222_v0 = vld [vmem:[%s9913_s1 + $0x3c8] ss:$36 sps:$4 sm:$0xff]  }
 0x25c   :  { %5131 = vmatmul.mubr.bf16.vlgmr.msra.gmra.mxu1 %v8974_v61  ;;  %6257 = vmatpush3.bf16.msra.mxu0 %v7231_v47  ;;  %v7264_v47 = vld [vmem:[%s9913_s1 + $0x4e8] ss:$36 sps:$4 sm:$0xff]  }
 0x25d   :  { %6213 = vmatpush3.bf16.msra.mxu1 %v7219_v51  ;;  %6258 = vmatprep.subr.bf16.mxu0 %v7233_v52  ;;  %v7266_v51 = vld [vmem:[%s9913_s1 + $0x6e0] ss:$36 sps:$4 sm:$0xff]  }
 0x25e   :  { %6214 = vmatprep.subr.bf16.mxu1 %v7220_v54  ;;  %5173 = vmatprep.mubr.bf16.mxu1 %v8850_v50  ;;  %v7241_v50 = vld [vmem:[%s9913_s1 + $0xc80] ss:$36 sps:$4 sm:$0xff]  }
 0x25f   :  { %5255 = vmatprep.mubr.bf16.mxu0 %v7350_v58  ;;  %v7283_v52 = vld [vmem:[%s9913_s1 + $0x1220] ss:$36 sps:$4 sm:$0xff]   ;;  %v7289_v58 = vld [vmem:[%s9913_s1 + $0x14a8] ss:$36 sps:$4 sm:$0xff]  }
 0x260   :  { %6259 = vmatpush3.bf16.msra.mxu0 %v7235_v55  ;;  %v7267_v54 = vld [vmem:[%s9913_s1 + $0x4a0] ss:$36 sps:$4 sm:$0xff]   ;;  %v7269_v55 = vld [vmem:[%s9913_s1 + $0x11d8] ss:$36 sps:$4 sm:$0xff]  }
 0x261   :  { %6215 = vmatpush3.bf16.msra.mxu1 %v7221_v29  ;;  %6260 = vmatprep.subr.bf16.mxu0 %v7237_v56  ;;  %v7286_v29 = vld [vmem:[%s9913_s1 + $0x14f0] ss:$36 sps:$4 sm:$0xff]   ;;  %v7270_v56 = vld [vmem:[%s9913_s1 + $0xf98] ss:$36 sps:$4 sm:$0xff]  }
 0x262   :  { %6216 = vmatprep.subr.bf16.mxu1 %v7222_v0  ;;  %v7272_v0 = vld [vmem:[%s9913_s1 + $0x1190] ss:$36 sps:$4 sm:$0xff]  }
 0x264   :  { %6261 = vmatpush3.bf16.msra.mxu0 %v7239_v62  ;;  %v7273_v62 = vld [vmem:[%s9913_s1 + $0xf50] ss:$36 sps:$4 sm:$0xff]  }
 0x265   :  { %6217 = vmatpush3.bf16.msra.mxu1 %v7223_v33  ;;  %6262 = vmatprep.subr.bf16.mxu0 %v7241_v50  ;;  %v7275_v33 = vld [vmem:[%s9913_s1 + $0x1148] ss:$36 sps:$4 sm:$0xff]  }
 0x266   :  { %6218 = vmatprep.subr.bf16.mxu1 %v7224_v1  ;;  %v7276_v50 = vld [vmem:[%s9913_s1 + $0xf08] ss:$36 sps:$4 sm:$0xff]   ;;  %v7278_v1 = vld [vmem:[%s9913_s1 + $0x1100] ss:$36 sps:$4 sm:$0xff]  }
 0x268   :  { %6263 = vmatpush3.bf16.msra.mxu0 %v7243_v2  ;;  %v7281_v2 = vld [vmem:[%s9913_s1 + $0x10b8] ss:$36 sps:$4 sm:$0xff]  }
 0x269   :  { %6219 = vmatpush3.bf16.msra.mxu1 %v7225_v5  ;;  %6264 = vmatprep.subr.bf16.mxu0 %v7245_v43  ;;  %v7284_v5 = vld [vmem:[%s9913_s1 + $0x1070] ss:$36 sps:$4 sm:$0xff]  }
 0x26a   :  { %6220 = vmatprep.subr.bf16.mxu1 %v7226_v7  ;;  %v7285_v43 = vld [vmem:[%s9913_s1 + $0xe30] ss:$36 sps:$4 sm:$0xff]   ;;  %v7288_v7 = vld [vmem:[%s9913_s1 + $0xde8] ss:$36 sps:$4 sm:$0xff]  }
 0x26c   :  { %6265 = vmatpush3.bf16.msra.mxu0 %v7247_v9  ;;  %v7290_v9 = vld [vmem:[%s9913_s1 + $0xfe0] ss:$36 sps:$4 sm:$0xff]  }
 0x26d   :  { %6221 = vmatpush3.bf16.msra.mxu1 %v7227_v10  ;;  %6266 = vmatprep.subr.bf16.mxu0 %v7249_v12  ;;  %v7291_v10 = vld [vmem:[%s9913_s1 + $0xda0] ss:$36 sps:$4 sm:$0xff]  }
 0x26e   :  { %6222 = vmatprep.subr.bf16.mxu1 %v7228_v14  ;;  %v7352_v12 = vld [vmem:[%s9914_s0 + $0x18] ss:$40 sps:$4 sm:$0xff]   ;;  %v4702_v14 = vpop.f32.mrf.mxu1 }
 0x270   :  { %6267 = vmatpush3.bf16.msra.mxu0 %v7251_v15  ;;  %v4704_v15 = vpop.f32.mrf.mxu1 }
 0x271   :  { %6223 = vmatpush3.bf16.msra.mxu1 %v7230_v18  ;;  %6268 = vmatprep.subr.bf16.mxu0 %v7253_v19  ;;  %v4745_v19 = vpop.f32.mrf.mxu0 }
 0x272   :  { %6224 = vmatprep.subr.bf16.mxu1 %v7232_v21  ;;  %v9635_v18 = vpop.f32.mrf.mxu1 }
 0x274   :  { %6269 = vmatpush3.bf16.msra.mxu0 %v7255_v22  ;;  %v9637_v21 = vpop.f32.mrf.mxu1  ;;  %v4747_v22 = vpop.f32.mrf.mxu0 }
 0x275   :  { %6225 = vmatpush3.bf16.msra.mxu1 %v7234_v23  ;;  %6270 = vmatprep.subr.bf16.mxu0 %v7257_v24 }
 0x276   :  { %6226 = vmatprep.subr.bf16.mxu1 %v7236_v48  ;;  %v4788_v23 = vpop.f32.mrf.mxu1  ;;  %v4749_v24 = vpop.f32.mrf.mxu0 }
 0x278   :  { %6271 = vmatpush3.bf16.msra.mxu0 %v7259_v4  ;;  %v4790_v48 = vpop.f32.mrf.mxu1  ;;  %v9639_v4 = vpop.f32.mrf.mxu0 }
 0x279   :  { %6227 = vmatpush3.bf16.msra.mxu1 %v7238_v60  ;;  %5305 = vmatprep.subr.bf16.mxu0 %v7353_v20 }
 0x27a   :  { %6234 = vmatprep.subr.bf16.mxu1 %v7240_v25  ;;  %v4792_v60 = vpop.f32.mrf.mxu1  ;;  %v4831_v25 = vpop.f32.mrf.mxu0 }
 0x27b   :  { %5256 = vmatmul.mubr.bf16.vlgmr.msra.gmra.mxu0 %v8815_v63  ;;  %v7248_v63 = vld [vmem:[%s9913_s1 + $0x848] ss:$36 sps:$4 sm:$0xff]  }
 0x27c   :  { %5174 = vmatmul.mubr.bf16.vlgmr.msra.gmra.mxu1 %v7351_v30  ;;  %5306 = vmatpush1.bf16.msra.mxu0 %v7262_v26  ;;  %v9641_v26 = vpop.f32.mrf.mxu1 }
 0x27d   :  { %6235 = vmatpush3.bf16.msra.mxu1 %v7242_v27  ;;  %5307 = vmatprep.subr.bf16.mxu0 %v7353_v20  ;;  %v4833_v27 = vpop.f32.mrf.mxu0 }
 0x27e   :  { %6236 = vmatprep.subr.bf16.mxu1 %v7244_v34  ;;  %5214 = vmatprep.mubr.bf16.mxu1 %v8992_v39  ;;  %v7252_v39 = vld [vmem:[%s9913_s1 + $0x800] ss:$36 sps:$4 sm:$0xff]   ;;  %v4874_v34 = vpop.f32.mrf.mxu1 }
 0x27f   :  { %6211 = vmatprep.mubr.msk.bf16.mxu0 %vm4277_vm0, %v8843_v8  ;;  %v7271_v8 = vld [vmem:[%s9913_s1 + $0x1340] ss:$36 sps:$4 sm:$0xff]   ;;  %v4835_v30 = vpop.f32.mrf.mxu0 }
 0x280   :  { %5308 = vmatpush1.bf16.msra.mxu0 %v7265_v3  ;;  %v9643_v3 = vpop.f32.mrf.mxu1 }
 0x281   :  { %6237 = vmatpush3.bf16.msra.mxu1 %v7246_v6  ;;  %5309 = vmatprep.subr.bf16.mxu0 %v7353_v20  ;;  %v9645_v6 = vpop.f32.mrf.mxu0 }
 0x282   :  { %6238 = vmatprep.subr.bf16.mxu1 %v7248_v63  ;;  %v9647_v63 = vpop.f32.mrf.mxu1 }
 0x284   :  { %5310 = vmatpush1.bf16.msra.mxu0 %v7268_v32 }
 0x285   :  { %6239 = vmatpush3.bf16.msra.mxu1 %v7250_v35  ;;  %5311 = vmatprep.subr.bf16.mxu0 %v7353_v20  ;;  %v9649_v35 = vpop.f32.mrf.mxu1 }
 0x286   :  { %6240 = vmatprep.subr.bf16.mxu1 %v7252_v39 }
 0x288   :  { %5312 = vmatpush1.bf16.msra.mxu0 %v7271_v8 }
 0x289   :  { %6241 = vmatpush3.bf16.msra.mxu1 %v7254_v36  ;;  %5313 = vmatprep.subr.bf16.mxu0 %v7353_v20 }
 0x28a   :  { %6242 = vmatprep.subr.bf16.mxu1 %v7256_v38 }
 0x28c   :  { %5314 = vmatpush1.bf16.msra.mxu0 %v7274_v40 }
 0x28d   :  { %6243 = vmatpush3.bf16.msra.mxu1 %v7258_v13  ;;  %5315 = vmatprep.subr.bf16.mxu0 %v7353_v20 }
 0x28e   :  { %6244 = vmatprep.subr.bf16.mxu1 %v7260_v41 }
 0x290   :  { %5316 = vmatpush1.bf16.msra.mxu0 %v7277_v53 }
 0x291   :  { %6245 = vmatpush3.bf16.msra.mxu1 %v7261_v42  ;;  %5317 = vmatprep.subr.bf16.mxu0 %v7353_v20 }
 0x292   :  { %6246 = vmatprep.subr.bf16.mxu1 %v7263_v16 }
 0x294   :  { %5318 = vmatpush1.bf16.msra.mxu0 %v7280_v46 }
 0x295   :  { %6247 = vmatpush3.bf16.msra.mxu1 %v7264_v47  ;;  %5319 = vmatprep.subr.bf16.mxu0 %v7353_v20 }
 0x296   :  { %6248 = vmatprep.subr.bf16.mxu1 %v7266_v51 }
 0x298   :  { %5320 = vmatpush1.bf16.msra.mxu0 %v7283_v52 }
 0x299   :  { %6249 = vmatpush3.bf16.msra.mxu1 %v7267_v54  ;;  %5331 = vmatprep.subr.bf16.mxu0 %v7353_v20 }
 0x29a   :  { %6278 = vmatprep.subr.bf16.mxu1 %v7269_v55 }
 0x29b   :  { %v4917_v32 = vpop.f32.mrf.mxu0 }
 0x29c   :  { %5215 = vmatmul.mubr.bf16.vlgmr.msra.gmra.mxu1 %v9194_v31  ;;  %5332 = vmatpush2.bf16.msra.mxu0 %v7286_v29  ;;  %v7292_v31 = vld [vmem:[%s9913_s1 + $0x1460] ss:$36 sps:$4 sm:$0xff]  }
 0x29d   :  { %6279 = vmatpush3.bf16.msra.mxu1 %v7270_v56  ;;  %5333 = vmatprep.subr.bf16.mxu0 %v7353_v20  ;;  %v9651_v39 = vpop.f32.mrf.mxu0 }
 0x29e   :  { %6280 = vmatprep.subr.bf16.mxu1 %v7272_v0  ;;  %5296 = vmatprep.mubr.bf16.mxu1 %v9203_v17  ;;  %v7279_v17 = vld [vmem:[%s9913_s1 + $0xec0] ss:$36 sps:$4 sm:$0xff]  }
 0x29f   :  { %v9653_v36 = vpop.f32.mrf.mxu0 }
 0x2a0   :  { %5334 = vmatpush2.bf16.msra.mxu0 %v7289_v58 }
 0x2a1   :  { %6281 = vmatpush3.bf16.msra.mxu1 %v7273_v62  ;;  %5335 = vmatprep.subr.bf16.mxu0 %v7353_v20  ;;  %v7282_v20 = vld [vmem:[%s9913_s1 + $0xe78] ss:$36 sps:$4 sm:$0xff]   ;;  %v9657_v40 = vpop.f32.mrf.mxu0 }
 0x2a2   :  { %6282 = vmatprep.subr.bf16.mxu1 %v7275_v33 }
 0x2a4   :  { %5336 = vmatpush2.bf16.msra.mxu0 %v7292_v31 }
 0x2a5   :  { %6283 = vmatpush3.bf16.msra.mxu1 %v7276_v50 }
 0x2a6   :  { %6284 = vmatprep.subr.bf16.mxu1 %v7278_v1 }
 0x2a7   :  { %5338 = vmatmul.mubr.bf16.vlgmr.msra.gmra.mxu0 %v8974_v61  ;;  %v7287_v61 = vld [vmem:[%s9913_s1 + $0x1028] ss:$36 sps:$4 sm:$0xff]  }
 0x2a9   :  { %6285 = vmatpush3.bf16.msra.mxu1 %v7279_v17 }
 0x2aa   :  { %6286 = vmatprep.subr.bf16.mxu1 %v7281_v2 }
 0x2ad   :  { %6287 = vmatpush3.bf16.msra.mxu1 %v7282_v20 }
 0x2ae   :  { %6288 = vmatprep.subr.bf16.mxu1 %v7284_v5 }
 0x2b0   :  { %v4960_v8 = vpop.f32.mrf.mxu1 }
 0x2b1   :  { %6289 = vmatpush3.bf16.msra.mxu1 %v7285_v43 }
 0x2b2   :  { %6290 = vmatprep.subr.bf16.mxu1 %v7287_v61  ;;  %v9655_v38 = vpop.f32.mrf.mxu1 }
 0x2b4   :  { %v9659_v13 = vpop.f32.mrf.mxu1 }
 0x2b5   :  { %6291 = vmatpush3.bf16.msra.mxu1 %v7288_v7  ;;  %v9704_v7 = vadd.f32 %v4702_v14, %v9046_v28  ;;  %v9719_v14 = vadd.f32 %v4704_v15, %v9058_v11 }
 0x2b6   :  { %6292 = vmatprep.subr.bf16.mxu1 %v7290_v9  ;;  %v9661_v53 = vpop.f32.mrf.mxu1  ;;  %v4789_v9 = vadd.f32 %v4788_v23, %v4745_v19  ;;  %v9723_v23 = vadd.f32 %v9635_v18, %v9064_v37  ;;  %v4795_v18 = vadd.f32 %v9641_v26, %v9639_v4 }
 0x2b7   :  { %v5372_v28 = vmul.f32 %v9704_v7, %v9704_v7  ;;  %v5373_v37 = vmul.f32 %v9719_v14, %v9719_v14 }
 0x2b9   :  { %6293 = vmatpush3.bf16.msra.mxu1 %v7291_v10 }
 0x2bc   :  { %5297 = vmatmul.mubr.bf16.vlgmr.msra.gmra.mxu1 %v7352_v12 }
 0x2db   :  { %v5003_v41 = vpop.f32.mrf.mxu0 }
 0x2dc   :  { %v5004_v15 = vadd.f32 %v5003_v41, %v4960_v8  ;;  %v4838_v8 = vadd.f32 %v9645_v6, %v4795_v18 }
 0x2dd   :  { %v5005_v42 = vpop.f32.mrf.mxu0 }
 0x2de   :  { %v5006_v26 = vadd.f32 %v5005_v42, %v9655_v38  ;;  %v4881_v42 = vadd.f32 %v9649_v35, %v4838_v8 }
 0x2df   :  { %v9663_v46 = vpop.f32.mrf.mxu0 }
 0x2e1   :  { %v9667_v51 = vpop.f32.mrf.mxu0 }
 0x2f0   :  { %v5046_v16 = vpop.f32.mrf.mxu1 }
 0x2f2   :  { %v9665_v47 = vpop.f32.mrf.mxu1 }
 0x2f4   :  { %v9669_v52 = vpop.f32.mrf.mxu1 }
 0x2f6   :  { %v9671_v55 = vpop.f32.mrf.mxu1 }
 0x31b   :  { %v5089_v54 = vpop.f32.mrf.mxu0 }
 0x31c   :  { %v9675_v56 = vpop.f32.mrf.mxu1 }
 0x31d   :  { %v9673_v29 = vpop.f32.mrf.mxu0 }
 0x31e   :  { %v9679_v58 = vpop.f32.mrf.mxu1 }
 0x31f   :  { %v9677_v0 = vpop.f32.mrf.mxu0 }
 0x320   :  { %v9683_v33 = vpop.f32.mrf.mxu1 }
 0x321   :  { %v9681_v62 = vpop.f32.mrf.mxu0  ;;  %9922 = vst [vmem:[#allocation4_spill] sm:$0xff] %v9683_v33 }
 0x322   :  { %v9687_v50 = vpop.f32.mrf.mxu1 }
 0x323   :  { %9924 = vst [vmem:[#allocation6_spill] sm:$0xff] %v9687_v50  ;;  %v5371_v50 = vmul.f32 %v8609_v49, %v8609_v49 }
 0x33b   :  { %v9685_v31 = vpop.f32.mrf.mxu0 }
 0x33c   :  { %9923 = vst [vmem:[#allocation5_spill] sm:$0xff] %v9685_v31  ;;  %v9691_v17 = vpop.f32.mrf.mxu1 }
 0x33d   :  { %v9689_v1 = vpop.f32.mrf.mxu0 }
 0x33e   :  { %9925 = vst [vmem:[#allocation7_spill] sm:$0xff] %v9689_v1  ;;  %v9695_v20 = vpop.f32.mrf.mxu1  ;;  %v4832_v1 = vadd.f32 %v4831_v25, %v4789_v9  ;;  %v4791_v25 = vadd.f32 %v4790_v48, %v4747_v22  ;;  %v4793_v9 = vadd.f32 %v4792_v60, %v4749_v24  ;;  %v5360_v24 = vadd.f32 %v8636_v59, %v8633_v57 }
 0x33f   :  { %v9693_v2 = vpop.f32.mrf.mxu0  ;;  %v5381_v48 = vmul.f32 %v9723_v23, %v9723_v23  ;;  %v5047_v60 = vadd.f32 %v5046_v16, %v5004_v15  ;;  %v6230_v35 = vadd.f32 %v9695_v20, %v9691_v17 }
 0x340   :  { %9926 = vst [vmem:[#allocation8_spill] sm:$0xff] %v9693_v2  ;;  %v9699_v43 = vpop.f32.mrf.mxu1  ;;  %v4836_v11 = vadd.f32 %v4835_v30, %v4793_v9  ;;  %v9743_v30 = vadd.f32 %v9637_v21, %v9079_v45  ;;  %v5361_v16 = vadd.f32 %v5360_v24, %v9723_v23  ;;  %v5008_v45 = vadd.f32 %v9663_v46, %v9659_v13 }
 0x341   :  { %v9697_v5 = vpop.f32.mrf.mxu0  ;;  %9928 = vst [vmem:[#allocation10_spill] sm:$0xff] %v9699_v43  ;;  %v4834_v43 = vadd.f32 %v4833_v27, %v4791_v25  ;;  %v5010_v13 = vadd.f32 %v9667_v51, %v9661_v53  ;;  %v9780_v53 = vadd.f32 %v9657_v40, %v4881_v42 }
 0x342   :  { %9927 = vst [vmem:[#allocation9_spill] sm:$0xff] %v9697_v5  ;;  %v9706_v12 = vpop.f32.mrf.mxu1  ;;  %v5370_v5 = vmul.f32 %v8600_v44, %v8600_v44  ;;  %v5382_v38 = vmul.f32 %v9743_v30, %v9743_v30 }
 0x343   :  { %9930 = vst [vmem:[#allocation12_spill] sm:$0xff] %v9706_v12  ;;  %v4877_v4 = vadd.f32 %v9643_v3, %v4834_v43  ;;  %v5053_v51 = vadd.f32 %v9671_v55, %v5010_v13  ;;  %v5384_v18 = vmul.f32 %v9780_v53, %v9780_v53 }
 0x345   :  { %v9755_v6 = vadd.f32 %v9651_v39, %v4877_v4  ;;  %v9936_v15 = vld [vmem:[#allocation7_spill] sm:$0xff] }
 0x348   :  { %v9933_v25 = vld [vmem:[#allocation10_spill] sm:$0xff] }
 0x34a   :  { %v9934_v9 = vld [vmem:[#allocation12_spill] sm:$0xff] }
 0x35c   :  { %v6250_v31 = vpop.f32.mrf.mxu1 }
 0x367   :  { %v9701_v61 = vpop.f32.mrf.mxu0 }
 0x368   :  { %9929 = vst [vmem:[#allocation11_spill] sm:$0xff] %v9701_v61  ;;  %v5350_v61 = vadd.f32 %v8609_v49, %v8600_v44  ;;  %v4875_v49 = vadd.f32 %v4874_v34, %v4832_v1  ;;  %v5379_v44 = vmul.f32 %v8633_v57, %v8633_v57 }
 0x369   :  { %v5341_v10 = vpop.f32.mrf.mxu0 }
 0x36a   :  { %v5388_v10 = vadd.f32 %v5371_v50, %v5370_v5  ;;  %v5351_v12 = vadd.f32 %v5350_v61, %v9704_v7  ;;  %v9734_v22 = vadd.f32 %v4917_v32, %v4875_v49  ;;  %v4879_v49 = vadd.f32 %v9647_v63, %v4836_v11  ;;  %v9935_v11 = vld [vmem:[#allocation5_spill] sm:$0xff] }
 0x36b   :  { %v9710_v2 = vpop.f32.mrf.mxu0  ;;  %v5090_v32 = vadd.f32 %v5089_v54, %v5047_v60  ;;  %v5049_v63 = vadd.f32 %v9665_v47, %v5006_v26  ;;  %v5051_v54 = vadd.f32 %v9669_v52, %v5008_v45  ;;  %v5375_v52 = vmul.f32 %v9755_v6, %v9755_v6 }
 0x36c   :  { %9931 = vst [vmem:[#allocation13_spill] sm:$0xff] %v9710_v2  ;;  %v5380_v2 = vmul.f32 %v8636_v59, %v8636_v59  ;;  %v5389_v33 = vadd.f32 %v5388_v10, %v5372_v28  ;;  %v5352_v34 = vadd.f32 %v5351_v12, %v9719_v14  ;;  %v9758_v3 = vadd.f32 %v9653_v36, %v4879_v49  ;;  %v9932_v28 = vld [vmem:[#allocation4_spill] sm:$0xff] }
 0x36d   :  { %v5344_v19 = vpop.f32.mrf.mxu0  ;;  %v9769_v39 = vadd.f32 %v9675_v56, %v5090_v32  ;;  %v5092_v36 = vadd.f32 %v9673_v29, %v5049_v63  ;;  %v5362_v29 = vadd.f32 %v5361_v16, %v9743_v30  ;;  %v5096_v61 = vadd.f32 %v9681_v62, %v5053_v51  ;;  %v9939_v16 = vld [vmem:[#allocation9_spill] sm:$0xff] }
 0x36e   :  { %v6251_v19 = vpop.f32.mrf.mxu1  ;;  %v5398_v27 = vadd.f32 %v5380_v2, %v5379_v44  ;;  %v5390_v50 = vadd.f32 %v5389_v33, %v5373_v37  ;;  %v5374_v44 = vmul.f32 %v9734_v22, %v9734_v22  ;;  %v5353_v1 = vadd.f32 %v5352_v34, %v9734_v22  ;;  %v9937_v34 = vld [vmem:[#allocation6_spill] sm:$0xff] }
 0x36f   :  { %v6252_v33 = vadd.f32 %v6251_v19, %v6250_v31  ;;  %v5094_v2 = vadd.f32 %v9677_v0, %v5051_v54  ;;  %v5383_v31 = vmul.f32 %v9758_v3, %v9758_v3  ;;  %v5376_v17 = vmul.f32 %v9769_v39, %v9769_v39 }
 0x370   :  { %v6253_v41 = vpop.f32.mrf.mxu1  ;;  %v5399_v21 = vadd.f32 %v5398_v27, %v5381_v48  ;;  %v5391_v47 = vadd.f32 %v5390_v50, %v5374_v44  ;;  %v5354_v0 = vadd.f32 %v5353_v1, %v9755_v6  ;;  %v9788_v20 = vadd.f32 %v9679_v58, %v5092_v36  ;;  %v9938_v50 = vld [vmem:[#allocation8_spill] sm:$0xff]  ;;  %v9940_v1 = vld [vmem:[#allocation11_spill] sm:$0xff] }
 0x371   :  { %v5217_v5 = vadd.f32 %v6252_v33, %v6230_v35  ;;  %v5363_v40 = vadd.f32 %v5362_v29, %v9758_v3  ;;  %v9793_v55 = vadd.f32 %v9932_v28, %v5094_v2  ;;  %v6233_v10 = vadd.f32 %v9934_v9, %v9933_v25 }
 0x372   :  { %v6254_v46 = vpop.f32.mrf.mxu1  ;;  %v5400_v56 = vadd.f32 %v5399_v21, %v5382_v38  ;;  %v6274_v19 = vadd.f32 %v9936_v15, %v9935_v11  ;;  %v5355_v24 = vadd.f32 %v5354_v0, %v9769_v39  ;;  %v5392_v62 = vadd.f32 %v5391_v47, %v5375_v52 }
 0x373   :  { %v6255_v43 = vadd.f32 %v6254_v46, %v6253_v41  ;;  %v9803_v8 = vadd.f32 %v9937_v34, %v5096_v61  ;;  %v5377_v49 = vmul.f32 %v9788_v20, %v9788_v20  ;;  %v5364_v32 = vadd.f32 %v5363_v40, %v9780_v53 }
 0x374   :  { %v5401_v37 = vadd.f32 %v5400_v56, %v5383_v31  ;;  %v5258_v60 = vadd.f32 %v6274_v19, %v5217_v5  ;;  %v5393_v26 = vadd.f32 %v5392_v62, %v5376_v17  ;;  %v5385_v41 = vmul.f32 %v9793_v55, %v9793_v55  ;;  %v9941_v31 = vld [vmem:[#allocation13_spill] sm:$0xff]  ;;  %v5346_v62 = vld [vmem:[%s9915_s2] sm:$0xff] }
 0x375   :  { %v5220_v48 = vadd.f32 %v6255_v43, %v6233_v10  ;;  %v6277_v44 = vadd.f32 %v9939_v16, %v9938_v50  ;;  %v5356_v38 = vadd.f32 %v5355_v24, %v9788_v20  ;;  %v5365_v42 = vadd.f32 %v5364_v32, %v9793_v55  ;;  %v5349_v50 = vld [vmem:[%s9916_s3 + $0x8] sm:$0xff] }
 0x376   :  { %v5402_v21 = vadd.f32 %v5401_v37, %v5384_v18  ;;  %v5386_v36 = vmul.f32 %v9803_v8, %v9803_v8  ;;  %v5394_v46 = vadd.f32 %v5393_v26, %v5377_v49  ;;  %v5348_v26 = vld [vmem:[%s9916_s3] sm:$0xff] }
 0x377   :  { %v5261_v54 = vadd.f32 %v6277_v44, %v5220_v48  ;;  %v5366_v56 = vadd.f32 %v5365_v42, %v9803_v8 }
 0x378   :  { %v5403_v52 = vadd.f32 %v5402_v21, %v5385_v41  ;;  %v9942_v21 = vld [vmem:[#allocation2_spill] sm:$0xff] }
 0x37a   :  { %v5404_v0 = vadd.f32 %v5403_v52, %v5386_v36 }
 0x37c   :  { %v6294_v12 = vpop.f32.mrf.mxu1 }
 0x37e   :  { %v6295_v58 = vpop.f32.mrf.mxu1 }
 0x37f   :  { %v6296_v27 = vadd.f32 %v6295_v58, %v6294_v12 }
 0x380   :  { %v6297_v4 = vpop.f32.mrf.mxu1 }
 0x381   :  { %v5299_v45 = vadd.f32 %v6296_v27, %v5258_v60  ;;  %v5347_v27 = vld [vmem:[%s9915_s2 + $0x8] sm:$0xff] }
 0x382   :  { %v6298_v63 = vpop.f32.mrf.mxu1 }
 0x383   :  { %v6299_v33 = vadd.f32 %v6298_v63, %v6297_v4  ;;  %v9815_v13 = vadd.f32 %v9940_v1, %v5299_v45 }
 0x385   :  { %v5302_v47 = vadd.f32 %v6299_v33, %v5261_v54  ;;  %v5357_v2 = vadd.f32 %v5356_v38, %v9815_v13  ;;  %v5378_v35 = vmul.f32 %v9815_v13, %v9815_v13  ;;  %v9943_v38 = vld [vmem:[#allocation3_spill] sm:$0xff] }
 0x387   :  { %v9823_v51 = vadd.f32 %v9941_v31, %v5302_v47  ;;  %5358 = vadd.xlane.f32.xlu0 %v5357_v2  ;;  %v5395_v29 = vadd.f32 %v5394_v46, %v5378_v35 }
 0x389   :  { %5396 = vadd.xlane.f32.xlu1 %v5395_v29  ;;  %v5367_v5 = vadd.f32 %v5366_v56, %v9823_v51  ;;  %v5387_v43 = vmul.f32 %v9823_v51, %v9823_v51 }
 0x38b   :  { %5368 = vadd.xlane.f32.xlu0 %v5367_v5  ;;  %v5405_v17 = vadd.f32 %v5404_v0, %v5387_v43 }
 0x38d   :  { %5406 = vadd.xlane.f32.xlu1 %v5405_v17 }
 0x410   :  { %v5359_v61 = vpop.xlane.xlu0 %5358 }
 0x411   :  { %v5408_v12 = vmul.f32 0.00086805556, %v5359_v61 }
 0x412   :  { %v5397_v40 = vpop.xlane.xlu1 %5396 }
 0x413   :  { %v5412_v28 = vmul.f32 %v5408_v12, %v5408_v12  ;;  %v5410_v25 = vmul.f32 0.00086805556, %v5397_v40 }
 0x414   :  { %v5369_v9 = vpop.xlane.xlu0 %5368 }
 0x415   :  { %v5414_v10 = vsub.f32 %v5410_v25, %v5412_v28  ;;  %v5409_v11 = vmul.f32 0.00086805556, %v5369_v9 }
 0x416   :  { %v5407_v15 = vpop.xlane.xlu1 %5406 }
 0x417   :  { %v5416_v19 = vadd.f32 1e-05, %v5414_v10  ;;  %v5413_v37 = vmul.f32 %v5409_v11, %v5409_v11  ;;  %v5411_v18 = vmul.f32 0.00086805556, %v5407_v15 }
 0x419   :  { %7293 = vrsqrt.f32 %v5416_v19  ;;  %v5415_v58 = vsub.f32 %v5411_v18, %v5413_v37 }
 0x41b   :  { %v5417_v24 = vadd.f32 1e-05, %v5415_v58 }
 0x41d   :  { %7295 = vrsqrt.f32 %v5417_v24 }
 0x426   :  { %v7294_v48 = vpop.eup %7293 }
 0x427   :  { %v5420_v60 = vmul.f32 %v7294_v48, %v5346_v62 }
 0x429   :  { %5428 = vperm.xlu0 %6301, %v5420_v60   ;;  %v5422_v49 = vmul.f32 %v5420_v60, %v5408_v12 }
 0x42a   :  { %v7296_v34 = vpop.eup %7295 }
 0x42b   :  { %v5421_v4 = vmul.f32 %v7296_v34, %v5347_v27  ;;  %v5424_v32 = vsub.f32 %v5348_v26, %v5422_v49 }
 0x42d   :  { %5433 = vperm.xlu1 %6302, %v5421_v4   ;;  %v5423_v41 = vmul.f32 %v5421_v4, %v5409_v11 }
 0x42f   :  { %v5425_v16 = vsub.f32 %v5349_v50, %v5423_v41 }
 0x431   :  { %5456 = vperm.xlu1 %6302, %v5424_v32  }
 0x435   :  { %5461 = vperm.xlu1 %6302, %v5425_v16  }
 0x4a4   :  { %v5429_v44 = vpop.permute.xlu0 %5428 }
 0x4a5   :  { %v5436_v63 = vmul.f32 %v5429_v44, %v9942_v21  ;;  %v5437_v42 = vmul.f32 %v5429_v44, %v9943_v38  ;;  %v5438_v54 = vmul.f32 %v5429_v44, %v9704_v7  ;;  %v5439_v33 = vmul.f32 %v5429_v44, %v9719_v14 }
 0x4a6   :  { %v5440_v36 = vmul.f32 %v5429_v44, %v9734_v22  ;;  %v5441_v35 = vmul.f32 %v5429_v44, %v9755_v6  ;;  %v5442_v31 = vmul.f32 %v5429_v44, %v9769_v39  ;;  %v5443_v56 = vmul.f32 %v5429_v44, %v9788_v20 }
 0x4a7   :  { %v5444_v7 = vmul.f32 %v5429_v44, %v9815_v13 }
 0x4a8   :  { %v5434_v45 = vpop.permute.xlu1 %5433 }
 0x4a9   :  { %v5445_v0 = vmul.f32 %v5434_v45, %v8633_v57  ;;  %v5446_v6 = vmul.f32 %v5434_v45, %v8636_v59  ;;  %v5447_v39 = vmul.f32 %v5434_v45, %v9723_v23  ;;  %v5448_v20 = vmul.f32 %v5434_v45, %v9743_v30 }
 0x4aa   :  { %v5449_v13 = vmul.f32 %v5434_v45, %v9758_v3  ;;  %v5450_v28 = vmul.f32 %v5434_v45, %v9780_v53  ;;  %v5451_v25 = vmul.f32 %v5434_v45, %v9793_v55  ;;  %v5452_v59 = vmul.f32 %v5434_v45, %v9803_v8 }
 0x4ab   :  { %v5453_v10 = vmul.f32 %v5434_v45, %v9823_v51 }
 0x4ac   :  { %v5457_v1 = vpop.permute.xlu1 %5456 }
 0x4ad   :  { %v5464_v46 = vadd.f32 %v5457_v1, %v5436_v63  ;;  %v5465_v47 = vadd.f32 %v5457_v1, %v5437_v42  ;;  %v5466_v2 = vadd.f32 %v5457_v1, %v5438_v54  ;;  %v5467_v52 = vadd.f32 %v5457_v1, %v5439_v33 }
 0x4ae   :  { %v5468_v29 = vadd.f32 %v5457_v1, %v5440_v36  ;;  %v5469_v5 = vadd.f32 %v5457_v1, %v5441_v35  ;;  %v5470_v14 = vadd.f32 %v5457_v1, %v5442_v31  ;;  %v5471_v22 = vadd.f32 %v5457_v1, %v5443_v56 }
 0x4af   :  { %7297 = vtanh.f32 %v5464_v46  ;;  %v5472_v17 = vadd.f32 %v5457_v1, %v5444_v7 }
 0x4b0   :  { %7299 = vtanh.f32 %v5465_v47  ;;  %v5462_v43 = vpop.permute.xlu1 %5461 }
 0x4b1   :  { %7301 = vtanh.f32 %v5466_v2  ;;  %v5473_v61 = vadd.f32 %v5462_v43, %v5445_v0  ;;  %v5474_v12 = vadd.f32 %v5462_v43, %v5446_v6  ;;  %v5475_v40 = vadd.f32 %v5462_v43, %v5447_v39 }
 0x4b2   :  { %7303 = vtanh.f32 %v5467_v52  ;;  %v5476_v57 = vadd.f32 %v5462_v43, %v5448_v20  ;;  %v5477_v9 = vadd.f32 %v5462_v43, %v5449_v13  ;;  %v5478_v23 = vadd.f32 %v5462_v43, %v5450_v28 }
 0x4b3   :  { %7305 = vtanh.f32 %v5468_v29  ;;  %v5479_v30 = vadd.f32 %v5462_v43, %v5451_v25  ;;  %v5480_v11 = vadd.f32 %v5462_v43, %v5452_v59  ;;  %v5481_v15 = vadd.f32 %v5462_v43, %v5453_v10 }
 0x4b4   :  { %7307 = vtanh.f32 %v5469_v5 }
 0x4b5   :  { %7309 = vtanh.f32 %v5470_v14 }
 0x4b6   :  { %7311 = vtanh.f32 %v5471_v22 }
 0x4b7   :  { %7313 = vtanh.f32 %v5472_v17 }
 0x4b8   :  { %7315 = vtanh.f32 %v5473_v61 }
 0x4b9   :  { %7317 = vtanh.f32 %v5474_v12 }
 0x4ba   :  { %7319 = vtanh.f32 %v5475_v40 }
 0x4bb   :  { %7321 = vtanh.f32 %v5476_v57 }
 0x4bc   :  { %v7298_v3 = vpop.eup %7297  ;;  %7323 = vtanh.f32 %v5477_v9 }
 0x4bd   :  { %v7300_v19 = vpop.eup %7299  ;;  %5500 = vst [vmem:[%s9917_s4] sm:$0xff] %v7298_v3  ;;  %7325 = vtanh.f32 %v5478_v23 }
 0x4be   :  { %v7302_v53 = vpop.eup %7301  ;;  %5501 = vst [vmem:[%s9917_s4 + $0x8] sm:$0xff] %v7300_v19  ;;  %7327 = vtanh.f32 %v5479_v30 }
 0x4bf   :  { %v7304_v55 = vpop.eup %7303  ;;  %5502 = vst [vmem:[%s9917_s4 + $0x10] sm:$0xff] %v7302_v53  ;;  %7329 = vtanh.f32 %v5480_v11 }
 0x4c0   :  { %v7306_v8 = vpop.eup %7305  ;;  %5503 = vst [vmem:[%s9917_s4 + $0x18] sm:$0xff] %v7304_v55  ;;  %7331 = vtanh.f32 %v5481_v15 }
 0x4c1   :  { %v7308_v51 = vpop.eup %7307  ;;  %5504 = vst [vmem:[%s9917_s4 + $0x20] sm:$0xff] %v7306_v8 }
 0x4c2   :  { %v7310_v37 = vpop.eup %7309  ;;  %5505 = vst [vmem:[%s9917_s4 + $0x28] sm:$0xff] %v7308_v51 }
 0x4c3   :  { %v7312_v18 = vpop.eup %7311  ;;  %5506 = vst [vmem:[%s9917_s4 + $0x30] sm:$0xff] %v7310_v37 }
 0x4c4   :  { %v7314_v58 = vpop.eup %7313  ;;  %5507 = vst [vmem:[%s9917_s4 + $0x38] sm:$0xff] %v7312_v18 }
 0x4c5   :  { %v7316_v24 = vpop.eup %7315  ;;  %5508 = vst [vmem:[%s9917_s4 + $0x40] sm:$0xff] %v7314_v58 }
 0x4c6   :  { %v7318_v62 = vpop.eup %7317  ;;  %5509 = vst [vmem:[%s9917_s4 + $0x48] sm:$0xff] %v7316_v24 }
 0x4c7   :  { %v7320_v48 = vpop.eup %7319  ;;  %5510 = vst [vmem:[%s9917_s4 + $0x50] sm:$0xff] %v7318_v62 }
 0x4c8   :  { %v7322_v60 = vpop.eup %7321  ;;  %5511 = vst [vmem:[%s9917_s4 + $0x58] sm:$0xff] %v7320_v48 }
 0x4c9   :  { %v7324_v27 = vpop.eup %7323  ;;  %5512 = vst [vmem:[%s9917_s4 + $0x60] sm:$0xff] %v7322_v60 }
 0x4ca   :  { %v7326_v34 = vpop.eup %7325  ;;  %5513 = vst [vmem:[%s9917_s4 + $0x68] sm:$0xff] %v7324_v27 }
 0x4cb   :  { %v7328_v4 = vpop.eup %7327  ;;  %5514 = vst [vmem:[%s9917_s4 + $0x70] sm:$0xff] %v7326_v34 }
 0x4cc   :  { %v7330_v49 = vpop.eup %7329  ;;  %5515 = vst [vmem:[%s9917_s4 + $0x78] sm:$0xff] %v7328_v4 }
 0x4cd   :  { %v7332_v26 = vpop.eup %7331  ;;  %5516 = vst [vmem:[%s9917_s4 + $0x80] sm:$0xff] %v7330_v49 }
 0x4ce   :  { %5517 = vst [vmem:[%s9917_s4 + $0x88] sm:$0xff] %v7332_v26 }

// kernel: backbone_step2.3
= control target key start
LH: loop header
LB: loop body
LE: loop exit
PB: predicated region body
PF: predicated region fallthrough
CT: control target
= control target key end

     0   :  { %vm1255_vm0 = vcmask 392192   ;;  %v3114_v55 = vmov 0   ;;  %s4823_s1 = inlined_call_operand.vmem [shape: bf16[432,896], index: 1, kind: input, shape index: {}]   ;;  %s4824_s0 = inlined_call_operand.vmem [shape: bf16[32,432], index: 0, kind: input, shape index: {}]   ;;  %s4825_s4 = inlined_call_operand.vmem [shape: f32[896,256], index: 4, kind: input, shape index: {}]   ;;  %s4826_s2 = inlined_call_operand.vmem [shape: f32[32,1], index: 2, kind: input, shape index: {}]   ;;  %s4827_s3 = inlined_call_operand.vmem [shape: f32[32,1], index: 3, kind: input, shape index: {}]   ;;  %s4828_s5 = inlined_call_operand.vmem [shape: f32[32,256], index: 5, kind: output, shape index: {}]  }
   0x1   :  { %v2767_v0 = vld [vmem:[%s4823_s1 + $0x18c] ss:$28 sps:$4 sm:$0xff]   ;;  %v2773_v4 = vld [vmem:[%s4823_s1 + $0x154] ss:$28 sps:$4 sm:$0xff]   ;;  %v2779_v8 = vld [vmem:[%s4823_s1 + $0x11c] ss:$28 sps:$4 sm:$0xff]   ;;  %2765 = vset.pattern.permute.xlu0 %v3114_v55  ;;  %2766 = vset.pattern.permute.xlu1 %v3114_v55 }
   0x2   :  { %v2769_v1 = vld [vmem:[%s4823_s1 + $0x50c] ss:$28 sps:$4 sm:$0xff]   ;;  %1262 = vmatprep.subr.bf16.mxu0 %v2767_v0  ;;  %v2775_v5 = vld [vmem:[%s4823_s1 + $0x4d4] ss:$28 sps:$4 sm:$0xff]   ;;  %v2781_v9 = vld [vmem:[%s4823_s1 + $0x49c] ss:$28 sps:$4 sm:$0xff]  }
   0x3   :  { %v2771_v2 = vld [vmem:[%s4823_s1 + $0x188] ss:$28 sps:$4 sm:$0xff]   ;;  %1315 = vmatprep.subr.bf16.mxu1 %v2769_v1  ;;  %v2777_v6 = vld [vmem:[%s4823_s1 + $0x150] ss:$28 sps:$4 sm:$0xff]   ;;  %v2783_v10 = vld [vmem:[%s4823_s1 + $0x118] ss:$28 sps:$4 sm:$0xff]  }
   0x4   :  { %v2772_v3 = vld [vmem:[%s4823_s1 + $0x508] ss:$28 sps:$4 sm:$0xff]   ;;  %1263 = vmatpush1.bf16.msra.mxu0 %v2771_v2  ;;  %v2778_v7 = vld [vmem:[%s4823_s1 + $0x4d0] ss:$28 sps:$4 sm:$0xff]   ;;  %v2784_v11 = vld [vmem:[%s4823_s1 + $0x498] ss:$28 sps:$4 sm:$0xff]  }
   0x5   :  { %1316 = vmatpush1.bf16.msra.mxu1 %v2772_v3  ;;  %1264 = vmatprep.subr.bf16.mxu0 %v2773_v4  ;;  %v2785_v12 = vld [vmem:[%s4823_s1 + $0xe4] ss:$28 sps:$4 sm:$0xff]   ;;  %v2791_v16 = vld [vmem:[%s4823_s1 + $0xac] ss:$28 sps:$4 sm:$0xff]   ;;  %v2797_v20 = vld [vmem:[%s4823_s1 + $0x74] ss:$28 sps:$4 sm:$0xff]  }
   0x6   :  { %1317 = vmatprep.subr.bf16.mxu1 %v2775_v5  ;;  %v2787_v13 = vld [vmem:[%s4823_s1 + $0x464] ss:$28 sps:$4 sm:$0xff]   ;;  %v2793_v17 = vld [vmem:[%s4823_s1 + $0x42c] ss:$28 sps:$4 sm:$0xff]   ;;  %v2799_v21 = vld [vmem:[%s4823_s1 + $0x3f4] ss:$28 sps:$4 sm:$0xff]  }
   0x7   :  { %v2789_v14 = vld [vmem:[%s4823_s1 + $0xe0] ss:$28 sps:$4 sm:$0xff]   ;;  %v2795_v18 = vld [vmem:[%s4823_s1 + $0xa8] ss:$28 sps:$4 sm:$0xff]   ;;  %v2801_v22 = vld [vmem:[%s4823_s1 + $0x70] ss:$28 sps:$4 sm:$0xff]  }
   0x8   :  { %1265 = vmatpush1.bf16.msra.mxu0 %v2777_v6  ;;  %v2790_v15 = vld [vmem:[%s4823_s1 + $0x460] ss:$28 sps:$4 sm:$0xff]   ;;  %v2796_v19 = vld [vmem:[%s4823_s1 + $0x428] ss:$28 sps:$4 sm:$0xff]   ;;  %v2802_v23 = vld [vmem:[%s4823_s1 + $0x3f0] ss:$28 sps:$4 sm:$0xff]  }
   0x9   :  { %1318 = vmatpush1.bf16.msra.mxu1 %v2778_v7  ;;  %1266 = vmatprep.subr.bf16.mxu0 %v2779_v8  ;;  %v2803_v24 = vld [vmem:[%s4823_s1 + $0x3c] ss:$28 sps:$4 sm:$0xff]   ;;  %v2809_v28 = vld [vmem:[%s4823_s1 + $0x4] ss:$28 sps:$4 sm:$0xff]   ;;  %v2815_v32 = vld [vmem:[%s4823_s1 + $0x34c] ss:$28 sps:$4 sm:$0xff]  }
   0xa   :  { %1319 = vmatprep.subr.bf16.mxu1 %v2781_v9  ;;  %v2805_v25 = vld [vmem:[%s4823_s1 + $0x3bc] ss:$28 sps:$4 sm:$0xff]   ;;  %v2811_v29 = vld [vmem:[%s4823_s1 + $0x384] ss:$28 sps:$4 sm:$0xff]   ;;  %v2817_v33 = vld [vmem:[%s4823_s1 + $0x5b4] ss:$28 sps:$4 sm:$0xff]  }
   0xb   :  { %v2807_v26 = vld [vmem:[%s4823_s1 + $0x38] ss:$28 sps:$4 sm:$0xff]   ;;  %v2813_v30 = vld [vmem:[%s4823_s1] ss:$28 sps:$4 sm:$0xff]   ;;  %v2819_v35 = vld [vmem:[%s4823_s1 + $0x348] ss:$28 sps:$4 sm:$0xff]  }
   0xc   :  { %1267 = vmatpush1.bf16.msra.mxu0 %v2783_v10  ;;  %v2808_v27 = vld [vmem:[%s4823_s1 + $0x3b8] ss:$28 sps:$4 sm:$0xff]   ;;  %v2814_v31 = vld [vmem:[%s4823_s1 + $0x380] ss:$28 sps:$4 sm:$0xff]   ;;  %v2820_v36 = vld [vmem:[%s4823_s1 + $0x5b0] ss:$28 sps:$4 sm:$0xff]  }
   0xd   :  { %1320 = vmatpush1.bf16.msra.mxu1 %v2784_v11  ;;  %1268 = vmatprep.subr.bf16.mxu0 %v2785_v12  ;;  %v3251_v34 = vld [vmem:[%s4824_s0 + $0xc] ss:$16 sps:$4 sm:$0xff]   ;;  %v2821_v37 = vld [vmem:[%s4823_s1 + $0x314] ss:$28 sps:$4 sm:$0xff]   ;;  %v2829_v42 = vld [vmem:[%s4823_s1 + $0x544] ss:$28 sps:$4 sm:$0xff]  }
   0xe   :  { %1321 = vmatprep.subr.bf16.mxu1 %v2787_v13  ;;  %v2823_v38 = vld [vmem:[%s4823_s1 + $0x57c] ss:$28 sps:$4 sm:$0xff]   ;;  %2727 = vmatprep.mubr.msk.bf16.mxu1 %vm1255_vm0, %v3251_v34  ;;  %v2825_v39 = vld [vmem:[%s4823_s1 + $0x310] ss:$28 sps:$4 sm:$0xff]   ;;  %v2833_v45 = vld [vmem:[%s4823_s1 + $0x2a4] ss:$28 sps:$4 sm:$0xff]  }
   0xf   :  { %v2826_v40 = vld [vmem:[%s4823_s1 + $0x578] ss:$28 sps:$4 sm:$0xff]   ;;  %v2832_v44 = vld [vmem:[%s4823_s1 + $0x540] ss:$28 sps:$4 sm:$0xff]   ;;  %v2837_v47 = vld [vmem:[%s4823_s1 + $0x190] ss:$28 sps:$4 sm:$0xff]  }
  0x10   :  { %1269 = vmatpush1.bf16.msra.mxu0 %v2789_v14  ;;  %v2827_v41 = vld [vmem:[%s4823_s1 + $0x2dc] ss:$28 sps:$4 sm:$0xff]   ;;  %v2839_v46 = vld [vmem:[%s4823_s1 + $0x194] ss:$28 sps:$4 sm:$0xff]   ;;  %v2842_v50 = vld [vmem:[%s4823_s1 + $0x26c] ss:$28 sps:$4 sm:$0xff]  }
  0x11   :  { %1322 = vmatpush1.bf16.msra.mxu1 %v2790_v15  ;;  %1270 = vmatprep.subr.bf16.mxu0 %v2791_v16  ;;  %v2831_v43 = vld [vmem:[%s4823_s1 + $0x2d8] ss:$28 sps:$4 sm:$0xff]   ;;  %v2840_v48 = vld [vmem:[%s4823_s1 + $0x2a0] ss:$28 sps:$4 sm:$0xff]   ;;  %v2847_v54 = vld [vmem:[%s4823_s1 + $0x268] ss:$28 sps:$4 sm:$0xff]  }
  0x12   :  { %1323 = vmatprep.subr.bf16.mxu1 %v2793_v17  ;;  %v3300_v49 = vld [vmem:[%s4824_s0 + $0x8] ss:$16 sps:$4 sm:$0xff]   ;;  %v3308_v51 = vld [vmem:[%s4824_s0 + $0x4] ss:$16 sps:$4 sm:$0xff]   ;;  %v2850_v58 = vld [vmem:[%s4823_s1 + $0x120] ss:$28 sps:$4 sm:$0xff]  }
  0x13   :  { %v2846_v52 = vld [vmem:[%s4823_s1 + $0x15c] ss:$28 sps:$4 sm:$0xff]   ;;  %1294 = vmatprep.mubr.bf16.mxu0 %v3308_v51  ;;  %v2848_v56 = vld [vmem:[%s4823_s1 + $0x234] ss:$28 sps:$4 sm:$0xff]   ;;  %v2852_v57 = vld [vmem:[%s4823_s1 + $0x124] ss:$28 sps:$4 sm:$0xff]  }
  0x14   :  { %1271 = vmatpush1.bf16.msra.mxu0 %v2795_v18  ;;  %v2844_v53 = vld [vmem:[%s4823_s1 + $0x158] ss:$28 sps:$4 sm:$0xff]   ;;  %v2853_v59 = vld [vmem:[%s4823_s1 + $0x230] ss:$28 sps:$4 sm:$0xff]   ;;  %v2856_v62 = vld [vmem:[%s4823_s1 + $0xe8] ss:$28 sps:$4 sm:$0xff]  }
  0x15   :  { %1324 = vmatpush1.bf16.msra.mxu1 %v2796_v19  ;;  %1272 = vmatprep.subr.bf16.mxu0 %v2797_v20  ;;  %v2854_v60 = vld [vmem:[%s4823_s1 + $0x1fc] ss:$28 sps:$4 sm:$0xff]   ;;  %v2858_v61 = vld [vmem:[%s4823_s1 + $0xec] ss:$28 sps:$4 sm:$0xff]   ;;  %v2860_v0 = vld [vmem:[%s4823_s1 + $0x1c4] ss:$28 sps:$4 sm:$0xff]  }
  0x16   :  { %1325 = vmatprep.subr.bf16.mxu1 %v2799_v21  ;;  %v2859_v63 = vld [vmem:[%s4823_s1 + $0x1f8] ss:$28 sps:$4 sm:$0xff]   ;;  %v2862_v2 = vld [vmem:[%s4823_s1 + $0xb0] ss:$28 sps:$4 sm:$0xff]   ;;  %v2865_v3 = vld [vmem:[%s4823_s1 + $0x1c0] ss:$28 sps:$4 sm:$0xff]  }
  0x17   :  { %v2864_v1 = vld [vmem:[%s4823_s1 + $0xb4] ss:$28 sps:$4 sm:$0xff]   ;;  %v2871_v4 = vld [vmem:[%s4823_s1 + $0x7c] ss:$28 sps:$4 sm:$0xff]   ;;  %v2877_v9 = vld [vmem:[%s4823_s1 + $0x44] ss:$28 sps:$4 sm:$0xff]  }
  0x18   :  { %1273 = vmatpush1.bf16.msra.mxu0 %v2801_v22  ;;  %v2874_v5 = vld [vmem:[%s4823_s1 + $0x514] ss:$28 sps:$4 sm:$0xff]   ;;  %v2880_v10 = vld [vmem:[%s4823_s1 + $0x4dc] ss:$28 sps:$4 sm:$0xff]   ;;  %v2883_v13 = vld [vmem:[%s4823_s1 + $0xc] ss:$28 sps:$4 sm:$0xff]  }
  0x19   :  { %1326 = vmatpush1.bf16.msra.mxu1 %v2802_v23  ;;  %1274 = vmatprep.subr.bf16.mxu0 %v2803_v24  ;;  %v3368_v6 = vld [vmem:[%s4824_s0] ss:$16 sps:$4 sm:$0xff]   ;;  %v2869_v7 = vld [vmem:[%s4823_s1 + $0x78] ss:$28 sps:$4 sm:$0xff]   ;;  %v3403_v16 = vld [vmem:[%s4824_s0 + $0x2c] ss:$16 sps:$4 sm:$0xff]  }
  0x1a   :  { %1327 = vmatprep.subr.bf16.mxu1 %v2805_v25  ;;  %v2872_v8 = vld [vmem:[%s4823_s1 + $0x510] ss:$28 sps:$4 sm:$0xff]   ;;  %v2875_v11 = vld [vmem:[%s4823_s1 + $0x40] ss:$28 sps:$4 sm:$0xff]   ;;  %v2878_v12 = vld [vmem:[%s4823_s1 + $0x4d8] ss:$28 sps:$4 sm:$0xff]  }
  0x1b   :  { %v3395_v14 = vld [vmem:[%s4824_s0 + $0x24] ss:$16 sps:$4 sm:$0xff]   ;;  %v3408_v17 = vld [vmem:[%s4824_s0 + $0x28] ss:$16 sps:$4 sm:$0xff]   ;;  %v2884_v19 = vld [vmem:[%s4823_s1 + $0x4a0] ss:$28 sps:$4 sm:$0xff]  }
  0x1c   :  { %1275 = vmatpush1.bf16.msra.mxu0 %v2807_v26  ;;  %v2886_v15 = vld [vmem:[%s4823_s1 + $0x4a4] ss:$28 sps:$4 sm:$0xff]   ;;  %v2889_v21 = vld [vmem:[%s4823_s1 + $0x354] ss:$28 sps:$4 sm:$0xff]   ;;  %v2892_v22 = vld [vmem:[%s4823_s1 + $0x46c] ss:$28 sps:$4 sm:$0xff]  }
  0x1d   :  { %1328 = vmatpush1.bf16.msra.mxu1 %v2808_v27  ;;  %1276 = vmatprep.subr.bf16.mxu0 %v2809_v28  ;;  %v2881_v18 = vld [vmem:[%s4823_s1 + $0x8] ss:$28 sps:$4 sm:$0xff]   ;;  %v3422_v20 = vld [vmem:[%s4824_s0 + $0x20] ss:$16 sps:$4 sm:$0xff]   ;;  %v2895_v25 = vld [vmem:[%s4823_s1 + $0x31c] ss:$28 sps:$4 sm:$0xff]  }
  0x1e   :  { %1329 = vmatprep.subr.bf16.mxu1 %v2811_v29  ;;  %v2887_v23 = vld [vmem:[%s4823_s1 + $0x350] ss:$28 sps:$4 sm:$0xff]   ;;  %v2890_v24 = vld [vmem:[%s4823_s1 + $0x468] ss:$28 sps:$4 sm:$0xff]   ;;  %v2893_v27 = vld [vmem:[%s4823_s1 + $0x318] ss:$28 sps:$4 sm:$0xff]  }
  0x1f   :  { %v2898_v26 = vld [vmem:[%s4823_s1 + $0x434] ss:$28 sps:$4 sm:$0xff]   ;;  %v2901_v29 = vld [vmem:[%s4823_s1 + $0x2e4] ss:$28 sps:$4 sm:$0xff]  }
  0x20   :  { %1277 = vmatpush1.bf16.msra.mxu0 %v2813_v30  ;;  %v2896_v28 = vld [vmem:[%s4823_s1 + $0x430] ss:$28 sps:$4 sm:$0xff]   ;;  %v2904_v30 = vld [vmem:[%s4823_s1 + $0x3fc] ss:$28 sps:$4 sm:$0xff]  }
  0x21   :  { %1330 = vmatpush1.bf16.msra.mxu1 %v2814_v31  ;;  %1278 = vmatprep.subr.bf16.mxu0 %v2815_v32  ;;  %v2899_v31 = vld [vmem:[%s4823_s1 + $0x2e0] ss:$28 sps:$4 sm:$0xff]   ;;  %v2902_v32 = vld [vmem:[%s4823_s1 + $0x3f8] ss:$28 sps:$4 sm:$0xff]  }
  0x22   :  { %1341 = vmatprep.subr.bf16.mxu1 %v2817_v33  ;;  %v2907_v33 = vld [vmem:[%s4823_s1 + $0x2ac] ss:$28 sps:$4 sm:$0xff]  }
  0x24   :  { %1279 = vmatpush2.bf16.msra.mxu0 %v2819_v35  ;;  %v2910_v35 = vld [vmem:[%s4823_s1 + $0x3c4] ss:$28 sps:$4 sm:$0xff]  }
  0x25   :  { %1342 = vmatpush2.bf16.msra.mxu1 %v2820_v36  ;;  %1280 = vmatprep.subr.bf16.mxu0 %v2821_v37  ;;  %v2905_v36 = vld [vmem:[%s4823_s1 + $0x2a8] ss:$28 sps:$4 sm:$0xff]   ;;  %v2908_v37 = vld [vmem:[%s4823_s1 + $0x3c0] ss:$28 sps:$4 sm:$0xff]  }
  0x26   :  { %1343 = vmatprep.subr.bf16.mxu1 %v2823_v38  ;;  %v2913_v38 = vld [vmem:[%s4823_s1 + $0x274] ss:$28 sps:$4 sm:$0xff]  }
  0x28   :  { %1281 = vmatpush2.bf16.msra.mxu0 %v2825_v39  ;;  %v2916_v39 = vld [vmem:[%s4823_s1 + $0x38c] ss:$28 sps:$4 sm:$0xff]  }
  0x29   :  { %1344 = vmatpush2.bf16.msra.mxu1 %v2826_v40  ;;  %1282 = vmatprep.subr.bf16.mxu0 %v2827_v41  ;;  %v2911_v40 = vld [vmem:[%s4823_s1 + $0x270] ss:$28 sps:$4 sm:$0xff]   ;;  %v2914_v41 = vld [vmem:[%s4823_s1 + $0x388] ss:$28 sps:$4 sm:$0xff]  }
  0x2a   :  { %1345 = vmatprep.subr.bf16.mxu1 %v2829_v42  ;;  %v2925_v42 = vld [vmem:[%s4823_s1 + $0x23c] ss:$28 sps:$4 sm:$0xff]  }
  0x2c   :  { %1283 = vmatpush2.bf16.msra.mxu0 %v2831_v43  ;;  %v2928_v43 = vld [vmem:[%s4823_s1 + $0x5bc] ss:$28 sps:$4 sm:$0xff]  }
  0x2d   :  { %1346 = vmatpush2.bf16.msra.mxu1 %v2832_v44  ;;  %1284 = vmatprep.subr.bf16.mxu0 %v2833_v45  ;;  %v2923_v44 = vld [vmem:[%s4823_s1 + $0x238] ss:$28 sps:$4 sm:$0xff]  }
  0x2e   :  { %1368 = vmatprep.subr.bf16.mxu1 %v2839_v46  ;;  %v2926_v45 = vld [vmem:[%s4823_s1 + $0x5b8] ss:$28 sps:$4 sm:$0xff]   ;;  %v2931_v46 = vld [vmem:[%s4823_s1 + $0x204] ss:$28 sps:$4 sm:$0xff]  }
  0x30   :  { %1348 = vmatmul.mubr.bf16.vlgmr.msra.gmra.mxu1 %v3300_v49  ;;  %1285 = vmatpush2.bf16.msra.mxu0 %v2840_v48  ;;  %v2929_v48 = vld [vmem:[%s4823_s1 + $0x200] ss:$28 sps:$4 sm:$0xff]  }
  0x31   :  { %1369 = vmatpush1.bf16.msra.mxu1 %v2837_v47  ;;  %1286 = vmatprep.subr.bf16.mxu0 %v2842_v50  ;;  %v2934_v47 = vld [vmem:[%s4823_s1 + $0x584] ss:$28 sps:$4 sm:$0xff]  }
  0x32   :  { %1370 = vmatprep.subr.bf16.mxu1 %v2846_v52  ;;  %2728 = vmatprep.mubr.msk.bf16.mxu1 %vm1255_vm0, %v3403_v16  ;;  %v2932_v50 = vld [vmem:[%s4823_s1 + $0x580] ss:$28 sps:$4 sm:$0xff]   ;;  %v2937_v52 = vld [vmem:[%s4823_s1 + $0x1cc] ss:$28 sps:$4 sm:$0xff]  }
  0x34   :  { %1287 = vmatpush2.bf16.msra.mxu0 %v2847_v54  ;;  %v2935_v54 = vld [vmem:[%s4823_s1 + $0x1c8] ss:$28 sps:$4 sm:$0xff]  }
  0x35   :  { %1371 = vmatpush1.bf16.msra.mxu1 %v2844_v53  ;;  %1288 = vmatprep.subr.bf16.mxu0 %v2848_v56  ;;  %v2940_v53 = vld [vmem:[%s4823_s1 + $0x54c] ss:$28 sps:$4 sm:$0xff]  }
  0x36   :  { %1372 = vmatprep.subr.bf16.mxu1 %v2852_v57  ;;  %v2938_v56 = vld [vmem:[%s4823_s1 + $0x548] ss:$28 sps:$4 sm:$0xff]   ;;  %v2943_v57 = vld [vmem:[%s4823_s1 + $0x19c] ss:$28 sps:$4 sm:$0xff]  }
  0x38   :  { %1289 = vmatpush2.bf16.msra.mxu0 %v2853_v59  ;;  %1358 = vmatmul.mubr.bf16.gmra.mxu1 %v3408_v17  ;;  %v2941_v59 = vld [vmem:[%s4823_s1 + $0x198] ss:$28 sps:$4 sm:$0xff]  }
  0x39   :  { %1373 = vmatpush1.bf16.msra.mxu1 %v2850_v58  ;;  %1290 = vmatprep.subr.bf16.mxu0 %v2854_v60  ;;  %v2961_v58 = vld [vmem:[%s4823_s1 + $0x51c] ss:$28 sps:$4 sm:$0xff]   ;;  %v2946_v60 = vld [vmem:[%s4823_s1 + $0x164] ss:$28 sps:$4 sm:$0xff]  }
  0x3a   :  { %1374 = vmatprep.subr.bf16.mxu1 %v2858_v61  ;;  %1400 = vmatprep.mubr.bf16.mxu1 %v3308_v51  ;;  %v2959_v61 = vld [vmem:[%s4823_s1 + $0x518] ss:$28 sps:$4 sm:$0xff]  }
  0x3c   :  { %1291 = vmatpush2.bf16.msra.mxu0 %v2859_v63  ;;  %v2944_v63 = vld [vmem:[%s4823_s1 + $0x160] ss:$28 sps:$4 sm:$0xff]  }
  0x3d   :  { %1375 = vmatpush1.bf16.msra.mxu1 %v2856_v62  ;;  %1292 = vmatprep.subr.bf16.mxu0 %v2860_v0  ;;  %v2967_v62 = vld [vmem:[%s4823_s1 + $0x4e4] ss:$28 sps:$4 sm:$0xff]   ;;  %v2949_v0 = vld [vmem:[%s4823_s1 + $0x12c] ss:$28 sps:$4 sm:$0xff]  }
  0x3e   :  { %1376 = vmatprep.subr.bf16.mxu1 %v2864_v1  ;;  %v2965_v1 = vld [vmem:[%s4823_s1 + $0x4e0] ss:$28 sps:$4 sm:$0xff]  }
  0x40   :  { %1293 = vmatpush2.bf16.msra.mxu0 %v2865_v3  ;;  %v2973_v3 = vld [vmem:[%s4823_s1 + $0x4ac] ss:$28 sps:$4 sm:$0xff]  }
  0x41   :  { %1377 = vmatpush1.bf16.msra.mxu1 %v2862_v2  ;;  %1421 = vmatprep.subr.bf16.mxu0 %v2874_v5  ;;  %v2947_v2 = vld [vmem:[%s4823_s1 + $0x128] ss:$28 sps:$4 sm:$0xff]  }
  0x42   :  { %1378 = vmatprep.subr.bf16.mxu1 %v2871_v4  ;;  %v2952_v4 = vld [vmem:[%s4823_s1 + $0xf4] ss:$28 sps:$4 sm:$0xff]   ;;  %v2971_v5 = vld [vmem:[%s4823_s1 + $0x4a8] ss:$28 sps:$4 sm:$0xff]  }
  0x43   :  { %1295 = vmatmul.mubr.bf16.vlgmr.msra.gmra.mxu0 %v3368_v6 }
  0x44   :  { %1422 = vmatpush1.bf16.msra.mxu0 %v2872_v8  ;;  %1304 = vmatprep.mubr.bf16.mxu0 %v3395_v14  ;;  %v2950_v8 = vld [vmem:[%s4823_s1 + $0xf0] ss:$28 sps:$4 sm:$0xff]  }
  0x45   :  { %1379 = vmatpush1.bf16.msra.mxu1 %v2869_v7  ;;  %1423 = vmatprep.subr.bf16.mxu0 %v2880_v10  ;;  %v2979_v7 = vld [vmem:[%s4823_s1 + $0x474] ss:$28 sps:$4 sm:$0xff]  }
  0x46   :  { %1380 = vmatprep.subr.bf16.mxu1 %v2877_v9  ;;  %v2955_v9 = vld [vmem:[%s4823_s1 + $0xbc] ss:$28 sps:$4 sm:$0xff]   ;;  %v2977_v10 = vld [vmem:[%s4823_s1 + $0x470] ss:$28 sps:$4 sm:$0xff]  }
  0x48   :  { %1424 = vmatpush1.bf16.msra.mxu0 %v2878_v12  ;;  %v2953_v12 = vld [vmem:[%s4823_s1 + $0xb8] ss:$28 sps:$4 sm:$0xff]  }
  0x49   :  { %1381 = vmatpush1.bf16.msra.mxu1 %v2875_v11  ;;  %1425 = vmatprep.subr.bf16.mxu0 %v2886_v15  ;;  %v2985_v11 = vld [vmem:[%s4823_s1 + $0x43c] ss:$28 sps:$4 sm:$0xff]   ;;  %v2991_v15 = vld [vmem:[%s4823_s1 + $0x404] ss:$28 sps:$4 sm:$0xff]  }
  0x4a   :  { %1382 = vmatprep.subr.bf16.mxu1 %v2883_v13  ;;  %v2958_v13 = vld [vmem:[%s4823_s1 + $0x84] ss:$28 sps:$4 sm:$0xff]  }
  0x4b   :  { %1305 = vmatmul.mubr.bf16.gmra.mxu0 %v3422_v20 }
  0x4c   :  { %1426 = vmatpush1.bf16.msra.mxu0 %v2884_v19  ;;  %2729 = vmatprep.mubr.msk.bf16.mxu0 %vm1255_vm0, %v3251_v34  ;;  %v2964_v19 = vld [vmem:[%s4823_s1 + $0x4c] ss:$28 sps:$4 sm:$0xff]  }
  0x4d   :  { %1383 = vmatpush1.bf16.msra.mxu1 %v2881_v18  ;;  %1427 = vmatprep.subr.bf16.mxu0 %v2892_v22  ;;  %v2956_v18 = vld [vmem:[%s4823_s1 + $0x80] ss:$28 sps:$4 sm:$0xff]   ;;  %v2997_v22 = vld [vmem:[%s4823_s1 + $0x3cc] ss:$28 sps:$4 sm:$0xff]  }
  0x4e   :  { %1384 = vmatprep.subr.bf16.mxu1 %v2889_v21  ;;  %v2989_v21 = vld [vmem:[%s4823_s1 + $0x400] ss:$28 sps:$4 sm:$0xff]  }
  0x50   :  { %1428 = vmatpush1.bf16.msra.mxu0 %v2890_v24  ;;  %v2970_v24 = vld [vmem:[%s4823_s1 + $0x14] ss:$28 sps:$4 sm:$0xff]  }
  0x51   :  { %1385 = vmatpush2.bf16.msra.mxu1 %v2887_v23  ;;  %1429 = vmatprep.subr.bf16.mxu0 %v2898_v26  ;;  %v2962_v23 = vld [vmem:[%s4823_s1 + $0x48] ss:$28 sps:$4 sm:$0xff]   ;;  %v3003_v26 = vld [vmem:[%s4823_s1 + $0x394] ss:$28 sps:$4 sm:$0xff]  }
  0x52   :  { %1386 = vmatprep.subr.bf16.mxu1 %v2895_v25  ;;  %v2995_v25 = vld [vmem:[%s4823_s1 + $0x3c8] ss:$28 sps:$4 sm:$0xff]  }
  0x54   :  { %1430 = vmatpush1.bf16.msra.mxu0 %v2896_v28  ;;  %v2976_v28 = vld [vmem:[%s4823_s1 + $0x35c] ss:$28 sps:$4 sm:$0xff]  }
  0x55   :  { %1387 = vmatpush2.bf16.msra.mxu1 %v2893_v27  ;;  %1431 = vmatprep.subr.bf16.mxu0 %v2904_v30  ;;  %v2968_v27 = vld [vmem:[%s4823_s1 + $0x10] ss:$28 sps:$4 sm:$0xff]   ;;  %v3009_v30 = vld [vmem:[%s4823_s1 + $0x5c4] ss:$28 sps:$4 sm:$0xff]  }
  0x56   :  { %1388 = vmatprep.subr.bf16.mxu1 %v2901_v29  ;;  %v3001_v29 = vld [vmem:[%s4823_s1 + $0x390] ss:$28 sps:$4 sm:$0xff]  }
  0x58   :  { %1432 = vmatpush1.bf16.msra.mxu0 %v2902_v32  ;;  %v2982_v32 = vld [vmem:[%s4823_s1 + $0x324] ss:$28 sps:$4 sm:$0xff]  }
  0x59   :  { %1389 = vmatpush2.bf16.msra.mxu1 %v2899_v31  ;;  %1433 = vmatprep.subr.bf16.mxu0 %v2910_v35  ;;  %v2974_v31 = vld [vmem:[%s4823_s1 + $0x358] ss:$28 sps:$4 sm:$0xff]   ;;  %v3015_v35 = vld [vmem:[%s4823_s1 + $0x58c] ss:$28 sps:$4 sm:$0xff]  }
  0x5a   :  { %1390 = vmatprep.subr.bf16.mxu1 %v2907_v33  ;;  %v3007_v33 = vld [vmem:[%s4823_s1 + $0x5c0] ss:$28 sps:$4 sm:$0xff]  }
  0x5c   :  { %1434 = vmatpush1.bf16.msra.mxu0 %v2908_v37  ;;  %v2988_v37 = vld [vmem:[%s4823_s1 + $0x2ec] ss:$28 sps:$4 sm:$0xff]  }
  0x5d   :  { %1391 = vmatpush2.bf16.msra.mxu1 %v2905_v36  ;;  %1435 = vmatprep.subr.bf16.mxu0 %v2916_v39  ;;  %v2980_v36 = vld [vmem:[%s4823_s1 + $0x320] ss:$28 sps:$4 sm:$0xff]   ;;  %v3021_v39 = vld [vmem:[%s4823_s1 + $0x554] ss:$28 sps:$4 sm:$0xff]  }
  0x5e   :  { %1392 = vmatprep.subr.bf16.mxu1 %v2913_v38  ;;  %v3013_v38 = vld [vmem:[%s4823_s1 + $0x588] ss:$28 sps:$4 sm:$0xff]  }
  0x60   :  { %1436 = vmatpush1.bf16.msra.mxu0 %v2914_v41  ;;  %v2994_v41 = vld [vmem:[%s4823_s1 + $0x2b4] ss:$28 sps:$4 sm:$0xff]  }
  0x61   :  { %1393 = vmatpush2.bf16.msra.mxu1 %v2911_v40  ;;  %1447 = vmatprep.subr.bf16.mxu0 %v2928_v43  ;;  %v2986_v40 = vld [vmem:[%s4823_s1 + $0x2e8] ss:$28 sps:$4 sm:$0xff]   ;;  %v3023_v43 = vld [vmem:[%s4823_s1 + $0x360] ss:$28 sps:$4 sm:$0xff]  }
  0x62   :  { %1394 = vmatprep.subr.bf16.mxu1 %v2925_v42  ;;  %v3019_v42 = vld [vmem:[%s4823_s1 + $0x550] ss:$28 sps:$4 sm:$0xff]  }
  0x64   :  { %1448 = vmatpush2.bf16.msra.mxu0 %v2926_v45  ;;  %v3000_v45 = vld [vmem:[%s4823_s1 + $0x27c] ss:$28 sps:$4 sm:$0xff]  }
  0x65   :  { %1395 = vmatpush2.bf16.msra.mxu1 %v2923_v44  ;;  %1449 = vmatprep.subr.bf16.mxu0 %v2934_v47  ;;  %v2992_v44 = vld [vmem:[%s4823_s1 + $0x2b0] ss:$28 sps:$4 sm:$0xff]   ;;  %v3026_v47 = vld [vmem:[%s4823_s1 + $0x328] ss:$28 sps:$4 sm:$0xff]  }
  0x66   :  { %1396 = vmatprep.subr.bf16.mxu1 %v2931_v46  ;;  %v3024_v46 = vld [vmem:[%s4823_s1 + $0x1a0] ss:$28 sps:$4 sm:$0xff]  }
  0x68   :  { %1450 = vmatpush2.bf16.msra.mxu0 %v2932_v50  ;;  %v3006_v50 = vld [vmem:[%s4823_s1 + $0x244] ss:$28 sps:$4 sm:$0xff]  }
  0x69   :  { %1397 = vmatpush2.bf16.msra.mxu1 %v2929_v48  ;;  %1451 = vmatprep.subr.bf16.mxu0 %v2940_v53  ;;  %v2998_v48 = vld [vmem:[%s4823_s1 + $0x278] ss:$28 sps:$4 sm:$0xff]   ;;  %v3029_v53 = vld [vmem:[%s4823_s1 + $0x2f0] ss:$28 sps:$4 sm:$0xff]  }
  0x6a   :  { %1398 = vmatprep.subr.bf16.mxu1 %v2937_v52  ;;  %v3027_v52 = vld [vmem:[%s4823_s1 + $0x168] ss:$28 sps:$4 sm:$0xff]  }
  0x6c   :  { %1452 = vmatpush2.bf16.msra.mxu0 %v2938_v56  ;;  %v3012_v56 = vld [vmem:[%s4823_s1 + $0x20c] ss:$28 sps:$4 sm:$0xff]  }
  0x6d   :  { %1399 = vmatpush2.bf16.msra.mxu1 %v2935_v54  ;;  %1474 = vmatprep.subr.bf16.mxu0 %v2943_v57  ;;  %v3004_v54 = vld [vmem:[%s4823_s1 + $0x240] ss:$28 sps:$4 sm:$0xff]   ;;  %v3030_v57 = vld [vmem:[%s4823_s1 + $0x130] ss:$28 sps:$4 sm:$0xff]  }
  0x6e   :  { %1527 = vmatprep.subr.bf16.mxu1 %v2961_v58  ;;  %v3032_v58 = vld [vmem:[%s4823_s1 + $0x2b8] ss:$28 sps:$4 sm:$0xff]  }
  0x6f   :  { %1454 = vmatmul.mubr.bf16.vlgmr.msra.gmra.mxu0 %v3300_v49 }
  0x70   :  { %1401 = vmatmul.mubr.bf16.vlgmr.msra.gmra.mxu1 %v3368_v6  ;;  %1475 = vmatpush1.bf16.msra.mxu0 %v2941_v59  ;;  %v3010_v59 = vld [vmem:[%s4823_s1 + $0x208] ss:$28 sps:$4 sm:$0xff]  }
  0x71   :  { %1410 = vmatprep.mubr.bf16.mxu1 %v3395_v14  ;;  %1476 = vmatprep.subr.bf16.mxu0 %v2946_v60  ;;  %v3018_v60 = vld [vmem:[%s4823_s1 + $0x1d4] ss:$28 sps:$4 sm:$0xff]  }
  0x72   :  { %2730 = vmatprep.mubr.msk.bf16.mxu0 %vm1255_vm0, %v3403_v16  ;;  %1528 = vmatpush1.bf16.msra.mxu1 %v2959_v61  ;;  %v3033_v61 = vld [vmem:[%s4823_s1 + $0xf8] ss:$28 sps:$4 sm:$0xff]  }
  0x73   :  { %1529 = vmatprep.subr.bf16.mxu1 %v2967_v62  ;;  %v3035_v62 = vld [vmem:[%s4823_s1 + $0x280] ss:$28 sps:$4 sm:$0xff]  }
  0x74   :  { %1477 = vmatpush1.bf16.msra.mxu0 %v2944_v63  ;;  %v3016_v63 = vld [vmem:[%s4823_s1 + $0x1d0] ss:$28 sps:$4 sm:$0xff]  }
  0x75   :  { %1478 = vmatprep.subr.bf16.mxu0 %v2949_v0  ;;  %v3036_v0 = vld [vmem:[%s4823_s1 + $0xc0] ss:$28 sps:$4 sm:$0xff]  }
  0x76   :  { %1530 = vmatpush1.bf16.msra.mxu1 %v2965_v1  ;;  %v3022_v1 = vld [vmem:[%s4823_s1 + $0x520] ss:$28 sps:$4 sm:$0xff]  }
  0x77   :  { %1464 = vmatmul.mubr.bf16.gmra.mxu0 %v3408_v17  ;;  %1531 = vmatprep.subr.bf16.mxu1 %v2973_v3  ;;  %v3041_v3 = vld [vmem:[%s4823_s1 + $0x210] ss:$28 sps:$4 sm:$0xff]  }
  0x78   :  { %1411 = vmatmul.mubr.bf16.gmra.mxu1 %v3422_v20  ;;  %1479 = vmatpush1.bf16.msra.mxu0 %v2947_v2  ;;  %v3039_v2 = vld [vmem:[%s4823_s1 + $0x88] ss:$28 sps:$4 sm:$0xff]  }
  0x79   :  { %1480 = vmatprep.subr.bf16.mxu0 %v2952_v4  ;;  %1506 = vmatprep.mubr.bf16.mxu0 %v3308_v51  ;;  %v3025_v4 = vld [vmem:[%s4823_s1 + $0x4e8] ss:$28 sps:$4 sm:$0xff]  }
  0x7a   :  { %1532 = vmatpush1.bf16.msra.mxu1 %v2971_v5  ;;  %2731 = vmatprep.mubr.msk.bf16.mxu1 %vm1255_vm0, %v3251_v34  ;;  %v2983_v34 = vld [vmem:[%s4823_s1 + $0x438] ss:$28 sps:$4 sm:$0xff]   ;;  %v3042_v5 = vld [vmem:[%s4823_s1 + $0x50] ss:$28 sps:$4 sm:$0xff]  }
  0x7b   :  { %1533 = vmatprep.subr.bf16.mxu1 %v2979_v7  ;;  %v3044_v7 = vld [vmem:[%s4823_s1 + $0x1d8] ss:$28 sps:$4 sm:$0xff]  }
  0x7c   :  { %1481 = vmatpush1.bf16.msra.mxu0 %v2950_v8  ;;  %v3028_v8 = vld [vmem:[%s4823_s1 + $0x4b0] ss:$28 sps:$4 sm:$0xff]  }
  0x7d   :  { %1482 = vmatprep.subr.bf16.mxu0 %v2955_v9  ;;  %v3045_v9 = vld [vmem:[%s4823_s1 + $0x18] ss:$28 sps:$4 sm:$0xff]  }
  0x7e   :  { %1534 = vmatpush1.bf16.msra.mxu1 %v2977_v10  ;;  %v3031_v10 = vld [vmem:[%s4823_s1 + $0x478] ss:$28 sps:$4 sm:$0xff]  }
  0x7f   :  { %1535 = vmatprep.subr.bf16.mxu1 %v2985_v11  ;;  %v3113_v11 = vld [vmem:[%s4824_s0 + $0xc] ss:$16 sps:$4 sm:$0xff]  }
  0x80   :  { %1483 = vmatpush1.bf16.msra.mxu0 %v2953_v12  ;;  %v3034_v12 = vld [vmem:[%s4823_s1 + $0x440] ss:$28 sps:$4 sm:$0xff]  }
  0x81   :  { %1484 = vmatprep.subr.bf16.mxu0 %v2958_v13  ;;  %v3037_v13 = vld [vmem:[%s4823_s1 + $0x408] ss:$28 sps:$4 sm:$0xff]  }
  0x82   :  { %1536 = vmatpush1.bf16.msra.mxu1 %v2983_v34  ;;  %v3040_v34 = vld [vmem:[%s4823_s1 + $0x3d0] ss:$28 sps:$4 sm:$0xff]  }
  0x83   :  { %1537 = vmatprep.subr.bf16.mxu1 %v2991_v15  ;;  %v3047_v15 = vld [vmem:[%s4823_s1 + $0x590] ss:$28 sps:$4 sm:$0xff]  }
  0x84   :  { %1485 = vmatpush1.bf16.msra.mxu0 %v2956_v18 }
  0x85   :  { %1486 = vmatprep.subr.bf16.mxu0 %v2964_v19 }
  0x86   :  { %1538 = vmatpush1.bf16.msra.mxu1 %v2989_v21 }
  0x87   :  { %1539 = vmatprep.subr.bf16.mxu1 %v2997_v22 }
  0x88   :  { %1487 = vmatpush1.bf16.msra.mxu0 %v2962_v23 }
  0x89   :  { %1488 = vmatprep.subr.bf16.mxu0 %v2970_v24 }
  0x8a   :  { %1540 = vmatpush1.bf16.msra.mxu1 %v2995_v25 }
  0x8b   :  { %1541 = vmatprep.subr.bf16.mxu1 %v3003_v26 }
  0x8c   :  { %1489 = vmatpush1.bf16.msra.mxu0 %v2968_v27 }
  0x8d   :  { %1490 = vmatprep.subr.bf16.mxu0 %v2976_v28 }
  0x8e   :  { %1542 = vmatpush1.bf16.msra.mxu1 %v3001_v29 }
  0x8f   :  { %1553 = vmatprep.subr.bf16.mxu1 %v3009_v30 }
  0x90   :  { %1491 = vmatpush2.bf16.msra.mxu0 %v2974_v31 }
  0x91   :  { %1492 = vmatprep.subr.bf16.mxu0 %v2982_v32 }
  0x92   :  { %1554 = vmatpush2.bf16.msra.mxu1 %v3007_v33 }
  0x93   :  { %1555 = vmatprep.subr.bf16.mxu1 %v3015_v35 }
  0x94   :  { %1493 = vmatpush2.bf16.msra.mxu0 %v2980_v36 }
  0x95   :  { %1494 = vmatprep.subr.bf16.mxu0 %v2988_v37 }
  0x96   :  { %1556 = vmatpush2.bf16.msra.mxu1 %v3013_v38 }
  0x97   :  { %1557 = vmatprep.subr.bf16.mxu1 %v3021_v39 }
  0x98   :  { %1495 = vmatpush2.bf16.msra.mxu0 %v2986_v40 }
  0x99   :  { %1496 = vmatprep.subr.bf16.mxu0 %v2994_v41 }
  0x9a   :  { %1558 = vmatpush2.bf16.msra.mxu1 %v3019_v42 }
  0x9b   :  { %2735 = vmatprep.subr.bf16.mxu1 %v3023_v43 }
  0x9c   :  { %1497 = vmatpush2.bf16.msra.mxu0 %v2992_v44 }
  0x9d   :  { %1498 = vmatprep.subr.bf16.mxu0 %v3000_v45  ;;  %1560 = vmatmul.mubr.bf16.vlgmr.msra.gmra.mxu1 %v3300_v49 }
  0x9e   :  { %2736 = vmatpush3.bf16.msra.mxu1 %v3024_v46  ;;  %2732 = vmatprep.mubr.msk.bf16.mxu1 %vm1255_vm0, %v3403_v16 }
  0x9f   :  { %2737 = vmatprep.subr.bf16.mxu1 %v3026_v47 }
  0xa0   :  { %1499 = vmatpush2.bf16.msra.mxu0 %v2998_v48 }
  0xa1   :  { %1500 = vmatprep.subr.bf16.mxu0 %v3006_v50 }
  0xa2   :  { %2738 = vmatpush3.bf16.msra.mxu1 %v3027_v52 }
  0xa3   :  { %2739 = vmatprep.subr.bf16.mxu1 %v3029_v53 }
  0xa4   :  { %1501 = vmatpush2.bf16.msra.mxu0 %v3004_v54 }
  0xa5   :  { %1502 = vmatprep.subr.bf16.mxu0 %v3012_v56  ;;  %1570 = vmatmul.mubr.bf16.gmra.mxu1 %v3408_v17 }
  0xa6   :  { %2740 = vmatpush3.bf16.msra.mxu1 %v3030_v57  ;;  %1612 = vmatprep.mubr.bf16.mxu1 %v3308_v51  ;;  %v3038_v51 = vld [vmem:[%s4823_s1 + $0x248] ss:$28 sps:$4 sm:$0xff]  }
  0xa7   :  { %2741 = vmatprep.subr.bf16.mxu1 %v3032_v58 }
  0xa8   :  { %1503 = vmatpush2.bf16.msra.mxu0 %v3010_v59 }
  0xa9   :  { %1504 = vmatprep.subr.bf16.mxu0 %v3018_v60 }
  0xaa   :  { %2742 = vmatpush3.bf16.msra.mxu1 %v3033_v61 }
  0xab   :  { %2743 = vmatprep.subr.bf16.mxu1 %v3035_v62 }
  0xac   :  { %1505 = vmatpush2.bf16.msra.mxu0 %v3016_v63 }
  0xad   :  { %1629 = vmatprep.subr.bf16.mxu0 %v3114_v55 }
  0xae   :  { %2744 = vmatpush3.bf16.msra.mxu1 %v3036_v0 }
  0xaf   :  { %1507 = vmatmul.mubr.bf16.vlgmr.msra.gmra.mxu0 %v3368_v6  ;;  %2745 = vmatprep.subr.bf16.mxu1 %v3038_v51 }
  0xb0   :  { %1630 = vmatpush1.bf16.msra.mxu0 %v3022_v1  ;;  %1516 = vmatprep.mubr.bf16.mxu0 %v3395_v14 }
  0xb1   :  { %1631 = vmatprep.subr.bf16.mxu0 %v3114_v55 }
  0xb2   :  { %2746 = vmatpush3.bf16.msra.mxu1 %v3039_v2 }
  0xb3   :  { %2747 = vmatprep.subr.bf16.mxu1 %v3041_v3 }
  0xb4   :  { %1632 = vmatpush1.bf16.msra.mxu0 %v3025_v4 }
  0xb5   :  { %1633 = vmatprep.subr.bf16.mxu0 %v3114_v55 }
  0xb6   :  { %2748 = vmatpush3.bf16.msra.mxu1 %v3042_v5 }
  0xb7   :  { %1517 = vmatmul.mubr.bf16.gmra.mxu0 %v3422_v20  ;;  %2749 = vmatprep.subr.bf16.mxu1 %v3044_v7 }
  0xb8   :  { %1634 = vmatpush1.bf16.msra.mxu0 %v3028_v8  ;;  %2733 = vmatprep.mubr.msk.bf16.mxu0 %vm1255_vm0, %v3113_v11 }
  0xb9   :  { %1635 = vmatprep.subr.bf16.mxu0 %v3114_v55 }
  0xba   :  { %2750 = vmatpush3.bf16.msra.mxu1 %v3045_v9 }
  0xbc   :  { %1636 = vmatpush1.bf16.msra.mxu0 %v3031_v10 }
  0xbd   :  { %1637 = vmatprep.subr.bf16.mxu0 %v3114_v55  ;;  %1613 = vmatmul.mubr.bf16.vlgmr.msra.gmra.mxu1 %v3368_v6  ;;  %v3043_v6 = vld [vmem:[%s4823_s1 + $0x398] ss:$28 sps:$4 sm:$0xff]  }
  0xbe   :  { %1620 = vmatprep.mubr.bf16.mxu1 %v3395_v14  ;;  %v3046_v14 = vld [vmem:[%s4823_s1 + $0x5c8] ss:$28 sps:$4 sm:$0xff]  }
  0xc0   :  { %1638 = vmatpush1.bf16.msra.mxu0 %v3034_v12 }
  0xc1   :  { %1639 = vmatprep.subr.bf16.mxu0 %v3114_v55 }
  0xc4   :  { %1640 = vmatpush1.bf16.msra.mxu0 %v3037_v13 }
  0xc5   :  { %1641 = vmatprep.subr.bf16.mxu0 %v3114_v55  ;;  %1621 = vmatmul.mubr.bf16.gmra.mxu1 %v3422_v20  ;;  %v3048_v20 = vld [vmem:[%s4823_s1 + $0x558] ss:$28 sps:$4 sm:$0xff]  }
  0xc8   :  { %1642 = vmatpush1.bf16.msra.mxu0 %v3040_v34 }
  0xc9   :  { %1643 = vmatprep.subr.bf16.mxu0 %v3114_v55 }
  0xcc   :  { %1644 = vmatpush1.bf16.msra.mxu0 %v3043_v6 }
  0xcd   :  { %1655 = vmatprep.subr.bf16.mxu0 %v3114_v55 }
  0xd0   :  { %1656 = vmatpush2.bf16.msra.mxu0 %v3046_v14 }
  0xd1   :  { %1657 = vmatprep.subr.bf16.mxu0 %v3114_v55 }
  0xd4   :  { %1658 = vmatpush2.bf16.msra.mxu0 %v3047_v15 }
  0xd5   :  { %1659 = vmatprep.subr.bf16.mxu0 %v3114_v55 }
  0xd8   :  { %1660 = vmatpush2.bf16.msra.mxu0 %v3048_v20 }
  0xdb   :  { %1662 = vmatmul.mubr.bf16.vlgmr.msra.gmra.mxu0 %v3300_v49 }
  0xdc   :  { %2734 = vmatprep.mubr.msk.bf16.mxu0 %vm1255_vm0, %v3403_v16 }
  0xe3   :  { %1670 = vmatmul.mubr.bf16.gmra.mxu0 %v3408_v17 }
  0xf0   :  { %v1349_v18 = vpop.f32.mrf.mxu1 }
  0xf2   :  { %v1351_v19 = vpop.f32.mrf.mxu1 }
  0xf4   :  { %v1353_v21 = vpop.f32.mrf.mxu1 }
  0xf6   :  { %v1355_v22 = vpop.f32.mrf.mxu1 }
  0xf8   :  { %v1359_v23 = vpop.f32.mrf.mxu1 }
  0xfa   :  { %v1361_v24 = vpop.f32.mrf.mxu1 }
  0xfc   :  { %v1363_v26 = vpop.f32.mrf.mxu1 }
  0xfe   :  { %v1365_v28 = vpop.f32.mrf.mxu1 }
 0x103   :  { %v1296_v25 = vpop.f32.mrf.mxu0 }
 0x104   :  { %v3830_v63 = vadd.f32 %v1349_v18, %v1296_v25 }
 0x105   :  { %v1298_v27 = vpop.f32.mrf.mxu0 }
 0x106   :  { %v3832_v0 = vadd.f32 %v1351_v19, %v1298_v27  ;;  %v1718_v5 = vmul.f32 %v3830_v63, %v3830_v63 }
 0x107   :  { %v1300_v29 = vpop.f32.mrf.mxu0 }
 0x108   :  { %v3836_v2 = vadd.f32 %v1353_v21, %v1300_v29  ;;  %v1719_v7 = vmul.f32 %v3832_v0, %v3832_v0  ;;  %v1686_v10 = vadd.f32 %v3832_v0, %v3830_v63 }
 0x109   :  { %v1302_v30 = vpop.f32.mrf.mxu0 }
 0x10a   :  { %v3834_v1 = vadd.f32 %v1355_v22, %v1302_v30  ;;  %v1725_v12 = vmul.f32 %v3836_v2, %v3836_v2  ;;  %v1746_v21 = vadd.f32 %v1719_v7, %v1718_v5 }
 0x10b   :  { %v1306_v49 = vpop.f32.mrf.mxu0 }
 0x10c   :  { %v1726_v11 = vmul.f32 %v3834_v1, %v3834_v1  ;;  %v3852_v13 = vadd.f32 %v1359_v23, %v1306_v49 }
 0x10d   :  { %v1308_v33 = vpop.f32.mrf.mxu0 }
 0x10e   :  { %v3854_v34 = vadd.f32 %v1361_v24, %v1308_v33  ;;  %v1694_v24 = vadd.f32 %v3834_v1, %v3836_v2  ;;  %v1754_v25 = vadd.f32 %v1726_v11, %v1725_v12 }
 0x10f   :  { %v1310_v35 = vpop.f32.mrf.mxu0 }
 0x110   :  { %v3856_v6 = vadd.f32 %v1363_v26, %v1310_v35  ;;  %v1702_v29 = vadd.f32 %v3854_v34, %v3852_v13 }
 0x111   :  { %v1312_v36 = vpop.f32.mrf.mxu0 }
 0x112   :  { %v3860_v15 = vadd.f32 %v1365_v28, %v1312_v36  ;;  %v1732_v28 = vmul.f32 %v3852_v13, %v3852_v13  ;;  %v1739_v30 = vmul.f32 %v3856_v6, %v3856_v6 }
 0x114   :  { %v1740_v49 = vmul.f32 %v3860_v15, %v3860_v15 }
 0x12f   :  { %v1455_v37 = vpop.f32.mrf.mxu0 }
 0x130   :  { %v1402_v55 = vpop.f32.mrf.mxu1 }
 0x131   :  { %v1457_v39 = vpop.f32.mrf.mxu0  ;;  %v3838_v4 = vadd.f32 %v1455_v37, %v1402_v55  ;;  %v1733_v55 = vmul.f32 %v3854_v34, %v3854_v34 }
 0x132   :  { %v1404_v31 = vpop.f32.mrf.mxu1 }
 0x133   :  { %v1459_v41 = vpop.f32.mrf.mxu0  ;;  %v1687_v20 = vadd.f32 %v1686_v10, %v3838_v4  ;;  %v1720_v18 = vmul.f32 %v3838_v4, %v3838_v4  ;;  %v3865_v19 = vadd.f32 %v1457_v39, %v1404_v31  ;;  %v1770_v10 = vadd.f32 %v1740_v49, %v1739_v30 }
 0x134   :  { %v1406_v32 = vpop.f32.mrf.mxu1 }
 0x135   :  { %v1461_v44 = vpop.f32.mrf.mxu0  ;;  %v3844_v8 = vadd.f32 %v1459_v41, %v1406_v32  ;;  %v1747_v32 = vadd.f32 %v1746_v21, %v1720_v18  ;;  %v1688_v33 = vadd.f32 %v1687_v20, %v3865_v19  ;;  %v1721_v35 = vmul.f32 %v3865_v19, %v3865_v19 }
 0x136   :  { %v1408_v16 = vpop.f32.mrf.mxu1 }
 0x137   :  { %v1465_v46 = vpop.f32.mrf.mxu0  ;;  %v1727_v22 = vmul.f32 %v3844_v8, %v3844_v8  ;;  %v3871_v26 = vadd.f32 %v1461_v44, %v1408_v16  ;;  %v1748_v20 = vadd.f32 %v1747_v32, %v1721_v35 }
 0x138   :  { %v1412_v17 = vpop.f32.mrf.mxu1 }
 0x139   :  { %v1467_v48 = vpop.f32.mrf.mxu0  ;;  %v3873_v27 = vadd.f32 %v1465_v46, %v1412_v17  ;;  %v1695_v17 = vadd.f32 %v1694_v24, %v3844_v8  ;;  %v1755_v36 = vadd.f32 %v1754_v25, %v1727_v22  ;;  %v1728_v44 = vmul.f32 %v3871_v26, %v3871_v26 }
 0x13a   :  { %v3808_v38 = vpop.f32.mrf.mxu1 }
 0x13b   :  { %v1469_v52 = vpop.f32.mrf.mxu0  ;;  %v1703_v46 = vadd.f32 %v1702_v29, %v3873_v27  ;;  %v1734_v5 = vmul.f32 %v3873_v27, %v3873_v27 }
 0x13c   :  { %v3810_v40 = vpop.f32.mrf.mxu1 }
 0x13d   :  { %v3820_v54 = vpop.f32.mrf.mxu0  ;;  %v3902_v7 = vadd.f32 %v1469_v52, %v3810_v40 }
 0x13e   :  { %v3812_v42 = vpop.f32.mrf.mxu1 }
 0x15d   :  { %v1561_v43 = vpop.f32.mrf.mxu1 }
 0x15f   :  { %v3814_v45 = vpop.f32.mrf.mxu1 }
 0x161   :  { %v1565_v47 = vpop.f32.mrf.mxu1 }
 0x163   :  { %v3816_v50 = vpop.f32.mrf.mxu1 }
 0x165   :  { %v3818_v53 = vpop.f32.mrf.mxu1 }
 0x167   :  { %v3822_v57 = vpop.f32.mrf.mxu1 }
 0x169   :  { %v3824_v59 = vpop.f32.mrf.mxu1 }
 0x16b   :  { %v3826_v61 = vpop.f32.mrf.mxu1 }
 0x16f   :  { %v1508_v56 = vpop.f32.mrf.mxu0 }
 0x170   :  { %v3886_v16 = vadd.f32 %v1561_v43, %v1508_v56  ;;  %v3899_v43 = vadd.f32 %v1467_v48, %v3808_v38  ;;  %v1762_v56 = vadd.f32 %v1733_v55, %v1732_v28  ;;  %v1696_v38 = vadd.f32 %v1695_v17, %v3871_v26 }
 0x171   :  { %v1510_v58 = vpop.f32.mrf.mxu0 }
 0x172   :  { %v1722_v11 = vmul.f32 %v3886_v16, %v3886_v16  ;;  %v1689_v12 = vadd.f32 %v1688_v33, %v3886_v16  ;;  %v1763_v18 = vadd.f32 %v1762_v56, %v1734_v5  ;;  %v1704_v21 = vadd.f32 %v1703_v46, %v3899_v43 }
 0x173   :  { %v1512_v60 = vpop.f32.mrf.mxu0  ;;  %v1735_v24 = vmul.f32 %v3899_v43, %v3899_v43 }
 0x174   :  { %v3891_v37 = vadd.f32 %v1565_v47, %v1512_v60  ;;  %v3905_v47 = vadd.f32 %v3814_v45, %v1510_v58  ;;  %v1710_v60 = vadd.f32 %v3860_v15, %v3856_v6  ;;  %v1756_v58 = vadd.f32 %v1755_v36, %v1728_v44 }
 0x175   :  { %v1514_v51 = vpop.f32.mrf.mxu0  ;;  %v1749_v49 = vadd.f32 %v1748_v20, %v1722_v11  ;;  %v1764_v46 = vadd.f32 %v1763_v18, %v1735_v24 }
 0x176   :  { %v1729_v48 = vmul.f32 %v3891_v37, %v3891_v37  ;;  %v3916_v40 = vadd.f32 %v3816_v50, %v1514_v51  ;;  %v1711_v25 = vadd.f32 %v1710_v60, %v3902_v7  ;;  %v1723_v28 = vmul.f32 %v3905_v47, %v3905_v47 }
 0x177   :  { %v1518_v9 = vpop.f32.mrf.mxu0  ;;  %v1690_v55 = vadd.f32 %v1689_v12, %v3905_v47  ;;  %v1697_v30 = vadd.f32 %v1696_v38, %v3891_v37 }
 0x178   :  { %v3926_v29 = vadd.f32 %v3818_v53, %v1518_v9  ;;  %v1730_v32 = vmul.f32 %v3916_v40, %v3916_v40  ;;  %v1757_v33 = vadd.f32 %v1756_v58, %v1729_v48 }
 0x179   :  { %v1520_v23 = vpop.f32.mrf.mxu0 }
 0x17a   :  { %v3941_v35 = vadd.f32 %v3822_v57, %v1520_v23  ;;  %v1750_v23 = vadd.f32 %v1749_v49, %v1723_v28  ;;  %v1758_v48 = vadd.f32 %v1757_v33, %v1730_v32 }
 0x17b   :  { %v1522_v39 = vpop.f32.mrf.mxu0 }
 0x17c   :  { %v3951_v5 = vadd.f32 %v3824_v59, %v1522_v39  ;;  %v1737_v59 = vmul.f32 %v3941_v35, %v3941_v35 }
 0x17d   :  { %v3828_v62 = vpop.f32.mrf.mxu1  ;;  %v1524_v45 = vpop.f32.mrf.mxu0 }
 0x17e   :  { %v1743_v24 = vmul.f32 %v3951_v5, %v3951_v5 }
 0x17f   :  { %v2752_v3 = vpop.f32.mrf.mxu1 }
 0x180   :  { %v2753_v22 = vadd.f32 %v2752_v3, %v3828_v62  ;;  %v1741_v62 = vmul.f32 %v3902_v7, %v3902_v7  ;;  %v3936_v3 = vadd.f32 %v3820_v54, %v3812_v42  ;;  %v1705_v42 = vadd.f32 %v1704_v21, %v3926_v29 }
 0x181   :  { %v3858_v14 = vpop.f32.mrf.mxu1  ;;  %v1736_v54 = vmul.f32 %v3926_v29, %v3926_v29 }
 0x182   :  { %v1712_v11 = vadd.f32 %v1711_v25, %v3936_v3  ;;  %v1742_v12 = vmul.f32 %v3936_v3, %v3936_v3  ;;  %v1706_v21 = vadd.f32 %v1705_v42, %v3941_v35 }
 0x183   :  { %v2755_v31 = vpop.f32.mrf.mxu1 }
 0x184   :  { %v2756_v17 = vadd.f32 %v2755_v31, %v3858_v14  ;;  %v1698_v14 = vadd.f32 %v1697_v30, %v3916_v40  ;;  %v1771_v31 = vadd.f32 %v1770_v10, %v1741_v62  ;;  %v3966_v10 = vadd.f32 %v3826_v61, %v1524_v45 }
 0x185   :  { %v2757_v41 = vpop.f32.mrf.mxu1 }
 0x186   :  { %v1744_v45 = vmul.f32 %v3966_v10, %v3966_v10 }
 0x187   :  { %v2758_v52 = vpop.f32.mrf.mxu1 }
 0x188   :  { %v2759_v57 = vadd.f32 %v2758_v52, %v2757_v41  ;;  %v1713_v52 = vadd.f32 %v1712_v11, %v3951_v5  ;;  %v2031_v11 = vld [vmem:[%s4825_s4 + $0x2e8] sm:$0xff] }
 0x189   :  { %v2760_v9 = vpop.f32.mrf.mxu1 }
 0x18a   :  { %v1714_v33 = vadd.f32 %v1713_v52, %v3966_v10  ;;  %v1962_v52 = vld [vmem:[%s4825_s4 + $0xc0] sm:$0xff] }
 0x18b   :  { %v2761_v38 = vpop.f32.mrf.mxu1 }
 0x18c   :  { %v2762_v28 = vadd.f32 %v2761_v38, %v2760_v9  ;;  %v1965_v38 = vld [vmem:[%s4825_s4 + $0xd8] sm:$0xff] }
 0x19b   :  { %v1663_v50 = vpop.f32.mrf.mxu0 }
 0x19c   :  { %v3928_v51 = vadd.f32 %v2753_v22, %v1663_v50  ;;  %v1765_v22 = vadd.f32 %v1764_v46, %v1736_v54 }
 0x19d   :  { %v1665_v53 = vpop.f32.mrf.mxu0 }
 0x19e   :  { %v1691_v36 = vadd.f32 %v1690_v55, %v3928_v51  ;;  %v1724_v44 = vmul.f32 %v3928_v51, %v3928_v51  ;;  %v1772_v55 = vadd.f32 %v1771_v31, %v1742_v12  ;;  %v1766_v32 = vadd.f32 %v1765_v22, %v1737_v59  ;;  %v1967_v31 = vld [vmem:[%s4825_s4 + $0xe8] sm:$0xff]  ;;  %v1966_v12 = vld [vmem:[%s4825_s4 + $0xe0] sm:$0xff]  ;;  %v1964_v59 = vld [vmem:[%s4825_s4 + $0xd0] sm:$0xff] }
 0x19f   :  { %v1666_v56 = vpop.f32.mrf.mxu0  ;;  %v2025_v22 = vld [vmem:[%s4825_s4 + $0x2b8] sm:$0xff] }
 0x1a0   :  { %v3953_v60 = vadd.f32 %v2756_v17, %v1666_v56  ;;  %1692 = vadd.xlane.f32.xlu0 %v1691_v36  ;;  %v1751_v58 = vadd.f32 %v1750_v23, %v1724_v44  ;;  %v1773_v9 = vadd.f32 %v1772_v55, %v1743_v24  ;;  %v1969_v56 = vld [vmem:[%s4825_s4 + $0xf8] sm:$0xff]  ;;  %v2032_v23 = vld [vmem:[%s4825_s4 + $0x2f0] sm:$0xff]  ;;  %v2023_v55 = vld [vmem:[%s4825_s4 + $0x2a8] sm:$0xff] }
 0x1a1   :  { %v1668_v20 = vpop.f32.mrf.mxu0  ;;  %2162 = vmatprep.subr.mxu1 %v1969_v56  ;;  %v1960_v24 = vld [vmem:[%s4825_s4 + $0xb0] sm:$0xff]  ;;  %v1951_v56 = vld [vmem:[%s4825_s4 + $0x68] sm:$0xff] }
 0x1a2   :  { %v1699_v39 = vadd.f32 %v1698_v14, %v3953_v60  ;;  %v1731_v41 = vmul.f32 %v3953_v60, %v3953_v60  ;;  %v1774_v42 = vadd.f32 %v1773_v9, %v1744_v45  ;;  %v1968_v14 = vld [vmem:[%s4825_s4 + $0xf0] sm:$0xff]  ;;  %v2030_v20 = vld [vmem:[%s4825_s4 + $0x2e0] sm:$0xff]  ;;  %v2021_v45 = vld [vmem:[%s4825_s4 + $0x298] sm:$0xff] }
 0x1a3   :  { %v1671_v18 = vpop.f32.mrf.mxu0  ;;  %2163 = vmatpush1.msra.mxu1 %v1968_v14  ;;  %v2019_v9 = vld [vmem:[%s4825_s4 + $0x288] sm:$0xff]  ;;  %v1950_v14 = vld [vmem:[%s4825_s4 + $0x60] sm:$0xff] }
 0x1a4   :  { %v3971_v25 = vadd.f32 %v2759_v57, %v1671_v18  ;;  %1700 = vadd.xlane.f32.xlu1 %v1699_v39  ;;  %1752 = vadd.xlane.f32.xlu0 %v1751_v58  ;;  %v1759_v30 = vadd.f32 %v1758_v48, %v1731_v41  ;;  %v2033_v57 = vld [vmem:[%s4825_s4 + $0x2f8] sm:$0xff]  ;;  %v2028_v39 = vld [vmem:[%s4825_s4 + $0x2d0] sm:$0xff]  ;;  %v1963_v58 = vld [vmem:[%s4825_s4 + $0xc8] sm:$0xff] }
 0x1a5   :  { %v1673_v50 = vpop.f32.mrf.mxu0  ;;  %2251 = vmatprep.subr.mxu0 %v2033_v57  ;;  %2164 = vmatprep.subr.mxu1 %v1967_v31  ;;  %v2029_v48 = vld [vmem:[%s4825_s4 + $0x2d8] sm:$0xff]  ;;  %v2027_v41 = vld [vmem:[%s4825_s4 + $0x2c8] sm:$0xff]  ;;  %v2026_v18 = vld [vmem:[%s4825_s4 + $0x2c0] sm:$0xff] }
 0x1a6   :  { %v1707_v49 = vadd.f32 %v1706_v21, %v3971_v25  ;;  %v1738_v61 = vmul.f32 %v3971_v25, %v3971_v25  ;;  %2252 = vmatpush1.msra.mxu0 %v2032_v23  ;;  %2165 = vmatpush1.msra.mxu1 %v1966_v12  ;;  %v1961_v21 = vld [vmem:[%s4825_s4 + $0xb8] sm:$0xff]  ;;  %v1959_v50 = vld [vmem:[%s4825_s4 + $0xa8] sm:$0xff]  ;;  %v2014_v23 = vld [vmem:[%s4825_s4 + $0x260] sm:$0xff] }
 0x1a7   :  { %v1674_v62 = vpop.f32.mrf.mxu0  ;;  %2253 = vmatprep.subr.mxu0 %v2031_v11  ;;  %2166 = vmatprep.subr.mxu1 %v1965_v38  ;;  %v2015_v57 = vld [vmem:[%s4825_s4 + $0x268] sm:$0xff]  ;;  %v1949_v31 = vld [vmem:[%s4825_s4 + $0x58] sm:$0xff]  ;;  %v1948_v12 = vld [vmem:[%s4825_s4 + $0x50] sm:$0xff] }
 0x1a8   :  { %v3978_v53 = vadd.f32 %v2762_v28, %v1674_v62  ;;  %1760 = vadd.xlane.f32.xlu1 %v1759_v30  ;;  %1708 = vadd.xlane.f32.xlu0 %v1707_v49  ;;  %v1767_v36 = vadd.f32 %v1766_v32, %v1738_v61  ;;  %v2024_v28 = vld [vmem:[%s4825_s4 + $0x2b0] sm:$0xff]  ;;  %v1958_v30 = vld [vmem:[%s4825_s4 + $0xa0] sm:$0xff]  ;;  %v1957_v61 = vld [vmem:[%s4825_s4 + $0x98] sm:$0xff] }
 0x1a9   :  { %v1676_v17 = vpop.f32.mrf.mxu0  ;;  %2254 = vmatpush1.msra.mxu0 %v2030_v20  ;;  %2167 = vmatpush1.msra.mxu1 %v1964_v59  ;;  %v2022_v49 = vld [vmem:[%s4825_s4 + $0x2a0] sm:$0xff]  ;;  %v1956_v62 = vld [vmem:[%s4825_s4 + $0x90] sm:$0xff]  ;;  %v2013_v11 = vld [vmem:[%s4825_s4 + $0x258] sm:$0xff] }
 0x1aa   :  { %v1715_v44 = vadd.f32 %v1714_v33, %v3978_v53  ;;  %v1745_v46 = vmul.f32 %v3978_v53, %v3978_v53  ;;  %2255 = vmatprep.subr.mxu0 %v2029_v48  ;;  %2168 = vmatprep.subr.mxu1 %v1963_v58  ;;  %v2020_v32 = vld [vmem:[%s4825_s4 + $0x290] sm:$0xff]  ;;  %v1955_v33 = vld [vmem:[%s4825_s4 + $0x88] sm:$0xff]  ;;  %v1954_v17 = vld [vmem:[%s4825_s4 + $0x80] sm:$0xff] }
 0x1ab   :  { %2256 = vmatpush1.msra.mxu0 %v2028_v39  ;;  %2169 = vmatpush1.msra.mxu1 %v1962_v52  ;;  %v2012_v20 = vld [vmem:[%s4825_s4 + $0x250] sm:$0xff]  ;;  %v1947_v38 = vld [vmem:[%s4825_s4 + $0x48] sm:$0xff]  ;;  %v1946_v59 = vld [vmem:[%s4825_s4 + $0x40] sm:$0xff] }
 0x1ac   :  { %1768 = vadd.xlane.f32.xlu1 %v1767_v36  ;;  %1716 = vadd.xlane.f32.xlu0 %v1715_v44  ;;  %v1775_v54 = vadd.f32 %v1774_v42, %v1745_v46  ;;  %v2018_v36 = vld [vmem:[%s4825_s4 + $0x280] sm:$0xff]  ;;  %v1953_v44 = vld [vmem:[%s4825_s4 + $0x78] sm:$0xff]  ;;  %v1952_v42 = vld [vmem:[%s4825_s4 + $0x70] sm:$0xff] }
 0x1ad   :  { %2257 = vmatprep.subr.mxu0 %v2027_v41  ;;  %2170 = vmatprep.subr.mxu1 %v1961_v21  ;;  %v2017_v46 = vld [vmem:[%s4825_s4 + $0x278] sm:$0xff]  ;;  %v2011_v48 = vld [vmem:[%s4825_s4 + $0x248] sm:$0xff]  ;;  %v2010_v39 = vld [vmem:[%s4825_s4 + $0x240] sm:$0xff] }
 0x1ae   :  { %2258 = vmatpush1.msra.mxu0 %v2026_v18  ;;  %2171 = vmatpush1.msra.mxu1 %v1960_v24  ;;  %v1945_v58 = vld [vmem:[%s4825_s4 + $0x38] sm:$0xff]  ;;  %v1944_v52 = vld [vmem:[%s4825_s4 + $0x30] sm:$0xff]  ;;  %v1943_v21 = vld [vmem:[%s4825_s4 + $0x28] sm:$0xff] }
 0x1af   :  { %2259 = vmatprep.subr.mxu0 %v2025_v22  ;;  %2172 = vmatprep.subr.mxu1 %v1959_v50  ;;  %v2009_v41 = vld [vmem:[%s4825_s4 + $0x238] sm:$0xff]  ;;  %v2008_v18 = vld [vmem:[%s4825_s4 + $0x230] sm:$0xff]  ;;  %v2007_v22 = vld [vmem:[%s4825_s4 + $0x228] sm:$0xff] }
 0x1b0   :  { %1776 = vadd.xlane.f32.xlu1 %v1775_v54  ;;  %2260 = vmatpush1.msra.mxu0 %v2024_v28  ;;  %v2016_v54 = vld [vmem:[%s4825_s4 + $0x270] sm:$0xff]  ;;  %v1942_v24 = vld [vmem:[%s4825_s4 + $0x20] sm:$0xff]  ;;  %v1941_v50 = vld [vmem:[%s4825_s4 + $0x18] sm:$0xff] }
 0x1b1   :  { %2261 = vmatprep.subr.mxu0 %v2023_v55  ;;  %2173 = vmatpush1.msra.mxu1 %v1958_v30  ;;  %v2006_v28 = vld [vmem:[%s4825_s4 + $0x220] sm:$0xff]  ;;  %v2005_v55 = vld [vmem:[%s4825_s4 + $0x218] sm:$0xff]  ;;  %v1940_v30 = vld [vmem:[%s4825_s4 + $0x10] sm:$0xff] }
 0x1b2   :  { %2262 = vmatpush1.msra.mxu0 %v2022_v49  ;;  %2174 = vmatprep.subr.mxu1 %v1957_v61  ;;  %v2004_v49 = vld [vmem:[%s4825_s4 + $0x210] sm:$0xff]  ;;  %v1939_v61 = vld [vmem:[%s4825_s4 + $0x8] sm:$0xff] }
 0x1b3   :  { %2263 = vmatprep.subr.mxu0 %v2021_v45  ;;  %2175 = vmatpush1.msra.mxu1 %v1956_v62  ;;  %v2003_v45 = vld [vmem:[%s4825_s4 + $0x208] sm:$0xff]  ;;  %v1938_v62 = vld [vmem:[%s4825_s4] sm:$0xff] }
 0x1b4   :  { %2264 = vmatpush1.msra.mxu0 %v2020_v32  ;;  %2176 = vmatprep.subr.mxu1 %v1955_v33  ;;  %v2002_v32 = vld [vmem:[%s4825_s4 + $0x200] sm:$0xff]  ;;  %v2001_v33 = vld [vmem:[%s4825_s4 + $0x1f8] sm:$0xff] }
 0x1b5   :  { %2265 = vmatprep.subr.mxu0 %v2019_v9  ;;  %2177 = vmatpush1.msra.mxu1 %v1954_v17  ;;  %v2065_v9 = vld [vmem:[%s4825_s4 + $0x3f8] sm:$0xff]  ;;  %v2000_v17 = vld [vmem:[%s4825_s4 + $0x1f0] sm:$0xff] }
 0x1b6   :  { %2266 = vmatpush1.msra.mxu0 %v2018_v36  ;;  %2178 = vmatprep.subr.mxu1 %v1953_v44  ;;  %v2064_v36 = vld [vmem:[%s4825_s4 + $0x3f0] sm:$0xff]  ;;  %v1999_v44 = vld [vmem:[%s4825_s4 + $0x1e8] sm:$0xff] }
 0x1b7   :  { %2267 = vmatprep.subr.mxu0 %v2017_v46  ;;  %2179 = vmatpush1.msra.mxu1 %v1952_v42  ;;  %v2063_v46 = vld [vmem:[%s4825_s4 + $0x3e8] sm:$0xff]  ;;  %v1998_v42 = vld [vmem:[%s4825_s4 + $0x1e0] sm:$0xff] }
 0x1b8   :  { %2268 = vmatpush1.msra.mxu0 %v2016_v54  ;;  %2180 = vmatprep.subr.mxu1 %v1951_v56  ;;  %v2062_v54 = vld [vmem:[%s4825_s4 + $0x3e0] sm:$0xff]  ;;  %v1997_v56 = vld [vmem:[%s4825_s4 + $0x1d8] sm:$0xff] }
 0x1b9   :  { %2269 = vmatprep.subr.mxu0 %v2015_v57  ;;  %2181 = vmatpush1.msra.mxu1 %v1950_v14  ;;  %v2061_v57 = vld [vmem:[%s4825_s4 + $0x3d8] sm:$0xff]  ;;  %v1996_v14 = vld [vmem:[%s4825_s4 + $0x1d0] sm:$0xff] }
 0x1ba   :  { %2270 = vmatpush1.msra.mxu0 %v2014_v23  ;;  %2182 = vmatprep.subr.mxu1 %v1949_v31  ;;  %v2060_v23 = vld [vmem:[%s4825_s4 + $0x3d0] sm:$0xff]  ;;  %v1995_v31 = vld [vmem:[%s4825_s4 + $0x1c8] sm:$0xff] }
 0x1bb   :  { %2271 = vmatprep.subr.mxu0 %v2013_v11  ;;  %2183 = vmatpush1.msra.mxu1 %v1948_v12  ;;  %v2059_v11 = vld [vmem:[%s4825_s4 + $0x3c8] sm:$0xff]  ;;  %v1994_v12 = vld [vmem:[%s4825_s4 + $0x1c0] sm:$0xff] }
 0x1bc   :  { %2272 = vmatpush1.msra.mxu0 %v2012_v20  ;;  %2184 = vmatprep.subr.mxu1 %v1947_v38  ;;  %v2058_v20 = vld [vmem:[%s4825_s4 + $0x3c0] sm:$0xff]  ;;  %v1993_v38 = vld [vmem:[%s4825_s4 + $0x1b8] sm:$0xff] }
 0x1bd   :  { %2273 = vmatprep.subr.mxu0 %v2011_v48  ;;  %2185 = vmatpush1.msra.mxu1 %v1946_v59  ;;  %v2057_v48 = vld [vmem:[%s4825_s4 + $0x3b8] sm:$0xff]  ;;  %v1992_v59 = vld [vmem:[%s4825_s4 + $0x1b0] sm:$0xff] }
 0x1be   :  { %2274 = vmatpush1.msra.mxu0 %v2010_v39  ;;  %2186 = vmatprep.subr.mxu1 %v1945_v58  ;;  %v2056_v39 = vld [vmem:[%s4825_s4 + $0x3b0] sm:$0xff]  ;;  %v1991_v58 = vld [vmem:[%s4825_s4 + $0x1a8] sm:$0xff] }
 0x1bf   :  { %2275 = vmatprep.subr.mxu0 %v2009_v41  ;;  %2187 = vmatpush1.msra.mxu1 %v1944_v52  ;;  %v2055_v41 = vld [vmem:[%s4825_s4 + $0x3a8] sm:$0xff]  ;;  %v1990_v52 = vld [vmem:[%s4825_s4 + $0x1a0] sm:$0xff] }
 0x1c0   :  { %2276 = vmatpush1.msra.mxu0 %v2008_v18  ;;  %2188 = vmatprep.subr.mxu1 %v1943_v21  ;;  %v2054_v18 = vld [vmem:[%s4825_s4 + $0x3a0] sm:$0xff] }
 0x1c1   :  { %2277 = vmatprep.subr.mxu0 %v2007_v22  ;;  %2189 = vmatpush1.msra.mxu1 %v1942_v24 }
 0x1c2   :  { %2278 = vmatpush1.msra.mxu0 %v2006_v28  ;;  %2190 = vmatprep.subr.mxu1 %v1941_v50 }
 0x1c3   :  { %2279 = vmatprep.subr.mxu0 %v2005_v55  ;;  %2191 = vmatpush1.msra.mxu1 %v1940_v30 }
 0x1c4   :  { %2280 = vmatpush1.msra.mxu0 %v2004_v49  ;;  %2192 = vmatprep.subr.mxu1 %v1939_v61 }
 0x1c5   :  { %2281 = vmatprep.subr.mxu0 %v2003_v45  ;;  %2193 = vmatpush1.msra.mxu1 %v1938_v62 }
 0x1c6   :  { %2282 = vmatpush1.msra.mxu0 %v2002_v32  ;;  %2194 = vmatprep.subr.mxu1 %v2001_v33 }
 0x1c7   :  { %2283 = vmatprep.subr.mxu0 %v2065_v9  ;;  %2195 = vmatpush2.msra.mxu1 %v2000_v17 }
 0x1c8   :  { %2284 = vmatpush2.msra.mxu0 %v2064_v36  ;;  %2196 = vmatprep.subr.mxu1 %v1999_v44 }
 0x1c9   :  { %2285 = vmatprep.subr.mxu0 %v2063_v46  ;;  %2197 = vmatpush2.msra.mxu1 %v1998_v42 }
 0x1ca   :  { %2286 = vmatpush2.msra.mxu0 %v2062_v54  ;;  %2198 = vmatprep.subr.mxu1 %v1997_v56 }
 0x1cb   :  { %2287 = vmatprep.subr.mxu0 %v2061_v57  ;;  %2199 = vmatpush2.msra.mxu1 %v1996_v14 }
 0x1cc   :  { %2288 = vmatpush2.msra.mxu0 %v2060_v23  ;;  %2200 = vmatprep.subr.mxu1 %v1995_v31 }
 0x1cd   :  { %2289 = vmatprep.subr.mxu0 %v2059_v11  ;;  %2201 = vmatpush2.msra.mxu1 %v1994_v12 }
 0x1ce   :  { %2290 = vmatpush2.msra.mxu0 %v2058_v20  ;;  %2202 = vmatprep.subr.mxu1 %v1993_v38  ;;  %v1678_v20 = vld [vmem:[%s4826_s2] sm:$0xff]  ;;  %v1989_v38 = vld [vmem:[%s4825_s4 + $0x198] sm:$0xff] }
 0x1cf   :  { %2291 = vmatprep.subr.mxu0 %v2057_v48  ;;  %2203 = vmatpush2.msra.mxu1 %v1992_v59  ;;  %v2053_v48 = vld [vmem:[%s4825_s4 + $0x398] sm:$0xff] }
 0x1d0   :  { %2292 = vmatpush2.msra.mxu0 %v2056_v39  ;;  %2204 = vmatprep.subr.mxu1 %v1991_v58  ;;  %v1988_v39 = vld [vmem:[%s4825_s4 + $0x190] sm:$0xff] }
 0x1d1   :  { %2293 = vmatprep.subr.mxu0 %v2055_v41  ;;  %2205 = vmatpush2.msra.mxu1 %v1990_v52  ;;  %v2052_v58 = vld [vmem:[%s4825_s4 + $0x390] sm:$0xff]  ;;  %v1987_v41 = vld [vmem:[%s4825_s4 + $0x188] sm:$0xff] }
 0x1d2   :  { %2294 = vmatpush2.msra.mxu0 %v2054_v18  ;;  %2206 = vmatprep.subr.mxu1 %v1989_v38 }
 0x1d3   :  { %2295 = vmatprep.subr.mxu0 %v2053_v48  ;;  %2207 = vmatpush2.msra.mxu1 %v1988_v39  ;;  %v1979_v48 = vld [vmem:[%s4825_s4 + $0x148] sm:$0xff]  ;;  %v1978_v39 = vld [vmem:[%s4825_s4 + $0x140] sm:$0xff] }
 0x1d4   :  { %2296 = vmatpush2.msra.mxu0 %v2052_v58  ;;  %2208 = vmatprep.subr.mxu1 %v1987_v41  ;;  %v2042_v58 = vld [vmem:[%s4825_s4 + $0x340] sm:$0xff]  ;;  %v1977_v41 = vld [vmem:[%s4825_s4 + $0x138] sm:$0xff] }
 0x229   :  { %v1693_v21 = vpop.xlane.xlu0 %1692 }
 0x22a   :  { %v1778_v22 = vmul.f32 0.00125, %v1693_v21  ;;  %v2051_v21 = vld [vmem:[%s4825_s4 + $0x388] sm:$0xff] }
 0x22b   :  { %2297 = vmatprep.subr.mxu0 %v2051_v21 }
 0x22c   :  { %v1786_v50 = vmul.f32 %v1778_v22, %v1778_v22 }
 0x22d   :  { %v1701_v24 = vpop.xlane.xlu1 %1700  ;;  %v1753_v28 = vpop.xlane.xlu0 %1752 }
 0x22e   :  { %v1779_v55 = vmul.f32 0.00125, %v1701_v24  ;;  %v1782_v30 = vmul.f32 0.00125, %v1753_v28  ;;  %v1986_v24 = vld [vmem:[%s4825_s4 + $0x180] sm:$0xff] }
 0x22f   :  { %v2050_v28 = vld [vmem:[%s4825_s4 + $0x380] sm:$0xff]  ;;  %2209 = vmatpush2.msra.mxu1 %v1986_v24  ;;  %v1976_v24 = vld [vmem:[%s4825_s4 + $0x130] sm:$0xff] }
 0x230   :  { %v1790_v49 = vsub.f32 %v1782_v30, %v1786_v50  ;;  %v1787_v62 = vmul.f32 %v1779_v55, %v1779_v55  ;;  %v1682_v50 = vld [vmem:[%s4827_s3] sm:$0xff]  ;;  %v1679_v30 = vld [vmem:[%s4826_s2 + $0x8] sm:$0xff]  ;;  %2298 = vmatpush2.msra.mxu0 %v2050_v28  ;;  %v2040_v28 = vld [vmem:[%s4825_s4 + $0x330] sm:$0xff] }
 0x231   :  { %v1761_v61 = vpop.xlane.xlu1 %1760  ;;  %v1709_v45 = vpop.xlane.xlu0 %1708 }
 0x232   :  { %v1794_v32 = vadd.f32 1e-05, %v1790_v49  ;;  %v1783_v33 = vmul.f32 0.00125, %v1761_v61  ;;  %v4248_v9 = vmul.f32 0.00125, %v1709_v45 }
 0x234   :  { %3049 = vrsqrt.f32 %v1794_v32  ;;  %v1791_v17 = vsub.f32 %v1783_v33, %v1787_v62  ;;  %v1788_v42 = vmul.f32 %v4248_v9, %v4248_v9  ;;  %v1985_v32 = vld [vmem:[%s4825_s4 + $0x178] sm:$0xff] }
 0x235   :  { %v1769_v36 = vpop.xlane.xlu1 %1768  ;;  %v1717_v44 = vpop.xlane.xlu0 %1716  ;;  %v2049_v33 = vld [vmem:[%s4825_s4 + $0x378] sm:$0xff]  ;;  %2210 = vmatprep.subr.mxu1 %v1985_v32 }
 0x236   :  { %v1795_v46 = vadd.f32 1e-05, %v1791_v17  ;;  %v1784_v54 = vmul.f32 0.00125, %v1769_v36  ;;  %v4252_v57 = vmul.f32 0.00125, %v1717_v44  ;;  %2299 = vmatprep.subr.mxu0 %v2049_v33 }
 0x237   :  { %v1683_v17 = vld [vmem:[%s4827_s3 + $0x8] sm:$0xff]  ;;  %v1984_v36 = vld [vmem:[%s4825_s4 + $0x170] sm:$0xff]  ;;  %v2037_v32 = vld [vmem:[%s4825_s4 + $0x318] sm:$0xff] }
 0x238   :  { %3051 = vrsqrt.f32 %v1795_v46  ;;  %v1792_v56 = vsub.f32 %v1784_v54, %v1788_v42  ;;  %v1789_v11 = vmul.f32 %v4252_v57, %v4252_v57  ;;  %v2048_v44 = vld [vmem:[%s4825_s4 + $0x370] sm:$0xff]  ;;  %2211 = vmatpush2.msra.mxu1 %v1984_v36  ;;  %v2047_v54 = vld [vmem:[%s4825_s4 + $0x368] sm:$0xff] }
 0x239   :  { %v1777_v14 = vpop.xlane.xlu1 %1776  ;;  %v1680_v42 = vld [vmem:[%s4826_s2 + $0x10] sm:$0xff]  ;;  %2300 = vmatpush2.msra.mxu0 %v2048_v44  ;;  %v1971_v44 = vld [vmem:[%s4825_s4 + $0x108] sm:$0xff] }
 0x23a   :  { %v1796_v23 = vadd.f32 1e-05, %v1792_v56  ;;  %v1785_v31 = vmul.f32 0.00125, %v1777_v14  ;;  %v1982_v56 = vld [vmem:[%s4825_s4 + $0x160] sm:$0xff]  ;;  %2301 = vmatprep.subr.mxu0 %v2047_v54  ;;  %v2036_v36 = vld [vmem:[%s4825_s4 + $0x310] sm:$0xff] }
 0x23b   :  { %v2046_v14 = vld [vmem:[%s4825_s4 + $0x360] sm:$0xff]  ;;  %v2097_v54 = vld [vmem:[%s4825_s4 + $0x4f8] sm:$0xff] }
 0x23c   :  { %3053 = vrsqrt.f32 %v1796_v23  ;;  %v1793_v12 = vsub.f32 %v1785_v31, %v1789_v11  ;;  %v1981_v23 = vld [vmem:[%s4825_s4 + $0x158] sm:$0xff]  ;;  %v1980_v11 = vld [vmem:[%s4825_s4 + $0x150] sm:$0xff]  ;;  %2302 = vmatpush2.msra.mxu0 %v2046_v14 }
 0x23d   :  { %v2045_v31 = vld [vmem:[%s4825_s4 + $0x358] sm:$0xff] }
 0x23e   :  { %v1797_v52 = vadd.f32 1e-05, %v1793_v12  ;;  %v2044_v12 = vld [vmem:[%s4825_s4 + $0x350] sm:$0xff]  ;;  %2303 = vmatprep.subr.mxu0 %v2045_v31  ;;  %v2161_v14 = vld [vmem:[%s4825_s4 + $0x6f8] sm:$0xff] }
 0x23f   :  { %2304 = vmatpush2.msra.mxu0 %v2044_v12 }
 0x240   :  { %3055 = vrsqrt.f32 %v1797_v52  ;;  %v2041_v52 = vld [vmem:[%s4825_s4 + $0x338] sm:$0xff] }
 0x241   :  { %v3050_v59 = vpop.eup %3049 }
 0x242   :  { %v1802_v18 = vmul.f32 %v3050_v59, %v1678_v20  ;;  %v2043_v59 = vld [vmem:[%s4825_s4 + $0x348] sm:$0xff] }
 0x243   :  { %2305 = vmatprep.subr.mxu0 %v2043_v59 }
 0x244   :  { %1816 = vperm.xlu0 %2765, %v1802_v18   ;;  %v1806_v49 = vmul.f32 %v1802_v18, %v1778_v22  ;;  %v1684_v18 = vld [vmem:[%s4827_s3 + $0x10] sm:$0xff]  ;;  %2306 = vmatpush2.msra.mxu0 %v2042_v58 }
 0x245   :  { %v3052_v61 = vpop.eup %3051  ;;  %2307 = vmatprep.subr.mxu0 %v2041_v52 }
 0x246   :  { %v1810_v45 = vsub.f32 %v1682_v50, %v1806_v49  ;;  %v1803_v62 = vmul.f32 %v3052_v61, %v1679_v30  ;;  %v1681_v30 = vld [vmem:[%s4826_s2 + $0x18] sm:$0xff]  ;;  %v2039_v49 = vld [vmem:[%s4825_s4 + $0x328] sm:$0xff]  ;;  %v1974_v61 = vld [vmem:[%s4825_s4 + $0x120] sm:$0xff]  ;;  %2308 = vmatpush2.msra.mxu0 %v2040_v28 }
 0x247   :  { %2309 = vmatprep.subr.mxu0 %v2039_v49 }
 0x248   :  { %1864 = vperm.xlu1 %2766, %v1810_v45   ;;  %v1807_v22 = vmul.f32 %v1803_v62, %v1779_v55  ;;  %v1983_v55 = vld [vmem:[%s4825_s4 + $0x168] sm:$0xff]  ;;  %v2038_v45 = vld [vmem:[%s4825_s4 + $0x320] sm:$0xff] }
 0x249   :  { %v3054_v46 = vpop.eup %3053  ;;  %2212 = vmatprep.subr.mxu1 %v1983_v55  ;;  %2310 = vmatpush2.msra.mxu0 %v2038_v45  ;;  %v2034_v55 = vld [vmem:[%s4825_s4 + $0x300] sm:$0xff] }
 0x24a   :  { %2213 = vmatpush2.msra.mxu1 %v1982_v56  ;;  %v1811_v20 = vsub.f32 %v1683_v17, %v1807_v22  ;;  %v1804_v38 = vmul.f32 %v3054_v46, %v1680_v42  ;;  %v1972_v22 = vld [vmem:[%s4825_s4 + $0x110] sm:$0xff]  ;;  %v2035_v46 = vld [vmem:[%s4825_s4 + $0x308] sm:$0xff]  ;;  %2311 = vmatprep.subr.mxu0 %v2037_v32  ;;  %v1970_v42 = vld [vmem:[%s4825_s4 + $0x100] sm:$0xff] }
 0x24b   :  { %2214 = vmatprep.subr.mxu1 %v1981_v23  ;;  %2312 = vmatpush2.msra.mxu0 %v2036_v36  ;;  %v1685_v23 = vld [vmem:[%s4827_s3 + $0x18] sm:$0xff] }
 0x24c   :  { %1821 = vperm.xlu1 %2766, %v1803_v62   ;;  %2215 = vmatpush2.msra.mxu1 %v1980_v11  ;;  %v1808_v21 = vmul.f32 %v1804_v38, %v4248_v9  ;;  %v1975_v9 = vld [vmem:[%s4825_s4 + $0x128] sm:$0xff]  ;;  %v1973_v62 = vld [vmem:[%s4825_s4 + $0x118] sm:$0xff] }
 0x24d   :  { %2216 = vmatprep.subr.mxu1 %v1979_v48  ;;  %v3056_v50 = vpop.eup %3055  ;;  %2313 = vmatprep.subr.mxu0 %v2035_v46 }
 0x24e   :  { %2217 = vmatpush2.msra.mxu1 %v1978_v39  ;;  %v1812_v33 = vsub.f32 %v1684_v18, %v1808_v21  ;;  %v1805_v17 = vmul.f32 %v3056_v50, %v1681_v30  ;;  %2314 = vmatpush2.msra.mxu0 %v2034_v55  ;;  %v2093_v55 = vld [vmem:[%s4825_s4 + $0x4d8] sm:$0xff] }
 0x24f   :  { %2218 = vmatprep.subr.mxu1 %v1977_v41  ;;  %2429 = vmatprep.subr.mxu0 %v2161_v14  ;;  %v2092_v14 = vld [vmem:[%s4825_s4 + $0x4d0] sm:$0xff] }
 0x250   :  { %1869 = vperm.xlu1 %2766, %v1811_v20   ;;  %2219 = vmatpush2.msra.mxu1 %v1976_v24  ;;  %v1809_v56 = vmul.f32 %v1805_v17, %v4252_v57 }
 0x251   :  { %2220 = vmatprep.subr.mxu1 %v1975_v9 }
 0x252   :  { %2221 = vmatpush2.msra.mxu1 %v1974_v61  ;;  %v1813_v31 = vsub.f32 %v1685_v23, %v1809_v56  ;;  %v2158_v56 = vld [vmem:[%s4825_s4 + $0x6e0] sm:$0xff]  ;;  %v2157_v23 = vld [vmem:[%s4825_s4 + $0x6d8] sm:$0xff] }
 0x253   :  { %2222 = vmatprep.subr.mxu1 %v1973_v62  ;;  %v2096_v62 = vld [vmem:[%s4825_s4 + $0x4f0] sm:$0xff] }
 0x254   :  { %1826 = vperm.xlu1 %2766, %v1804_v38   ;;  %2223 = vmatpush2.msra.mxu1 %v1972_v22 }
 0x255   :  { %2224 = vmatprep.subr.mxu1 %v1971_v44  ;;  %v2160_v44 = vld [vmem:[%s4825_s4 + $0x6f0] sm:$0xff] }
 0x256   :  { %2225 = vmatpush2.msra.mxu1 %v1970_v42  ;;  %v2159_v42 = vld [vmem:[%s4825_s4 + $0x6e8] sm:$0xff] }
 0x257   :  { %2340 = vmatprep.subr.mxu1 %v2097_v54 }
 0x258   :  { %1874 = vperm.xlu1 %2766, %v1812_v33  }
 0x25c   :  { %1831 = vperm.xlu1 %2766, %v1805_v17  }
 0x260   :  { %1879 = vperm.xlu1 %2766, %v1813_v31   ;;  %v2091_v31 = vld [vmem:[%s4825_s4 + $0x4c8] sm:$0xff] }
 0x2bf   :  { %v4408_v11 = vpop.permute.xlu0 %1816 }
 0x2c0   :  { %v1834_v57 = vmul.f32 %v4408_v11, %v3830_v63  ;;  %v1835_v12 = vmul.f32 %v4408_v11, %v3832_v0  ;;  %v1836_v20 = vmul.f32 %v4408_v11, %v3838_v4  ;;  %v1837_v38 = vmul.f32 %v4408_v11, %v3865_v19 }
 0x2c1   :  { %v1838_v48 = vmul.f32 %v4408_v11, %v3886_v16 }
 0x2c3   :  { %v4420_v59 = vpop.permute.xlu1 %1864 }
 0x2c4   :  { %v1882_v39 = vadd.f32 %v4420_v59, %v1834_v57  ;;  %v1883_v58 = vadd.f32 %v4420_v59, %v1835_v12  ;;  %v1884_v63 = vadd.f32 %v4420_v59, %v1836_v20  ;;  %v1885_v41 = vadd.f32 %v4420_v59, %v1837_v38  ;;  %v2156_v57 = vld [vmem:[%s4825_s4 + $0x6d0] sm:$0xff]  ;;  %v2155_v12 = vld [vmem:[%s4825_s4 + $0x6c8] sm:$0xff]  ;;  %v2090_v20 = vld [vmem:[%s4825_s4 + $0x4c0] sm:$0xff] }
 0x2c5   :  { %v4427_v0 = vadd.f32 %v4420_v59, %v1838_v48 }
 0x2c6   :  { %3057 = vtanh.f32 %v1882_v39  ;;  %v2154_v39 = vld [vmem:[%s4825_s4 + $0x6c0] sm:$0xff] }
 0x2c7   :  { %3059 = vtanh.f32 %v1883_v58  ;;  %v4429_v4 = vpop.permute.xlu1 %1821 }
 0x2c8   :  { %3061 = vtanh.f32 %v1884_v63  ;;  %v1841_v19 = vmul.f32 %v4429_v4, %v3836_v2  ;;  %v1842_v16 = vmul.f32 %v4429_v4, %v3834_v1  ;;  %v1844_v52 = vmul.f32 %v4429_v4, %v3871_v26 }
 0x2c9   :  { %3063 = vtanh.f32 %v1885_v41  ;;  %v1845_v18 = vmul.f32 %v4429_v4, %v3891_v37  ;;  %v1846_v21 = vmul.f32 %v4429_v4, %v3916_v40  ;;  %v1843_v28 = vmul.f32 %v4429_v4, %v3844_v8  ;;  %v2089_v41 = vld [vmem:[%s4825_s4 + $0x4b8] sm:$0xff] }
 0x2cb   :  { %v4441_v24 = vpop.permute.xlu1 %1869 }
 0x2cc   :  { %v1889_v50 = vadd.f32 %v4441_v24, %v1841_v19  ;;  %v1890_v2 = vadd.f32 %v4441_v24, %v1842_v16  ;;  %v1892_v1 = vadd.f32 %v4441_v24, %v1844_v52  ;;  %v4449_v30 = vadd.f32 %v4441_v24, %v1845_v18  ;;  %v2153_v52 = vld [vmem:[%s4825_s4 + $0x6b8] sm:$0xff] }
 0x2cd   :  { %v4452_v26 = vadd.f32 %v4441_v24, %v1846_v21  ;;  %v1891_v37 = vadd.f32 %v4441_v24, %v1843_v28  ;;  %v2088_v28 = vld [vmem:[%s4825_s4 + $0x4b0] sm:$0xff] }
 0x2ce   :  { %3065 = vtanh.f32 %v1890_v2  ;;  %v2152_v2 = vld [vmem:[%s4825_s4 + $0x6b0] sm:$0xff] }
 0x2cf   :  { %v4455_v40 = vpop.permute.xlu1 %1826  ;;  %3067 = vtanh.f32 %v1889_v50 }
 0x2d0   :  { %3069 = vtanh.f32 %v1892_v1  ;;  %v1849_v9 = vmul.f32 %v4455_v40, %v3854_v34  ;;  %v1851_v45 = vmul.f32 %v4455_v40, %v3899_v43  ;;  %v1848_v33 = vmul.f32 %v4455_v40, %v3852_v13  ;;  %v2095_v34 = vld [vmem:[%s4825_s4 + $0x4e8] sm:$0xff]  ;;  %v2094_v13 = vld [vmem:[%s4825_s4 + $0x4e0] sm:$0xff] }
 0x2d1   :  { %3071 = vtanh.f32 %v1891_v37  ;;  %v1850_v36 = vmul.f32 %v4455_v40, %v3873_v27  ;;  %v2086_v37 = vld [vmem:[%s4825_s4 + $0x4a0] sm:$0xff] }
 0x2d3   :  { %v3058_v8 = vpop.eup %3057  ;;  %v4459_v49 = vpop.permute.xlu1 %1874 }
 0x2d4   :  { %v3060_v61 = vpop.eup %3059  ;;  %v1897_v17 = vadd.f32 %v4459_v49, %v1849_v9  ;;  %v1899_v43 = vadd.f32 %v4459_v49, %v1851_v45  ;;  %v1896_v46 = vadd.f32 %v4459_v49, %v1848_v33  ;;  %v1898_v54 = vadd.f32 %v4459_v49, %v1850_v36  ;;  %v2150_v9 = vld [vmem:[%s4825_s4 + $0x6a0] sm:$0xff]  ;;  %v2149_v45 = vld [vmem:[%s4825_s4 + $0x698] sm:$0xff]  ;;  %v2148_v33 = vld [vmem:[%s4825_s4 + $0x690] sm:$0xff] }
 0x2d5   :  { %v3062_v32 = vpop.eup %3061  ;;  %2226 = vmatprep.mubr.f32.mxu1 %v3060_v61  ;;  %v2085_v61 = vld [vmem:[%s4825_s4 + $0x498] sm:$0xff] }
 0x2d6   :  { %v3064_v22 = vpop.eup %3063  ;;  %2227 = vmatmul.mubr.f32.vlgmr.msra.gmra.mxu1 %v3058_v8  ;;  %3073 = vtanh.f32 %v1897_v17  ;;  %v2083_v17 = vld [vmem:[%s4825_s4 + $0x488] sm:$0xff] }
 0x2d7   :  { %2315 = vmatprep.mubr.f32.mxu0 %v3064_v22  ;;  %2341 = vmatpush1.msra.mxu1 %v2096_v62  ;;  %v4485_v27 = vpop.permute.xlu1 %1831  ;;  %3075 = vtanh.f32 %v1899_v43  ;;  %v2084_v62 = vld [vmem:[%s4825_s4 + $0x490] sm:$0xff]  ;;  %v2146_v43 = vld [vmem:[%s4825_s4 + $0x680] sm:$0xff] }
 0x2d8   :  { %2316 = vmatmul.mubr.f32.vlgmr.msra.gmra.mxu0 %v3062_v32  ;;  %2342 = vmatprep.subr.mxu1 %v2095_v34  ;;  %3077 = vtanh.f32 %v1896_v46  ;;  %v1856_v63 = vmul.f32 %v4485_v27, %v3860_v15  ;;  %v1858_v16 = vmul.f32 %v4485_v27, %v3936_v3  ;;  %v1855_v21 = vmul.f32 %v4485_v27, %v3856_v6  ;;  %v2087_v6 = vld [vmem:[%s4825_s4 + $0x4a8] sm:$0xff] }
 0x2d9   :  { %2430 = vmatpush1.msra.mxu0 %v2160_v44  ;;  %2343 = vmatpush1.msra.mxu1 %v2094_v13  ;;  %3079 = vtanh.f32 %v1898_v54  ;;  %v1857_v3 = vmul.f32 %v4485_v27, %v3902_v7  ;;  %v2151_v7 = vld [vmem:[%s4825_s4 + $0x6a8] sm:$0xff]  ;;  %v1839_v32 = vmul.f32 %v4408_v11, %v3905_v47  ;;  %v2082_v47 = vld [vmem:[%s4825_s4 + $0x480] sm:$0xff]  ;;  %v2081_v13 = vld [vmem:[%s4825_s4 + $0x478] sm:$0xff] }
 0x2da   :  { %2431 = vmatprep.subr.mxu0 %v2159_v42  ;;  %2344 = vmatprep.subr.mxu1 %v2093_v55  ;;  %v2147_v34 = vld [vmem:[%s4825_s4 + $0x688] sm:$0xff]  ;;  %v2145_v42 = vld [vmem:[%s4825_s4 + $0x678] sm:$0xff]  ;;  %v2080_v54 = vld [vmem:[%s4825_s4 + $0x470] sm:$0xff] }
 0x2db   :  { %2432 = vmatpush1.msra.mxu0 %v2158_v56  ;;  %2345 = vmatpush1.msra.mxu1 %v2092_v14  ;;  %v3066_v38 = vpop.eup %3065  ;;  %v4512_v48 = vpop.permute.xlu1 %1879  ;;  %v1887_v36 = vadd.f32 %v4420_v59, %v1839_v32  ;;  %v2144_v56 = vld [vmem:[%s4825_s4 + $0x670] sm:$0xff]  ;;  %v2079_v14 = vld [vmem:[%s4825_s4 + $0x468] sm:$0xff] }
 0x2dc   :  { %2433 = vmatprep.subr.mxu0 %v2157_v23  ;;  %2346 = vmatprep.subr.mxu1 %v2091_v31  ;;  %v3068_v58 = vpop.eup %3067  ;;  %v1904_v15 = vadd.f32 %v4512_v48, %v1856_v63  ;;  %v1906_v50 = vadd.f32 %v4512_v48, %v1858_v16  ;;  %v1903_v1 = vadd.f32 %v4512_v48, %v1855_v21  ;;  %v2143_v31 = vld [vmem:[%s4825_s4 + $0x668] sm:$0xff]  ;;  %v2138_v16 = vld [vmem:[%s4825_s4 + $0x640] sm:$0xff]  ;;  %v2137_v21 = vld [vmem:[%s4825_s4 + $0x638] sm:$0xff] }
 0x2dd   :  { %2434 = vmatpush1.msra.mxu0 %v2156_v57  ;;  %v3070_v19 = vpop.eup %3069  ;;  %2347 = vmatpush1.msra.mxu1 %v2090_v20  ;;  %v1905_v8 = vadd.f32 %v4512_v48, %v1857_v3  ;;  %v1840_v23 = vmul.f32 %v4408_v11, %v3928_v51  ;;  %v2078_v57 = vld [vmem:[%s4825_s4 + $0x460] sm:$0xff]  ;;  %v2077_v51 = vld [vmem:[%s4825_s4 + $0x458] sm:$0xff]  ;;  %v2139_v63 = vld [vmem:[%s4825_s4 + $0x648] sm:$0xff] }
 0x2de   :  { %2435 = vmatprep.subr.mxu0 %v2155_v12  ;;  %v3072_v18 = vpop.eup %3071  ;;  %2232 = vmatprep.mubr.f32.mxu1 %v3066_v38  ;;  %3081 = vtanh.f32 %v1904_v15  ;;  %v2142_v12 = vld [vmem:[%s4825_s4 + $0x660] sm:$0xff]  ;;  %v2141_v20 = vld [vmem:[%s4825_s4 + $0x658] sm:$0xff]  ;;  %v2076_v38 = vld [vmem:[%s4825_s4 + $0x450] sm:$0xff] }
 0x2df   :  { %2436 = vmatpush1.msra.mxu0 %v2154_v39  ;;  %2321 = vmatprep.mubr.f32.mxu0 %v3070_v19  ;;  %3083 = vtanh.f32 %v1906_v50  ;;  %v1888_v11 = vadd.f32 %v4420_v59, %v1840_v23  ;;  %v2140_v39 = vld [vmem:[%s4825_s4 + $0x650] sm:$0xff]  ;;  %v2075_v59 = vld [vmem:[%s4825_s4 + $0x448] sm:$0xff] }
 0x2e0   :  { %2348 = vmatprep.subr.mxu1 %v2089_v41  ;;  %2437 = vmatprep.subr.mxu0 %v2153_v52  ;;  %3085 = vtanh.f32 %v1903_v1  ;;  %v2074_v41 = vld [vmem:[%s4825_s4 + $0x440] sm:$0xff]  ;;  %v2136_v3 = vld [vmem:[%s4825_s4 + $0x630] sm:$0xff]  ;;  %v2071_v50 = vld [vmem:[%s4825_s4 + $0x428] sm:$0xff] }
 0x2e1   :  { %2233 = vmatmul.mubr.f32.gmra.mxu1 %v3068_v58  ;;  %2322 = vmatmul.mubr.f32.gmra.mxu0 %v3072_v18  ;;  %3087 = vtanh.f32 %v1905_v8  ;;  %v1847_v58 = vmul.f32 %v4429_v4, %v3953_v60  ;;  %v2073_v4 = vld [vmem:[%s4825_s4 + $0x438] sm:$0xff]  ;;  %v2134_v1 = vld [vmem:[%s4825_s4 + $0x620] sm:$0xff]  ;;  %v2131_v32 = vld [vmem:[%s4825_s4 + $0x608] sm:$0xff] }
 0x2e2   :  { %2349 = vmatpush1.msra.mxu1 %v2088_v28  ;;  %2438 = vmatpush1.msra.mxu0 %v2152_v2  ;;  %3089 = vtanh.f32 %v1887_v36  ;;  %v1854_v28 = vmul.f32 %v4455_v40, %v3971_v25  ;;  %v2135_v25 = vld [vmem:[%s4825_s4 + $0x628] sm:$0xff]  ;;  %v2069_v8 = vld [vmem:[%s4825_s4 + $0x418] sm:$0xff] }
 0x2e3   :  { %2350 = vmatprep.subr.mxu1 %v2087_v6  ;;  %2439 = vmatprep.subr.mxu0 %v2151_v7  ;;  %v3074_v22 = vpop.eup %3073  ;;  %3091 = vtanh.f32 %v1888_v11  ;;  %v1895_v60 = vadd.f32 %v4441_v24, %v1847_v58  ;;  %v2072_v24 = vld [vmem:[%s4825_s4 + $0x430] sm:$0xff]  ;;  %v2070_v6 = vld [vmem:[%s4825_s4 + $0x420] sm:$0xff]  ;;  %v2119_v23 = vld [vmem:[%s4825_s4 + $0x5a8] sm:$0xff] }
 0x2e4   :  { %2351 = vmatpush1.msra.mxu1 %v2086_v37  ;;  %2440 = vmatpush1.msra.mxu0 %v2150_v9  ;;  %v3076_v44 = vpop.eup %3075  ;;  %v1902_v2 = vadd.f32 %v4459_v49, %v1854_v28  ;;  %v1861_v37 = vmul.f32 %v4485_v27, %v3978_v53  ;;  %v2133_v9 = vld [vmem:[%s4825_s4 + $0x618] sm:$0xff]  ;;  %v2132_v53 = vld [vmem:[%s4825_s4 + $0x610] sm:$0xff]  ;;  %v2115_v11 = vld [vmem:[%s4825_s4 + $0x588] sm:$0xff] }
 0x2e5   :  { %2352 = vmatprep.subr.mxu1 %v2085_v61  ;;  %2441 = vmatprep.subr.mxu0 %v2149_v45  ;;  %v3078_v46 = vpop.eup %3077  ;;  %3093 = vtanh.f32 %v1895_v60  ;;  %v2068_v61 = vld [vmem:[%s4825_s4 + $0x410] sm:$0xff]  ;;  %v2111_v58 = vld [vmem:[%s4825_s4 + $0x568] sm:$0xff]  ;;  %v1852_v60 = vmul.f32 %v4455_v40, %v3926_v29 }
 0x2e6   :  { %2353 = vmatpush1.msra.mxu1 %v2084_v62  ;;  %2442 = vmatpush1.msra.mxu0 %v2148_v33  ;;  %v3080_v55 = vpop.eup %3079  ;;  %3095 = vtanh.f32 %v1902_v2  ;;  %v1909_v45 = vadd.f32 %v4512_v48, %v1861_v37  ;;  %v2067_v62 = vld [vmem:[%s4825_s4 + $0x408] sm:$0xff]  ;;  %v2066_v33 = vld [vmem:[%s4825_s4 + $0x400] sm:$0xff]  ;;  %v2104_v29 = vld [vmem:[%s4825_s4 + $0x530] sm:$0xff] }
 0x2e7   :  { %2354 = vmatprep.subr.mxu1 %v2083_v17  ;;  %2443 = vmatprep.subr.mxu0 %v2147_v34  ;;  %v2130_v17 = vld [vmem:[%s4825_s4 + $0x600] sm:$0xff]  ;;  %v2129_v34 = vld [vmem:[%s4825_s4 + $0x5f8] sm:$0xff]  ;;  %v2100_v28 = vld [vmem:[%s4825_s4 + $0x510] sm:$0xff] }
 0x2e8   :  { %2355 = vmatpush1.msra.mxu1 %v2082_v47  ;;  %2444 = vmatpush1.msra.mxu0 %v2146_v43  ;;  %v2128_v47 = vld [vmem:[%s4825_s4 + $0x5f0] sm:$0xff]  ;;  %3097 = vtanh.f32 %v1909_v45  ;;  %v3115_v43 = vmov 0.0  }
 0x2e9   :  { %2238 = vmatprep.mubr.f32.mxu1 %v3074_v22  ;;  %2327 = vmatprep.mubr.f32.mxu0 %v3076_v44  ;;  %v2127_v22 = vld [vmem:[%s4825_s4 + $0x5e8] sm:$0xff]  ;;  %v2126_v44 = vld [vmem:[%s4825_s4 + $0x5e0] sm:$0xff]  ;;  %3099 = vtanh.f32 %v4427_v0 }
 0x2ea   :  { %2356 = vmatprep.subr.mxu1 %v2081_v13  ;;  %2445 = vmatprep.subr.mxu0 %v2145_v42  ;;  %v2125_v13 = vld [vmem:[%s4825_s4 + $0x5d8] sm:$0xff]  ;;  %v2123_v42 = vld [vmem:[%s4825_s4 + $0x5c8] sm:$0xff]  ;;  %3101 = vtanh.f32 %v4452_v26  ;;  %v2106_v0 = vld [vmem:[%s4825_s4 + $0x540] sm:$0xff] }
 0x2eb   :  { %2239 = vmatmul.mubr.f32.gmra.mxu1 %v3078_v46  ;;  %2328 = vmatmul.mubr.f32.gmra.mxu0 %v3080_v55  ;;  %v3082_v19 = vpop.eup %3081  ;;  %v2124_v46 = vld [vmem:[%s4825_s4 + $0x5d0] sm:$0xff]  ;;  %v2105_v26 = vld [vmem:[%s4825_s4 + $0x538] sm:$0xff]  ;;  %3103 = vtanh.f32 %v4449_v30  ;;  %v2102_v30 = vld [vmem:[%s4825_s4 + $0x520] sm:$0xff] }
 0x2ec   :  { %2357 = vmatpush1.msra.mxu1 %v2080_v54  ;;  %2446 = vmatpush1.msra.mxu0 %v2144_v56  ;;  %v3084_v52 = vpop.eup %3083  ;;  %v2122_v54 = vld [vmem:[%s4825_s4 + $0x5c0] sm:$0xff]  ;;  %v2121_v56 = vld [vmem:[%s4825_s4 + $0x5b8] sm:$0xff] }
 0x2ed   :  { %2358 = vmatprep.subr.mxu1 %v2079_v14  ;;  %2447 = vmatprep.subr.mxu0 %v2143_v31  ;;  %v3086_v18 = vpop.eup %3085  ;;  %v2120_v14 = vld [vmem:[%s4825_s4 + $0x5b0] sm:$0xff] }
 0x2ee   :  { %2359 = vmatpush1.msra.mxu1 %v2078_v57  ;;  %2448 = vmatpush1.msra.mxu0 %v2142_v12  ;;  %v3088_v15 = vpop.eup %3087  ;;  %v2118_v57 = vld [vmem:[%s4825_s4 + $0x5a0] sm:$0xff]  ;;  %v2117_v12 = vld [vmem:[%s4825_s4 + $0x598] sm:$0xff] }
 0x2ef   :  { %2360 = vmatprep.subr.mxu1 %v2077_v51  ;;  %2449 = vmatprep.subr.mxu0 %v2141_v20  ;;  %v3090_v7 = vpop.eup %3089  ;;  %v2116_v51 = vld [vmem:[%s4825_s4 + $0x590] sm:$0xff] }
 0x2f0   :  { %2361 = vmatpush1.msra.mxu1 %v2076_v38  ;;  %2450 = vmatpush1.msra.mxu0 %v2140_v39  ;;  %v3092_v36 = vpop.eup %3091  ;;  %v2114_v38 = vld [vmem:[%s4825_s4 + $0x580] sm:$0xff]  ;;  %v2113_v39 = vld [vmem:[%s4825_s4 + $0x578] sm:$0xff] }
 0x2f1   :  { %2362 = vmatprep.subr.mxu1 %v2075_v59  ;;  %2451 = vmatprep.subr.mxu0 %v2139_v63  ;;  %v2112_v59 = vld [vmem:[%s4825_s4 + $0x570] sm:$0xff]  ;;  %v2110_v63 = vld [vmem:[%s4825_s4 + $0x560] sm:$0xff] }
 0x2f2   :  { %2363 = vmatpush1.msra.mxu1 %v2074_v41  ;;  %2452 = vmatpush1.msra.mxu0 %v2138_v16  ;;  %v3094_v55 = vpop.eup %3093  ;;  %v1853_v41 = vmul.f32 %v4455_v40, %v3941_v35  ;;  %v2108_v16 = vld [vmem:[%s4825_s4 + $0x550] sm:$0xff]  ;;  %v2107_v35 = vld [vmem:[%s4825_s4 + $0x548] sm:$0xff] }
 0x2f3   :  { %2244 = vmatprep.mubr.f32.mxu1 %v3082_v19  ;;  %2333 = vmatprep.mubr.f32.mxu0 %v3084_v52  ;;  %v3096_v31 = vpop.eup %3095  ;;  %v2109_v19 = vld [vmem:[%s4825_s4 + $0x558] sm:$0xff] }
 0x2f4   :  { %2364 = vmatprep.subr.mxu1 %v2073_v4  ;;  %2453 = vmatprep.subr.mxu0 %v2137_v21  ;;  %v1901_v52 = vadd.f32 %v4459_v49, %v1853_v41  ;;  %v1860_v4 = vmul.f32 %v4485_v27, %v3966_v10  ;;  %v2103_v10 = vld [vmem:[%s4825_s4 + $0x528] sm:$0xff]  ;;  %v1859_v21 = vmul.f32 %v4485_v27, %v3951_v5  ;;  %v2098_v27 = vld [vmem:[%s4825_s4 + $0x500] sm:$0xff] }
 0x2f5   :  { %2245 = vmatmul.mubr.f32.gmra.mxu1 %v3086_v18  ;;  %2334 = vmatmul.mubr.f32.gmra.mxu0 %v3088_v15  ;;  %v3098_v20 = vpop.eup %3097  ;;  %v1900_v18 = vadd.f32 %v4459_v49, %v1852_v60  ;;  %v2101_v49 = vld [vmem:[%s4825_s4 + $0x518] sm:$0xff]  ;;  %v2099_v5 = vld [vmem:[%s4825_s4 + $0x508] sm:$0xff] }
 0x2f6   :  { %2365 = vmatpush1.msra.mxu1 %v2072_v24  ;;  %2454 = vmatpush1.msra.mxu0 %v2136_v3  ;;  %3105 = vtanh.f32 %v1901_v52  ;;  %v1908_v40 = vadd.f32 %v4512_v48, %v1860_v4  ;;  %v1907_v15 = vadd.f32 %v4512_v48, %v1859_v21  ;;  %v3100_v48 = vpop.eup %3099 }
 0x2f7   :  { %2366 = vmatprep.subr.mxu1 %v2071_v50  ;;  %2404 = vmatprep.mubr.f32.mxu1 %v3090_v7  ;;  %3107 = vtanh.f32 %v1900_v18  ;;  %v3102_v24 = vpop.eup %3101 }
 0x2f8   :  { %2455 = vmatprep.subr.mxu0 %v2135_v25  ;;  %2367 = vmatpush1.msra.mxu1 %v2070_v6  ;;  %3109 = vtanh.f32 %v1908_v40  ;;  %v3104_v3 = vpop.eup %3103 }
 0x2f9   :  { %2456 = vmatpush1.msra.mxu0 %v2134_v1  ;;  %2368 = vmatprep.subr.mxu1 %v2069_v8  ;;  %3111 = vtanh.f32 %v1907_v15 }
 0x2fa   :  { %2457 = vmatprep.subr.mxu0 %v2133_v9  ;;  %2369 = vmatpush1.msra.mxu1 %v2068_v61 }
 0x2fb   :  { %2458 = vmatpush1.msra.mxu0 %v2132_v53  ;;  %2370 = vmatprep.subr.mxu1 %v2067_v62 }
 0x2fc   :  { %2459 = vmatprep.subr.mxu0 %v2131_v32  ;;  %2371 = vmatpush1.msra.mxu1 %v2066_v33 }
 0x2fd   :  { %2460 = vmatpush1.msra.mxu0 %v2130_v17  ;;  %2493 = vmatprep.mubr.f32.mxu0 %v3115_v43 }
 0x2fe   :  { %2372 = vmatprep.subr.mxu1 %v2129_v34  ;;  %2494 = vmatmul.mubr.f32.vlgmr.msra.gmra.mxu0 %v3092_v36 }
 0x2ff   :  { %2373 = vmatpush2.msra.mxu1 %v2128_v47  ;;  %2499 = vmatprep.mubr.f32.mxu0 %v3115_v43 }
 0x300   :  { %2374 = vmatprep.subr.mxu1 %v2127_v22 }
 0x301   :  { %2375 = vmatpush2.msra.mxu1 %v2126_v44 }
 0x302   :  { %2376 = vmatprep.subr.mxu1 %v2125_v13  ;;  %2500 = vmatmul.mubr.f32.gmra.mxu0 %v3094_v55 }
 0x303   :  { %2377 = vmatpush2.msra.mxu1 %v2124_v46  ;;  %2505 = vmatprep.mubr.f32.mxu0 %v3115_v43  ;;  %v3106_v50 = vpop.eup %3105 }
 0x304   :  { %2378 = vmatprep.subr.mxu1 %v2123_v42  ;;  %v3108_v2 = vpop.eup %3107 }
 0x305   :  { %2379 = vmatpush2.msra.mxu1 %v2122_v54  ;;  %v3110_v25 = vpop.eup %3109 }
 0x306   :  { %2380 = vmatprep.subr.mxu1 %v2121_v56  ;;  %2506 = vmatmul.mubr.f32.gmra.mxu0 %v3096_v31  ;;  %v3112_v6 = vpop.eup %3111 }
 0x307   :  { %2381 = vmatpush2.msra.mxu1 %v2120_v14  ;;  %2511 = vmatprep.mubr.f32.mxu0 %v3115_v43 }
 0x308   :  { %2382 = vmatprep.subr.mxu1 %v2119_v23 }
 0x309   :  { %2383 = vmatpush2.msra.mxu1 %v2118_v57 }
 0x30a   :  { %2384 = vmatprep.subr.mxu1 %v2117_v12  ;;  %2512 = vmatmul.mubr.f32.gmra.mxu0 %v3098_v20 }
 0x30b   :  { %2385 = vmatpush2.msra.mxu1 %v2116_v51 }
 0x30c   :  { %2386 = vmatprep.subr.mxu1 %v2115_v11 }
 0x30d   :  { %2387 = vmatpush2.msra.mxu1 %v2114_v38 }
 0x30e   :  { %2388 = vmatprep.subr.mxu1 %v2113_v39 }
 0x30f   :  { %2389 = vmatpush2.msra.mxu1 %v2112_v59 }
 0x310   :  { %2390 = vmatprep.subr.mxu1 %v2111_v58 }
 0x311   :  { %2391 = vmatpush2.msra.mxu1 %v2110_v63 }
 0x312   :  { %2392 = vmatprep.subr.mxu1 %v2109_v19 }
 0x313   :  { %2393 = vmatpush2.msra.mxu1 %v2108_v16 }
 0x314   :  { %2394 = vmatprep.subr.mxu1 %v2107_v35 }
 0x315   :  { %2395 = vmatpush2.msra.mxu1 %v2106_v0 }
 0x316   :  { %2396 = vmatprep.subr.mxu1 %v2105_v26 }
 0x317   :  { %2397 = vmatpush2.msra.mxu1 %v2104_v29 }
 0x318   :  { %2398 = vmatprep.subr.mxu1 %v2103_v10 }
 0x319   :  { %2399 = vmatpush2.msra.mxu1 %v2102_v30 }
 0x31a   :  { %2400 = vmatprep.subr.mxu1 %v2101_v49 }
 0x31b   :  { %2401 = vmatpush2.msra.mxu1 %v2100_v28 }
 0x31c   :  { %2402 = vmatprep.subr.mxu1 %v2099_v5 }
 0x31d   :  { %2403 = vmatpush2.msra.mxu1 %v2098_v27 }
 0x31e   :  { %2405 = vmatmul.mubr.f32.vlgmr.msra.gmra.mxu1 %v3100_v48 }
 0x31f   :  { %2410 = vmatprep.mubr.f32.mxu1 %v3102_v24 }
 0x322   :  { %2411 = vmatmul.mubr.f32.gmra.mxu1 %v3104_v3 }
 0x323   :  { %2416 = vmatprep.mubr.f32.mxu1 %v3106_v50 }
 0x326   :  { %2417 = vmatmul.mubr.f32.gmra.mxu1 %v3108_v2 }
 0x327   :  { %2422 = vmatprep.mubr.f32.mxu1 %v3110_v25 }
 0x32a   :  { %2423 = vmatmul.mubr.f32.gmra.mxu1 %v3112_v6 }
 0x396   :  { %v2228_v9 = vpop.f32.mrf.mxu1 }
 0x398   :  { %v2317_v1 = vpop.f32.mrf.mxu0  ;;  %v2230_v53 = vpop.f32.mrf.mxu1 }
 0x399   :  { %v2318_v46 = vadd.f32 %v2317_v1, %v2228_v9 }
 0x39a   :  { %v2319_v7 = vpop.f32.mrf.mxu0 }
 0x39b   :  { %v2320_v54 = vadd.f32 %v2319_v7, %v2230_v53 }
 0x3a1   :  { %v2323_v37 = vpop.f32.mrf.mxu0  ;;  %v2234_v62 = vpop.f32.mrf.mxu1 }
 0x3a2   :  { %v2324_v23 = vadd.f32 %v2323_v37, %v2234_v62 }
 0x3a3   :  { %v2325_v8 = vpop.f32.mrf.mxu0  ;;  %v2236_v33 = vpop.f32.mrf.mxu1 }
 0x3a4   :  { %v2326_v11 = vadd.f32 %v2325_v8, %v2236_v33 }
 0x3ab   :  { %v2329_v61 = vpop.f32.mrf.mxu0  ;;  %v2240_v34 = vpop.f32.mrf.mxu1 }
 0x3ac   :  { %v2330_v59 = vadd.f32 %v2329_v61, %v2240_v34 }
 0x3ad   :  { %v2331_v45 = vpop.f32.mrf.mxu0  ;;  %v2242_v22 = vpop.f32.mrf.mxu1 }
 0x3ae   :  { %v2332_v16 = vadd.f32 %v2331_v45, %v2242_v22 }
 0x3b5   :  { %v2335_v32 = vpop.f32.mrf.mxu0  ;;  %v2246_v43 = vpop.f32.mrf.mxu1 }
 0x3b6   :  { %v2336_v0 = vadd.f32 %v2335_v32, %v2246_v43 }
 0x3b7   :  { %v2337_v17 = vpop.f32.mrf.mxu0  ;;  %v2248_v13 = vpop.f32.mrf.mxu1 }
 0x3b8   :  { %v2338_v40 = vadd.f32 %v2337_v17, %v2248_v13 }
 0x3be   :  { %v2495_v47 = vpop.f32.mrf.mxu0 }
 0x3c0   :  { %v2497_v36 = vpop.f32.mrf.mxu0 }
 0x3c2   :  { %v2501_v44 = vpop.f32.mrf.mxu0 }
 0x3c4   :  { %v2503_v42 = vpop.f32.mrf.mxu0 }
 0x3c6   :  { %v2507_v12 = vpop.f32.mrf.mxu0 }
 0x3c8   :  { %v2509_v41 = vpop.f32.mrf.mxu0 }
 0x3ca   :  { %v2513_v18 = vpop.f32.mrf.mxu0 }
 0x3cc   :  { %v2515_v28 = vpop.f32.mrf.mxu0 }
 0x3de   :  { %v2406_v55 = vpop.f32.mrf.mxu1 }
 0x3df   :  { %v2407_v56 = vadd.f32 %v2406_v55, %v2318_v46 }
 0x3e0   :  { %v2408_v14 = vpop.f32.mrf.mxu1 }
 0x3e1   :  { %v2496_v31 = vadd.f32 %v2495_v47, %v2407_v56  ;;  %v2409_v57 = vadd.f32 %v2408_v14, %v2320_v54 }
 0x3e2   :  { %v2412_v51 = vpop.f32.mrf.mxu1 }
 0x3e3   :  { %2518 = vst [vmem:[%s4828_s5] sm:$0xff] %v2496_v31  ;;  %v2498_v20 = vadd.f32 %v2497_v36, %v2409_v57  ;;  %v2413_v38 = vadd.f32 %v2412_v51, %v2324_v23 }
 0x3e4   :  { %v2414_v39 = vpop.f32.mrf.mxu1 }
 0x3e5   :  { %2519 = vst [vmem:[%s4828_s5 + $0x8] sm:$0xff] %v2498_v20  ;;  %v2502_v58 = vadd.f32 %v2501_v44, %v2413_v38  ;;  %v2415_v63 = vadd.f32 %v2414_v39, %v2326_v11 }
 0x3e6   :  { %v2418_v19 = vpop.f32.mrf.mxu1 }
 0x3e7   :  { %2520 = vst [vmem:[%s4828_s5 + $0x10] sm:$0xff] %v2502_v58  ;;  %v2504_v52 = vadd.f32 %v2503_v42, %v2415_v63  ;;  %v2419_v35 = vadd.f32 %v2418_v19, %v2330_v59 }
 0x3e8   :  { %v2420_v60 = vpop.f32.mrf.mxu1 }
 0x3e9   :  { %2521 = vst [vmem:[%s4828_s5 + $0x18] sm:$0xff] %v2504_v52  ;;  %v2508_v4 = vadd.f32 %v2507_v12, %v2419_v35  ;;  %v2421_v26 = vadd.f32 %v2420_v60, %v2332_v16 }
 0x3ea   :  { %v2424_v29 = vpop.f32.mrf.mxu1 }
 0x3eb   :  { %2522 = vst [vmem:[%s4828_s5 + $0x20] sm:$0xff] %v2508_v4  ;;  %v2510_v10 = vadd.f32 %v2509_v41, %v2421_v26  ;;  %v2425_v21 = vadd.f32 %v2424_v29, %v2336_v0 }
 0x3ec   :  { %v2426_v30 = vpop.f32.mrf.mxu1 }
 0x3ed   :  { %2523 = vst [vmem:[%s4828_s5 + $0x28] sm:$0xff] %v2510_v10  ;;  %v2514_v49 = vadd.f32 %v2513_v18, %v2425_v21  ;;  %v2427_v15 = vadd.f32 %v2426_v30, %v2338_v40 }
 0x3ef   :  { %2524 = vst [vmem:[%s4828_s5 + $0x30] sm:$0xff] %v2514_v49  ;;  %v2516_v5 = vadd.f32 %v2515_v28, %v2427_v15 }
 0x3f1   :  { %2525 = vst [vmem:[%s4828_s5 + $0x38] sm:$0xff] %v2516_v5 }

</bundles_post_ra>
